<compile_context>
chip_gen: v5e
topology: v5e:2x2
jax: 0.10.0
libtpu: 0.0.40
codegen_flags: <defaults>
</compile_context>

<pallas_src>
import math
import functools

import jax
import jax.numpy as jnp
from jax.experimental import pallas as pl
from jax.experimental.pallas import tpu as pltpu


# ------------------------------------------------------------------
# Pallas kernel: one full decoder layer, all batch elements at once.
# Activations arrive in seq-first (L, N, E) layout.
# ------------------------------------------------------------------
def _decoder_layer_kernel(
    tgt_ref, mem_ref, qpos_ref, pos_ref,
    sa_wq_ref, sa_bq_ref, sa_wk_ref, sa_bk_ref, sa_wv_ref, sa_bv_ref,
    sa_wo_ref, sa_bo_ref,
    ca_wq_ref, ca_bq_ref, ca_wk_ref, ca_bk_ref, ca_wv_ref, ca_bv_ref,
    ca_wo_ref, ca_bo_ref,
    w1_ref, b1_ref, w2_ref, b2_ref,
    g1_ref, be1_ref, g2_ref, be2_ref, g3_ref, be3_ref,
    out_ref,
    *, n_head):
    f32 = jnp.float32
    bf16 = jnp.bfloat16

    l_t, n, e = tgt_ref.shape
    l_m = mem_ref.shape[0]
    hd = e // n_head
    m_t = l_t * n
    m_m = l_m * n

    # Flatten batch into the matmul M dimension (row index = l * n + b).
    tgt = tgt_ref[...].reshape(m_t, e).astype(f32)
    mem = mem_ref[...].reshape(m_m, e).astype(f32)
    qpos = qpos_ref[...].reshape(m_t, e).astype(f32)
    pos = pos_ref[...].reshape(m_m, e).astype(f32)

    def mm(x, w_ref):
        # activations cast to bf16 for the MXU, weights already bf16, f32 accum.
        return jnp.dot(x.astype(bf16), w_ref[...], preferred_element_type=f32)

    def layer_norm(x, g_ref, b_ref):
        mu = jnp.mean(x, axis=-1, keepdims=True)
        xc = x - mu
        var = jnp.mean(xc * xc, axis=-1, keepdims=True)
        return xc * jax.lax.rsqrt(var + 1e-5) * g_ref[...] + b_ref[...]

    def split_heads(x2d, length):
        # (L*N, E) -> (N*H, L, hd); cast to bf16 BEFORE the relayout.
        xh = x2d.astype(bf16).reshape(length, n, n_head, hd)
        return jnp.transpose(xh, (1, 2, 0, 3)).reshape(n * n_head, length, hd)

    def attention(q, k, v, lq, lk, wo_ref, bo_ref):
        # q/k/v: (L*N, E) f32; Q already carries the 1/sqrt(hd) scale.
        qh = split_heads(q, lq)                         # (N*H, Lq, hd) bf16
        kh = split_heads(k, lk)                         # (N*H, Lk, hd) bf16
        vh = split_heads(v, lk)                         # (N*H, Lk, hd) bf16
        s = jnp.einsum('bqd,bkd->bqk', qh, kh,
                       preferred_element_type=f32)      # (N*H, Lq, Lk) f32
        s = s - jnp.max(s, axis=-1, keepdims=True)
        p = jnp.exp(s)
        inv = pl.reciprocal(jnp.sum(p, axis=-1, keepdims=True), approx=True)
        p = p * inv
        ctx = jnp.einsum('bqk,bkd->bqd', p.astype(bf16), vh,
                         preferred_element_type=f32)    # (N*H, Lq, hd) f32
        # back to (L*N, E); do the relayout in bf16 (output proj input anyway).
        ctx = ctx.astype(bf16).reshape(n, n_head, lq, hd)
        ctx = jnp.transpose(ctx, (2, 0, 1, 3)).reshape(lq * n, e)
        return jnp.dot(ctx, wo_ref[...],
                       preferred_element_type=f32) + bo_ref[...]

    # --- self-attention block (forward_post) ---
    x = tgt + qpos
    q = mm(x, sa_wq_ref) + sa_bq_ref[...]
    k = mm(x, sa_wk_ref) + sa_bk_ref[...]
    v = mm(tgt, sa_wv_ref) + sa_bv_ref[...]
    tgt2 = attention(q, k, v, l_t, l_t, sa_wo_ref, sa_bo_ref)
    tgt = layer_norm(tgt + tgt2, g1_ref, be1_ref)       # dropout1 == identity

    # --- cross-attention block ---
    q = mm(tgt + qpos, ca_wq_ref) + ca_bq_ref[...]
    k = mm(mem + pos, ca_wk_ref) + ca_bk_ref[...]
    v = mm(mem, ca_wv_ref) + ca_bv_ref[...]
    tgt2 = attention(q, k, v, l_t, l_m, ca_wo_ref, ca_bo_ref)
    tgt = layer_norm(tgt + tgt2, g2_ref, be2_ref)       # dropout2 == identity

    # --- feed-forward block (relu) ---
    h = jnp.maximum(mm(tgt, w1_ref) + b1_ref[...], 0.0)
    tgt2 = mm(h, w2_ref) + b2_ref[...]
    tgt = layer_norm(tgt + tgt2, g3_ref, be3_ref)       # dropout3 == identity

    out_ref[...] = tgt.reshape(l_t, n, e).astype(out_ref.dtype)


# ------------------------------------------------------------------
# One-time parameter conversion (hoisted out of the forward path).
# All matmul weights are stored pre-transposed as (E_in, E_out) bf16;
# the 1/sqrt(head_dim) scale is folded into Wq / bq.
# ------------------------------------------------------------------
def pack_decoder_params(params, *, d_model, n_head):
    (sa_wi, sa_bi, sa_wo, sa_bo,
     ca_wi, ca_bi, ca_wo, ca_bo,
     w1, b1, w2, b2,
     g1, be1, g2, be2, g3, be3) = params
    e = d_model
    hd = e // n_head
    scale = 1.0 / math.sqrt(hd)
    f32 = jnp.float32
    bf16 = jnp.bfloat16

    def tb(w):
        return w.T.astype(bf16)

    sa_wq = (sa_wi[0:e, :].T * scale).astype(bf16)
    sa_bq = (sa_bi[:, 0:e] * scale).astype(f32)
    sa_wk = tb(sa_wi[e:2 * e, :]);     sa_bk = sa_bi[:, e:2 * e].astype(f32)
    sa_wv = tb(sa_wi[2 * e:3 * e, :]); sa_bv = sa_bi[:, 2 * e:3 * e].astype(f32)
    sa_wo_t = tb(sa_wo)

    ca_wq = (ca_wi[0:e, :].T * scale).astype(bf16)
    ca_bq = (ca_bi[:, 0:e] * scale).astype(f32)
    ca_wk = tb(ca_wi[e:2 * e, :]);     ca_bk = ca_bi[:, e:2 * e].astype(f32)
    ca_wv = tb(ca_wi[2 * e:3 * e, :]); ca_bv = ca_bi[:, 2 * e:3 * e].astype(f32)
    ca_wo_t = tb(ca_wo)

    w1_t = tb(w1)
    w2_t = tb(w2)

    return (sa_wq, sa_bq, sa_wk, sa_bk, sa_wv, sa_bv, sa_wo_t, sa_bo.astype(f32),
            ca_wq, ca_bq, ca_wk, ca_bk, ca_wv, ca_bv, ca_wo_t, ca_bo.astype(f32),
            w1_t, b1.astype(f32), w2_t, b2.astype(f32),
            g1.astype(f32), be1.astype(f32),
            g2.astype(f32), be2.astype(f32),
            g3.astype(f32), be3.astype(f32))


# ------------------------------------------------------------------
# Wrapper: pallas_call with full-array BlockSpecs (no wrapper transposes).
# ------------------------------------------------------------------
def transformer_decoder_layer(tgt, memory, pos, query_pos, packed_params, *,
                              n_head):
    """tgt/query_pos: (L_t, N, E); memory/pos: (L_m, N, E). Returns (L_t, N, E)."""
    l_t, n, e = tgt.shape

    inputs = (tgt, memory, query_pos, pos) + tuple(packed_params)

    def full_spec(x):
        zeros = (0,) * x.ndim
        return pl.BlockSpec(x.shape, lambda i, _z=zeros: _z)

    in_specs = [full_spec(x) for x in inputs]
    out_spec = pl.BlockSpec((l_t, n, e), lambda i: (0, 0, 0))

    # Explicit VMEM budget with headroom (inputs are double-buffered by the
    # pipeliner; intermediates / relayouts need extra scratch).
    io_bytes = sum(int(x.size) * x.dtype.itemsize for x in inputs)
    io_bytes += l_t * n * e * 4
    vmem_limit = max(32 * 1024 * 1024, 4 * io_bytes + (8 << 20))

    kernel = functools.partial(_decoder_layer_kernel, n_head=n_head)

    return pl.pallas_call(
        kernel,
        out_shape=jax.ShapeDtypeStruct((l_t, n, e), jnp.float32),
        grid=(1,),
        in_specs=in_specs,
        out_specs=out_spec,
        compiler_params=pltpu.CompilerParams(
            dimension_semantics=("arbitrary",),
            vmem_limit_bytes=int(vmem_limit)),
    )(*inputs)


# ------------------------------------------------------------------
# Pure-JAX f32 reference (PyTorch semantics, seq-first layout)
# ------------------------------------------------------------------
def _ref_mha(q, k, v, w_in, b_in, w_out, b_out, n_head):
    lq, nb, e = q.shape
    lk = k.shape[0]
    hd = e // n_head

    def proj(x, w, b):
        return jnp.einsum('lne,fe->lnf', x, w) + b

    qp = proj(q, w_in[0:e], b_in[0, 0:e]) * (1.0 / math.sqrt(hd))
    kp = proj(k, w_in[e:2 * e], b_in[0, e:2 * e])
    vp = proj(v, w_in[2 * e:3 * e], b_in[0, 2 * e:3 * e])

    def split(x, length):
        return jnp.transpose(x.reshape(length, nb, n_head, hd), (1, 2, 0, 3))

    qh, kh, vh = split(qp, lq), split(kp, lk), split(vp, lk)
    s = jnp.einsum('nhqd,nhkd->nhqk', qh, kh)
    p = jax.nn.softmax(s, axis=-1)
    ctx = jnp.einsum('nhqk,nhkd->nhqd', p, vh)
    ctx = jnp.transpose(ctx, (2, 0, 1, 3)).reshape(lq, nb, e)
    return jnp.einsum('lne,fe->lnf', ctx, w_out) + b_out[0]


def _reference_decoder_layer(tgt, memory, pos, query_pos, params, n_head):
    (sa_wi, sa_bi, sa_wo, sa_bo, ca_wi, ca_bi, ca_wo, ca_bo,
     w1, b1, w2, b2, g1, be1, g2, be2, g3, be3) = params

    def ln(x, g, b):
        mu = jnp.mean(x, axis=-1, keepdims=True)
        xc = x - mu
        var = jnp.mean(xc * xc, axis=-1, keepdims=True)
        return xc * jax.lax.rsqrt(var + 1e-5) * g[0] + b[0]

    q = tgt + query_pos
    t2 = _ref_mha(q, q, tgt, sa_wi, sa_bi, sa_wo, sa_bo, n_head)
    t = ln(tgt + t2, g1, be1)
    t2 = _ref_mha(t + query_pos, memory + pos, memory,
                  ca_wi, ca_bi, ca_wo, ca_bo, n_head)
    t = ln(t + t2, g2, be2)
    h = jnp.maximum(jnp.einsum('lne,fe->lnf', t, w1) + b1[0], 0.0)
    t2 = jnp.einsum('lnf,ef->lne', h, w2) + b2[0]
    t = ln(t + t2, g3, be3)
    return t


# ------------------------------------------------------------------
# deterministic parameter construction + test harness
# ------------------------------------------------------------------
def make_params(key, d_model, dim_ff):
    keys = jax.random.split(key, 12)
    f32 = jnp.float32

    def w(k, shape, scl=0.1):
        return (scl * jax.random.normal(k, shape)).astype(f32)

    sa_wi = w(keys[0], (3 * d_model, d_model))
    sa_bi = w(keys[1], (1, 3 * d_model), 0.02)
    sa_wo = w(keys[2], (d_model, d_model))
    sa_bo = w(keys[3], (1, d_model), 0.02)
    ca_wi = w(keys[4], (3 * d_model, d_model))
    ca_bi = w(keys[5], (1, 3 * d_model), 0.02)
    ca_wo = w(keys[6], (d_model, d_model))
    ca_bo = w(keys[7], (1, d_model), 0.02)
    w1 = w(keys[8], (dim_ff, d_model))
    b1 = w(keys[9], (1, dim_ff), 0.02)
    w2 = w(keys[10], (d_model, dim_ff))
    b2 = w(keys[11], (1, d_model), 0.02)
    ones = jnp.ones((1, d_model), f32)
    zeros = jnp.zeros((1, d_model), f32)
    return (sa_wi, sa_bi, sa_wo, sa_bo,
            ca_wi, ca_bi, ca_wo, ca_bo,
            w1, b1, w2, b2,
            ones, zeros, ones, zeros, ones, zeros)


if __name__ == "__main__":
    d_model, n_head, dim_ff = 32, 4, 64
    l_t, l_m, batch = 8, 16, 2

    key = jax.random.PRNGKey(0)
    k_tgt, k_mem, k_qp, k_pos, k_par = jax.random.split(key, 5)
    tgt = jax.random.normal(k_tgt, (l_t, batch, d_model), jnp.float32)
    memory = jax.random.normal(k_mem, (l_m, batch, d_model), jnp.float32)
    query_pos = jax.random.normal(k_qp, (l_t, batch, d_model), jnp.float32)
    pos = jax.random.normal(k_pos, (l_m, batch, d_model), jnp.float32)
    params = make_params(k_par, d_model, dim_ff)

    # One-time parameter conversion (not part of the per-call forward path).
    packed = pack_decoder_params(params, d_model=d_model, n_head=n_head)
    packed = jax.block_until_ready(packed)

    out = transformer_decoder_layer(tgt, memory, pos, query_pos, packed,
                                    n_head=n_head)
    out = jax.block_until_ready(out)

    ref = _reference_decoder_layer(tgt, memory, pos, query_pos, params, n_head)

    assert out.shape == (l_t, batch, d_model)
    # Kernel uses bf16 MXU operands (f32 accumulation) + approx reciprocal,
    # so compare against the f32 reference with a correspondingly loose tol.
    assert jnp.allclose(out, ref, rtol=2e-2, atol=2e-2), "mismatch vs reference"
    print("KERNEL_OK")
</pallas_src>

<mosaic_0001>
module attributes {stable_mosaic.version = 11 : i64} {
  func.func @_decoder_layer_kernel(%arg0: i32, %arg1: memref<8x2x32xf32, #tpu.memory_space<vmem>>, %arg2: memref<16x2x32xf32, #tpu.memory_space<vmem>>, %arg3: memref<8x2x32xf32, #tpu.memory_space<vmem>>, %arg4: memref<16x2x32xf32, #tpu.memory_space<vmem>>, %arg5: memref<32x32xbf16, #tpu.memory_space<vmem>>, %arg6: memref<1x32xf32, #tpu.memory_space<vmem>>, %arg7: memref<32x32xbf16, #tpu.memory_space<vmem>>, %arg8: memref<1x32xf32, #tpu.memory_space<vmem>>, %arg9: memref<32x32xbf16, #tpu.memory_space<vmem>>, %arg10: memref<1x32xf32, #tpu.memory_space<vmem>>, %arg11: memref<32x32xbf16, #tpu.memory_space<vmem>>, %arg12: memref<1x32xf32, #tpu.memory_space<vmem>>, %arg13: memref<32x32xbf16, #tpu.memory_space<vmem>>, %arg14: memref<1x32xf32, #tpu.memory_space<vmem>>, %arg15: memref<32x32xbf16, #tpu.memory_space<vmem>>, %arg16: memref<1x32xf32, #tpu.memory_space<vmem>>, %arg17: memref<32x32xbf16, #tpu.memory_space<vmem>>, %arg18: memref<1x32xf32, #tpu.memory_space<vmem>>, %arg19: memref<32x32xbf16, #tpu.memory_space<vmem>>, %arg20: memref<1x32xf32, #tpu.memory_space<vmem>>, %arg21: memref<32x64xbf16, #tpu.memory_space<vmem>>, %arg22: memref<1x64xf32, #tpu.memory_space<vmem>>, %arg23: memref<64x32xbf16, #tpu.memory_space<vmem>>, %arg24: memref<1x32xf32, #tpu.memory_space<vmem>>, %arg25: memref<1x32xf32, #tpu.memory_space<vmem>>, %arg26: memref<1x32xf32, #tpu.memory_space<vmem>>, %arg27: memref<1x32xf32, #tpu.memory_space<vmem>>, %arg28: memref<1x32xf32, #tpu.memory_space<vmem>>, %arg29: memref<1x32xf32, #tpu.memory_space<vmem>>, %arg30: memref<1x32xf32, #tpu.memory_space<vmem>>, %arg31: memref<8x2x32xf32, #tpu.memory_space<vmem>>) attributes {dimension_semantics = [#tpu.dimension_semantics<arbitrary>], iteration_bounds = array<i64: 1>, scalar_prefetch = 0 : i64, scratch_operands = 0 : i64, tpu.core_type = #tpu.core_type<tc>, window_params = [{pipeline_mode = #tpu.pipeline_mode<synchronous>, transform_indices = @transform_0, window_bounds = array<i64: 8, 2, 32>}, {pipeline_mode = #tpu.pipeline_mode<synchronous>, transform_indices = @transform_1, window_bounds = array<i64: 16, 2, 32>}, {pipeline_mode = #tpu.pipeline_mode<synchronous>, transform_indices = @transform_2, window_bounds = array<i64: 8, 2, 32>}, {pipeline_mode = #tpu.pipeline_mode<synchronous>, transform_indices = @transform_3, window_bounds = array<i64: 16, 2, 32>}, {pipeline_mode = #tpu.pipeline_mode<synchronous>, transform_indices = @transform_4, window_bounds = array<i64: 32, 32>}, {pipeline_mode = #tpu.pipeline_mode<synchronous>, transform_indices = @transform_5, window_bounds = array<i64: 1, 32>}, {pipeline_mode = #tpu.pipeline_mode<synchronous>, transform_indices = @transform_6, window_bounds = array<i64: 32, 32>}, {pipeline_mode = #tpu.pipeline_mode<synchronous>, transform_indices = @transform_7, window_bounds = array<i64: 1, 32>}, {pipeline_mode = #tpu.pipeline_mode<synchronous>, transform_indices = @transform_8, window_bounds = array<i64: 32, 32>}, {pipeline_mode = #tpu.pipeline_mode<synchronous>, transform_indices = @transform_9, window_bounds = array<i64: 1, 32>}, {pipeline_mode = #tpu.pipeline_mode<synchronous>, transform_indices = @transform_10, window_bounds = array<i64: 32, 32>}, {pipeline_mode = #tpu.pipeline_mode<synchronous>, transform_indices = @transform_11, window_bounds = array<i64: 1, 32>}, {pipeline_mode = #tpu.pipeline_mode<synchronous>, transform_indices = @transform_12, window_bounds = array<i64: 32, 32>}, {pipeline_mode = #tpu.pipeline_mode<synchronous>, transform_indices = @transform_13, window_bounds = array<i64: 1, 32>}, {pipeline_mode = #tpu.pipeline_mode<synchronous>, transform_indices = @transform_14, window_bounds = array<i64: 32, 32>}, {pipeline_mode = #tpu.pipeline_mode<synchronous>, transform_indices = @transform_15, window_bounds = array<i64: 1, 32>}, {pipeline_mode = #tpu.pipeline_mode<synchronous>, transform_indices = @transform_16, window_bounds = array<i64: 32, 32>}, {pipeline_mode = #tpu.pipeline_mode<synchronous>, transform_indices = @transform_17, window_bounds = array<i64: 1, 32>}, {pipeline_mode = #tpu.pipeline_mode<synchronous>, transform_indices = @transform_18, window_bounds = array<i64: 32, 32>}, {pipeline_mode = #tpu.pipeline_mode<synchronous>, transform_indices = @transform_19, window_bounds = array<i64: 1, 32>}, {pipeline_mode = #tpu.pipeline_mode<synchronous>, transform_indices = @transform_20, window_bounds = array<i64: 32, 64>}, {pipeline_mode = #tpu.pipeline_mode<synchronous>, transform_indices = @transform_21, window_bounds = array<i64: 1, 64>}, {pipeline_mode = #tpu.pipeline_mode<synchronous>, transform_indices = @transform_22, window_bounds = array<i64: 64, 32>}, {pipeline_mode = #tpu.pipeline_mode<synchronous>, transform_indices = @transform_23, window_bounds = array<i64: 1, 32>}, {pipeline_mode = #tpu.pipeline_mode<synchronous>, transform_indices = @transform_24, window_bounds = array<i64: 1, 32>}, {pipeline_mode = #tpu.pipeline_mode<synchronous>, transform_indices = @transform_25, window_bounds = array<i64: 1, 32>}, {pipeline_mode = #tpu.pipeline_mode<synchronous>, transform_indices = @transform_26, window_bounds = array<i64: 1, 32>}, {pipeline_mode = #tpu.pipeline_mode<synchronous>, transform_indices = @transform_27, window_bounds = array<i64: 1, 32>}, {pipeline_mode = #tpu.pipeline_mode<synchronous>, transform_indices = @transform_28, window_bounds = array<i64: 1, 32>}, {pipeline_mode = #tpu.pipeline_mode<synchronous>, transform_indices = @transform_29, window_bounds = array<i64: 1, 32>}, {pipeline_mode = #tpu.pipeline_mode<synchronous>, transform_indices = @transform_30, window_bounds = array<i64: 8, 2, 32>}]} {
    %c0 = arith.constant 0 : index
    %c0_0 = arith.constant 0 : index
    %c0_1 = arith.constant 0 : index
    %0 = vector.load %arg1[%c0, %c0_0, %c0_1] : memref<8x2x32xf32, #tpu.memory_space<vmem>>, vector<8x2x32xf32>
    %1 = vector.shape_cast %0 : vector<8x2x32xf32> to vector<16x32xf32>
    %c0_2 = arith.constant 0 : index
    %c0_3 = arith.constant 0 : index
    %c0_4 = arith.constant 0 : index
    %2 = vector.load %arg2[%c0_2, %c0_3, %c0_4] : memref<16x2x32xf32, #tpu.memory_space<vmem>>, vector<16x2x32xf32>
    %3 = vector.shape_cast %2 : vector<16x2x32xf32> to vector<32x32xf32>
    %c0_5 = arith.constant 0 : index
    %c0_6 = arith.constant 0 : index
    %c0_7 = arith.constant 0 : index
    %4 = vector.load %arg3[%c0_5, %c0_6, %c0_7] : memref<8x2x32xf32, #tpu.memory_space<vmem>>, vector<8x2x32xf32>
    %5 = vector.shape_cast %4 : vector<8x2x32xf32> to vector<16x32xf32>
    %c0_8 = arith.constant 0 : index
    %c0_9 = arith.constant 0 : index
    %c0_10 = arith.constant 0 : index
    %6 = vector.load %arg4[%c0_8, %c0_9, %c0_10] : memref<16x2x32xf32, #tpu.memory_space<vmem>>, vector<16x2x32xf32>
    %7 = vector.shape_cast %6 : vector<16x2x32xf32> to vector<32x32xf32>
    %8 = arith.addf %1, %5 : vector<16x32xf32>
    %9 = arith.truncf %8 : vector<16x32xf32> to vector<16x32xbf16>
    %c0_11 = arith.constant 0 : index
    %c0_12 = arith.constant 0 : index
    %10 = vector.load %arg5[%c0_11, %c0_12] : memref<32x32xbf16, #tpu.memory_space<vmem>>, vector<32x32xbf16>
    %cst = arith.constant dense<0.000000e+00> : vector<16x32xf32>
    %11 = tpu.matmul %9, %10, %cst {dimension_numbers = #tpu.dot_dimension_numbers<[1], [0], [0], [1], [0, 0, 1, 1], [], []>} : vector<16x32xbf16>, vector<32x32xbf16>, vector<16x32xf32> -> vector<16x32xf32>
    %c0_13 = arith.constant 0 : index
    %c0_14 = arith.constant 0 : index
    %12 = vector.load %arg6[%c0_13, %c0_14] : memref<1x32xf32, #tpu.memory_space<vmem>>, vector<1x32xf32>
    %13 = vector.broadcast %12 : vector<1x32xf32> to vector<16x32xf32>
    %14 = arith.addf %11, %13 : vector<16x32xf32>
    %15 = arith.truncf %8 : vector<16x32xf32> to vector<16x32xbf16>
    %c0_15 = arith.constant 0 : index
    %c0_16 = arith.constant 0 : index
    %16 = vector.load %arg7[%c0_15, %c0_16] : memref<32x32xbf16, #tpu.memory_space<vmem>>, vector<32x32xbf16>
    %cst_17 = arith.constant dense<0.000000e+00> : vector<16x32xf32>
    %17 = tpu.matmul %15, %16, %cst_17 {dimension_numbers = #tpu.dot_dimension_numbers<[1], [0], [0], [1], [0, 0, 1, 1], [], []>} : vector<16x32xbf16>, vector<32x32xbf16>, vector<16x32xf32> -> vector<16x32xf32>
    %c0_18 = arith.constant 0 : index
    %c0_19 = arith.constant 0 : index
    %18 = vector.load %arg8[%c0_18, %c0_19] : memref<1x32xf32, #tpu.memory_space<vmem>>, vector<1x32xf32>
    %19 = vector.broadcast %18 : vector<1x32xf32> to vector<16x32xf32>
    %20 = arith.addf %17, %19 : vector<16x32xf32>
    %21 = arith.truncf %1 : vector<16x32xf32> to vector<16x32xbf16>
    %c0_20 = arith.constant 0 : index
    %c0_21 = arith.constant 0 : index
    %22 = vector.load %arg9[%c0_20, %c0_21] : memref<32x32xbf16, #tpu.memory_space<vmem>>, vector<32x32xbf16>
    %cst_22 = arith.constant dense<0.000000e+00> : vector<16x32xf32>
    %23 = tpu.matmul %21, %22, %cst_22 {dimension_numbers = #tpu.dot_dimension_numbers<[1], [0], [0], [1], [0, 0, 1, 1], [], []>} : vector<16x32xbf16>, vector<32x32xbf16>, vector<16x32xf32> -> vector<16x32xf32>
    %c0_23 = arith.constant 0 : index
    %c0_24 = arith.constant 0 : index
    %24 = vector.load %arg10[%c0_23, %c0_24] : memref<1x32xf32, #tpu.memory_space<vmem>>, vector<1x32xf32>
    %25 = vector.broadcast %24 : vector<1x32xf32> to vector<16x32xf32>
    %26 = arith.addf %23, %25 : vector<16x32xf32>
    %27 = arith.truncf %14 : vector<16x32xf32> to vector<16x32xbf16>
    %28 = vector.shape_cast %27 : vector<16x32xbf16> to vector<8x2x4x8xbf16>
    %29 = tpu.transpose %28, [1, 2, 0, 3] : vector<8x2x4x8xbf16> -> vector<2x4x8x8xbf16>
    %30 = vector.shape_cast %29 : vector<2x4x8x8xbf16> to vector<8x8x8xbf16>
    %31 = arith.truncf %20 : vector<16x32xf32> to vector<16x32xbf16>
    %32 = vector.shape_cast %31 : vector<16x32xbf16> to vector<8x2x4x8xbf16>
    %33 = tpu.transpose %32, [1, 2, 0, 3] : vector<8x2x4x8xbf16> -> vector<2x4x8x8xbf16>
    %34 = vector.shape_cast %33 : vector<2x4x8x8xbf16> to vector<8x8x8xbf16>
    %35 = arith.truncf %26 : vector<16x32xf32> to vector<16x32xbf16>
    %36 = vector.shape_cast %35 : vector<16x32xbf16> to vector<8x2x4x8xbf16>
    %37 = tpu.transpose %36, [1, 2, 0, 3] : vector<8x2x4x8xbf16> -> vector<2x4x8x8xbf16>
    %38 = vector.shape_cast %37 : vector<2x4x8x8xbf16> to vector<8x8x8xbf16>
    "tpu.trace_start"() <{level = 10 : i32, message = "bqd,bkd->bqk"}> : () -> ()
    %cst_25 = arith.constant dense<0.000000e+00> : vector<8x8x8xf32>
    %39 = tpu.matmul %30, %34, %cst_25 {dimension_numbers = #tpu.dot_dimension_numbers<[2], [2], [1], [1], [0, 0, 0, 1, 1, 1], [0], [0]>} : vector<8x8x8xbf16>, vector<8x8x8xbf16>, vector<8x8x8xf32> -> vector<8x8x8xf32>
    "tpu.trace_stop"() : () -> ()
    %cst_26 = arith.constant dense<0xFF800000> : vector<8x8xf32>
    %40 = vector.multi_reduction <maximumf>, %39, %cst_26 [2] : vector<8x8x8xf32> to vector<8x8xf32>
    %41 = vector.shape_cast %40 : vector<8x8xf32> to vector<8x8x1xf32>
    %42 = vector.broadcast %41 : vector<8x8x1xf32> to vector<8x8x8xf32>
    %43 = arith.subf %39, %42 : vector<8x8x8xf32>
    %44 = math.exp %43 : vector<8x8x8xf32>
    %cst_27 = arith.constant dense<0.000000e+00> : vector<8x8xf32>
    %45 = vector.multi_reduction <add>, %44, %cst_27 [2] : vector<8x8x8xf32> to vector<8x8xf32>
    %46 = vector.shape_cast %45 : vector<8x8xf32> to vector<8x8x1xf32>
    %47 = tpu.reciprocal %46 {approx = true} : vector<8x8x1xf32> -> vector<8x8x1xf32>
    %48 = vector.broadcast %47 : vector<8x8x1xf32> to vector<8x8x8xf32>
    %49 = arith.mulf %44, %48 : vector<8x8x8xf32>
    %50 = arith.truncf %49 : vector<8x8x8xf32> to vector<8x8x8xbf16>
    "tpu.trace_start"() <{level = 10 : i32, message = "bqk,bkd->bqd"}> : () -> ()
    %cst_28 = arith.constant dense<0.000000e+00> : vector<8x8x8xf32>
    %51 = tpu.matmul %50, %38, %cst_28 {dimension_numbers = #tpu.dot_dimension_numbers<[2], [1], [1], [2], [0, 0, 0, 1, 1, 2], [0], [0]>} : vector<8x8x8xbf16>, vector<8x8x8xbf16>, vector<8x8x8xf32> -> vector<8x8x8xf32>
    "tpu.trace_stop"() : () -> ()
    %52 = arith.truncf %51 : vector<8x8x8xf32> to vector<8x8x8xbf16>
    %53 = vector.shape_cast %52 : vector<8x8x8xbf16> to vector<2x4x8x8xbf16>
    %54 = tpu.transpose %53, [2, 0, 1, 3] : vector<2x4x8x8xbf16> -> vector<8x2x4x8xbf16>
    %55 = vector.shape_cast %54 : vector<8x2x4x8xbf16> to vector<16x32xbf16>
    %c0_29 = arith.constant 0 : index
    %c0_30 = arith.constant 0 : index
    %56 = vector.load %arg11[%c0_29, %c0_30] : memref<32x32xbf16, #tpu.memory_space<vmem>>, vector<32x32xbf16>
    %cst_31 = arith.constant dense<0.000000e+00> : vector<16x32xf32>
    %57 = tpu.matmul %55, %56, %cst_31 {dimension_numbers = #tpu.dot_dimension_numbers<[1], [0], [0], [1], [0, 0, 1, 1], [], []>} : vector<16x32xbf16>, vector<32x32xbf16>, vector<16x32xf32> -> vector<16x32xf32>
    %c0_32 = arith.constant 0 : index
    %c0_33 = arith.constant 0 : index
    %58 = vector.load %arg12[%c0_32, %c0_33] : memref<1x32xf32, #tpu.memory_space<vmem>>, vector<1x32xf32>
    %59 = vector.broadcast %58 : vector<1x32xf32> to vector<16x32xf32>
    %60 = arith.addf %57, %59 : vector<16x32xf32>
    %61 = arith.addf %1, %60 : vector<16x32xf32>
    %cst_34 = arith.constant dense<0.000000e+00> : vector<16xf32>
    %62 = vector.multi_reduction <add>, %61, %cst_34 [1] : vector<16x32xf32> to vector<16xf32>
    %63 = vector.shape_cast %62 : vector<16xf32> to vector<16x1xf32>
    %cst_35 = arith.constant 3.200000e+01 : f32
    %64 = vector.broadcast %cst_35 : f32 to vector<16x1xf32>
    %65 = arith.divf %63, %64 : vector<16x1xf32>
    %66 = vector.broadcast %65 : vector<16x1xf32> to vector<16x32xf32>
    %67 = arith.subf %61, %66 : vector<16x32xf32>
    %68 = arith.mulf %67, %67 : vector<16x32xf32>
    %cst_36 = arith.constant dense<0.000000e+00> : vector<16xf32>
    %69 = vector.multi_reduction <add>, %68, %cst_36 [1] : vector<16x32xf32> to vector<16xf32>
    %70 = vector.shape_cast %69 : vector<16xf32> to vector<16x1xf32>
    %cst_37 = arith.constant 3.200000e+01 : f32
    %71 = vector.broadcast %cst_37 : f32 to vector<16x1xf32>
    %72 = arith.divf %70, %71 : vector<16x1xf32>
    %cst_38 = arith.constant 9.99999974E-6 : f32
    %73 = vector.broadcast %cst_38 : f32 to vector<16x1xf32>
    %74 = arith.addf %72, %73 : vector<16x1xf32>
    %75 = math.rsqrt %74 : vector<16x1xf32>
    %76 = vector.broadcast %75 : vector<16x1xf32> to vector<16x32xf32>
    %77 = arith.mulf %67, %76 : vector<16x32xf32>
    %c0_39 = arith.constant 0 : index
    %c0_40 = arith.constant 0 : index
    %78 = vector.load %arg25[%c0_39, %c0_40] : memref<1x32xf32, #tpu.memory_space<vmem>>, vector<1x32xf32>
    %79 = vector.broadcast %78 : vector<1x32xf32> to vector<16x32xf32>
    %80 = arith.mulf %77, %79 : vector<16x32xf32>
    %c0_41 = arith.constant 0 : index
    %c0_42 = arith.constant 0 : index
    %81 = vector.load %arg26[%c0_41, %c0_42] : memref<1x32xf32, #tpu.memory_space<vmem>>, vector<1x32xf32>
    %82 = vector.broadcast %81 : vector<1x32xf32> to vector<16x32xf32>
    %83 = arith.addf %80, %82 : vector<16x32xf32>
    %84 = arith.addf %83, %5 : vector<16x32xf32>
    %85 = arith.truncf %84 : vector<16x32xf32> to vector<16x32xbf16>
    %c0_43 = arith.constant 0 : index
    %c0_44 = arith.constant 0 : index
    %86 = vector.load %arg13[%c0_43, %c0_44] : memref<32x32xbf16, #tpu.memory_space<vmem>>, vector<32x32xbf16>
    %cst_45 = arith.constant dense<0.000000e+00> : vector<16x32xf32>
    %87 = tpu.matmul %85, %86, %cst_45 {dimension_numbers = #tpu.dot_dimension_numbers<[1], [0], [0], [1], [0, 0, 1, 1], [], []>} : vector<16x32xbf16>, vector<32x32xbf16>, vector<16x32xf32> -> vector<16x32xf32>
    %c0_46 = arith.constant 0 : index
    %c0_47 = arith.constant 0 : index
    %88 = vector.load %arg14[%c0_46, %c0_47] : memref<1x32xf32, #tpu.memory_space<vmem>>, vector<1x32xf32>
    %89 = vector.broadcast %88 : vector<1x32xf32> to vector<16x32xf32>
    %90 = arith.addf %87, %89 : vector<16x32xf32>
    %91 = arith.addf %3, %7 : vector<32x32xf32>
    %92 = arith.truncf %91 : vector<32x32xf32> to vector<32x32xbf16>
    %c0_48 = arith.constant 0 : index
    %c0_49 = arith.constant 0 : index
    %93 = vector.load %arg15[%c0_48, %c0_49] : memref<32x32xbf16, #tpu.memory_space<vmem>>, vector<32x32xbf16>
    %cst_50 = arith.constant dense<0.000000e+00> : vector<32x32xf32>
    %94 = tpu.matmul %92, %93, %cst_50 {dimension_numbers = #tpu.dot_dimension_numbers<[1], [0], [0], [1], [0, 0, 1, 1], [], []>} : vector<32x32xbf16>, vector<32x32xbf16>, vector<32x32xf32> -> vector<32x32xf32>
    %c0_51 = arith.constant 0 : index
    %c0_52 = arith.constant 0 : index
    %95 = vector.load %arg16[%c0_51, %c0_52] : memref<1x32xf32, #tpu.memory_space<vmem>>, vector<1x32xf32>
    %96 = vector.broadcast %95 : vector<1x32xf32> to vector<32x32xf32>
    %97 = arith.addf %94, %96 : vector<32x32xf32>
    %98 = arith.truncf %3 : vector<32x32xf32> to vector<32x32xbf16>
    %c0_53 = arith.constant 0 : index
    %c0_54 = arith.constant 0 : index
    %99 = vector.load %arg17[%c0_53, %c0_54] : memref<32x32xbf16, #tpu.memory_space<vmem>>, vector<32x32xbf16>
    %cst_55 = arith.constant dense<0.000000e+00> : vector<32x32xf32>
    %100 = tpu.matmul %98, %99, %cst_55 {dimension_numbers = #tpu.dot_dimension_numbers<[1], [0], [0], [1], [0, 0, 1, 1], [], []>} : vector<32x32xbf16>, vector<32x32xbf16>, vector<32x32xf32> -> vector<32x32xf32>
    %c0_56 = arith.constant 0 : index
    %c0_57 = arith.constant 0 : index
    %101 = vector.load %arg18[%c0_56, %c0_57] : memref<1x32xf32, #tpu.memory_space<vmem>>, vector<1x32xf32>
    %102 = vector.broadcast %101 : vector<1x32xf32> to vector<32x32xf32>
    %103 = arith.addf %100, %102 : vector<32x32xf32>
    %104 = arith.truncf %90 : vector<16x32xf32> to vector<16x32xbf16>
    %105 = vector.shape_cast %104 : vector<16x32xbf16> to vector<8x2x4x8xbf16>
    %106 = tpu.transpose %105, [1, 2, 0, 3] : vector<8x2x4x8xbf16> -> vector<2x4x8x8xbf16>
    %107 = vector.shape_cast %106 : vector<2x4x8x8xbf16> to vector<8x8x8xbf16>
    %108 = arith.truncf %97 : vector<32x32xf32> to vector<32x32xbf16>
    %109 = vector.shape_cast %108 : vector<32x32xbf16> to vector<16x2x4x8xbf16>
    %110 = tpu.transpose %109, [1, 2, 0, 3] : vector<16x2x4x8xbf16> -> vector<2x4x16x8xbf16>
    %111 = vector.shape_cast %110 : vector<2x4x16x8xbf16> to vector<8x16x8xbf16>
    %112 = arith.truncf %103 : vector<32x32xf32> to vector<32x32xbf16>
    %113 = vector.shape_cast %112 : vector<32x32xbf16> to vector<16x2x4x8xbf16>
    %114 = tpu.transpose %113, [1, 2, 0, 3] : vector<16x2x4x8xbf16> -> vector<2x4x16x8xbf16>
    %115 = vector.shape_cast %114 : vector<2x4x16x8xbf16> to vector<8x16x8xbf16>
    "tpu.trace_start"() <{level = 10 : i32, message = "bqd,bkd->bqk"}> : () -> ()
    %cst_58 = arith.constant dense<0.000000e+00> : vector<8x8x16xf32>
    %116 = tpu.matmul %107, %111, %cst_58 {dimension_numbers = #tpu.dot_dimension_numbers<[2], [2], [1], [1], [0, 0, 0, 1, 1, 1], [0], [0]>} : vector<8x8x8xbf16>, vector<8x16x8xbf16>, vector<8x8x16xf32> -> vector<8x8x16xf32>
    "tpu.trace_stop"() : () -> ()
    %cst_59 = arith.constant dense<0xFF800000> : vector<8x8xf32>
    %117 = vector.multi_reduction <maximumf>, %116, %cst_59 [2] : vector<8x8x16xf32> to vector<8x8xf32>
    %118 = vector.shape_cast %117 : vector<8x8xf32> to vector<8x8x1xf32>
    %119 = vector.broadcast %118 : vector<8x8x1xf32> to vector<8x8x16xf32>
    %120 = arith.subf %116, %119 : vector<8x8x16xf32>
    %121 = math.exp %120 : vector<8x8x16xf32>
    %cst_60 = arith.constant dense<0.000000e+00> : vector<8x8xf32>
    %122 = vector.multi_reduction <add>, %121, %cst_60 [2] : vector<8x8x16xf32> to vector<8x8xf32>
    %123 = vector.shape_cast %122 : vector<8x8xf32> to vector<8x8x1xf32>
    %124 = tpu.reciprocal %123 {approx = true} : vector<8x8x1xf32> -> vector<8x8x1xf32>
    %125 = vector.broadcast %124 : vector<8x8x1xf32> to vector<8x8x16xf32>
    %126 = arith.mulf %121, %125 : vector<8x8x16xf32>
    %127 = arith.truncf %126 : vector<8x8x16xf32> to vector<8x8x16xbf16>
    "tpu.trace_start"() <{level = 10 : i32, message = "bqk,bkd->bqd"}> : () -> ()
    %cst_61 = arith.constant dense<0.000000e+00> : vector<8x8x8xf32>
    %128 = tpu.matmul %127, %115, %cst_61 {dimension_numbers = #tpu.dot_dimension_numbers<[2], [1], [1], [2], [0, 0, 0, 1, 1, 2], [0], [0]>} : vector<8x8x16xbf16>, vector<8x16x8xbf16>, vector<8x8x8xf32> -> vector<8x8x8xf32>
    "tpu.trace_stop"() : () -> ()
    %129 = arith.truncf %128 : vector<8x8x8xf32> to vector<8x8x8xbf16>
    %130 = vector.shape_cast %129 : vector<8x8x8xbf16> to vector<2x4x8x8xbf16>
    %131 = tpu.transpose %130, [2, 0, 1, 3] : vector<2x4x8x8xbf16> -> vector<8x2x4x8xbf16>
    %132 = vector.shape_cast %131 : vector<8x2x4x8xbf16> to vector<16x32xbf16>
    %c0_62 = arith.constant 0 : index
    %c0_63 = arith.constant 0 : index
    %133 = vector.load %arg19[%c0_62, %c0_63] : memref<32x32xbf16, #tpu.memory_space<vmem>>, vector<32x32xbf16>
    %cst_64 = arith.constant dense<0.000000e+00> : vector<16x32xf32>
    %134 = tpu.matmul %132, %133, %cst_64 {dimension_numbers = #tpu.dot_dimension_numbers<[1], [0], [0], [1], [0, 0, 1, 1], [], []>} : vector<16x32xbf16>, vector<32x32xbf16>, vector<16x32xf32> -> vector<16x32xf32>
    %c0_65 = arith.constant 0 : index
    %c0_66 = arith.constant 0 : index
    %135 = vector.load %arg20[%c0_65, %c0_66] : memref<1x32xf32, #tpu.memory_space<vmem>>, vector<1x32xf32>
    %136 = vector.broadcast %135 : vector<1x32xf32> to vector<16x32xf32>
    %137 = arith.addf %134, %136 : vector<16x32xf32>
    %138 = arith.addf %83, %137 : vector<16x32xf32>
    %cst_67 = arith.constant dense<0.000000e+00> : vector<16xf32>
    %139 = vector.multi_reduction <add>, %138, %cst_67 [1] : vector<16x32xf32> to vector<16xf32>
    %140 = vector.shape_cast %139 : vector<16xf32> to vector<16x1xf32>
    %cst_68 = arith.constant 3.200000e+01 : f32
    %141 = vector.broadcast %cst_68 : f32 to vector<16x1xf32>
    %142 = arith.divf %140, %141 : vector<16x1xf32>
    %143 = vector.broadcast %142 : vector<16x1xf32> to vector<16x32xf32>
    %144 = arith.subf %138, %143 : vector<16x32xf32>
    %145 = arith.mulf %144, %144 : vector<16x32xf32>
    %cst_69 = arith.constant dense<0.000000e+00> : vector<16xf32>
    %146 = vector.multi_reduction <add>, %145, %cst_69 [1] : vector<16x32xf32> to vector<16xf32>
    %147 = vector.shape_cast %146 : vector<16xf32> to vector<16x1xf32>
    %cst_70 = arith.constant 3.200000e+01 : f32
    %148 = vector.broadcast %cst_70 : f32 to vector<16x1xf32>
    %149 = arith.divf %147, %148 : vector<16x1xf32>
    %cst_71 = arith.constant 9.99999974E-6 : f32
    %150 = vector.broadcast %cst_71 : f32 to vector<16x1xf32>
    %151 = arith.addf %149, %150 : vector<16x1xf32>
    %152 = math.rsqrt %151 : vector<16x1xf32>
    %153 = vector.broadcast %152 : vector<16x1xf32> to vector<16x32xf32>
    %154 = arith.mulf %144, %153 : vector<16x32xf32>
    %c0_72 = arith.constant 0 : index
    %c0_73 = arith.constant 0 : index
    %155 = vector.load %arg27[%c0_72, %c0_73] : memref<1x32xf32, #tpu.memory_space<vmem>>, vector<1x32xf32>
    %156 = vector.broadcast %155 : vector<1x32xf32> to vector<16x32xf32>
    %157 = arith.mulf %154, %156 : vector<16x32xf32>
    %c0_74 = arith.constant 0 : index
    %c0_75 = arith.constant 0 : index
    %158 = vector.load %arg28[%c0_74, %c0_75] : memref<1x32xf32, #tpu.memory_space<vmem>>, vector<1x32xf32>
    %159 = vector.broadcast %158 : vector<1x32xf32> to vector<16x32xf32>
    %160 = arith.addf %157, %159 : vector<16x32xf32>
    %161 = arith.truncf %160 : vector<16x32xf32> to vector<16x32xbf16>
    %c0_76 = arith.constant 0 : index
    %c0_77 = arith.constant 0 : index
    %162 = vector.load %arg21[%c0_76, %c0_77] : memref<32x64xbf16, #tpu.memory_space<vmem>>, vector<32x64xbf16>
    %cst_78 = arith.constant dense<0.000000e+00> : vector<16x64xf32>
    %163 = tpu.matmul %161, %162, %cst_78 {dimension_numbers = #tpu.dot_dimension_numbers<[1], [0], [0], [1], [0, 0, 1, 1], [], []>} : vector<16x32xbf16>, vector<32x64xbf16>, vector<16x64xf32> -> vector<16x64xf32>
    %c0_79 = arith.constant 0 : index
    %c0_80 = arith.constant 0 : index
    %164 = vector.load %arg22[%c0_79, %c0_80] : memref<1x64xf32, #tpu.memory_space<vmem>>, vector<1x64xf32>
    %165 = vector.broadcast %164 : vector<1x64xf32> to vector<16x64xf32>
    %166 = arith.addf %163, %165 : vector<16x64xf32>
    %cst_81 = arith.constant 0.000000e+00 : f32
    %167 = vector.broadcast %cst_81 : f32 to vector<16x64xf32>
    %168 = arith.maximumf %166, %167 : vector<16x64xf32>
    %169 = arith.truncf %168 : vector<16x64xf32> to vector<16x64xbf16>
    %c0_82 = arith.constant 0 : index
    %c0_83 = arith.constant 0 : index
    %170 = vector.load %arg23[%c0_82, %c0_83] : memref<64x32xbf16, #tpu.memory_space<vmem>>, vector<64x32xbf16>
    %cst_84 = arith.constant dense<0.000000e+00> : vector<16x32xf32>
    %171 = tpu.matmul %169, %170, %cst_84 {dimension_numbers = #tpu.dot_dimension_numbers<[1], [0], [0], [1], [0, 0, 1, 1], [], []>} : vector<16x64xbf16>, vector<64x32xbf16>, vector<16x32xf32> -> vector<16x32xf32>
    %c0_85 = arith.constant 0 : index
    %c0_86 = arith.constant 0 : index
    %172 = vector.load %arg24[%c0_85, %c0_86] : memref<1x32xf32, #tpu.memory_space<vmem>>, vector<1x32xf32>
    %173 = vector.broadcast %172 : vector<1x32xf32> to vector<16x32xf32>
    %174 = arith.addf %171, %173 : vector<16x32xf32>
    %175 = arith.addf %160, %174 : vector<16x32xf32>
    %cst_87 = arith.constant dense<0.000000e+00> : vector<16xf32>
    %176 = vector.multi_reduction <add>, %175, %cst_87 [1] : vector<16x32xf32> to vector<16xf32>
    %177 = vector.shape_cast %176 : vector<16xf32> to vector<16x1xf32>
    %cst_88 = arith.constant 3.200000e+01 : f32
    %178 = vector.broadcast %cst_88 : f32 to vector<16x1xf32>
    %179 = arith.divf %177, %178 : vector<16x1xf32>
    %180 = vector.broadcast %179 : vector<16x1xf32> to vector<16x32xf32>
    %181 = arith.subf %175, %180 : vector<16x32xf32>
    %182 = arith.mulf %181, %181 : vector<16x32xf32>
    %cst_89 = arith.constant dense<0.000000e+00> : vector<16xf32>
    %183 = vector.multi_reduction <add>, %182, %cst_89 [1] : vector<16x32xf32> to vector<16xf32>
    %184 = vector.shape_cast %183 : vector<16xf32> to vector<16x1xf32>
    %cst_90 = arith.constant 3.200000e+01 : f32
    %185 = vector.broadcast %cst_90 : f32 to vector<16x1xf32>
    %186 = arith.divf %184, %185 : vector<16x1xf32>
    %cst_91 = arith.constant 9.99999974E-6 : f32
    %187 = vector.broadcast %cst_91 : f32 to vector<16x1xf32>
    %188 = arith.addf %186, %187 : vector<16x1xf32>
    %189 = math.rsqrt %188 : vector<16x1xf32>
    %190 = vector.broadcast %189 : vector<16x1xf32> to vector<16x32xf32>
    %191 = arith.mulf %181, %190 : vector<16x32xf32>
    %c0_92 = arith.constant 0 : index
    %c0_93 = arith.constant 0 : index
    %192 = vector.load %arg29[%c0_92, %c0_93] : memref<1x32xf32, #tpu.memory_space<vmem>>, vector<1x32xf32>
    %193 = vector.broadcast %192 : vector<1x32xf32> to vector<16x32xf32>
    %194 = arith.mulf %191, %193 : vector<16x32xf32>
    %c0_94 = arith.constant 0 : index
    %c0_95 = arith.constant 0 : index
    %195 = vector.load %arg30[%c0_94, %c0_95] : memref<1x32xf32, #tpu.memory_space<vmem>>, vector<1x32xf32>
    %196 = vector.broadcast %195 : vector<1x32xf32> to vector<16x32xf32>
    %197 = arith.addf %194, %196 : vector<16x32xf32>
    %198 = vector.shape_cast %197 : vector<16x32xf32> to vector<8x2x32xf32>
    %c0_96 = arith.constant 0 : index
    %c0_97 = arith.constant 0 : index
    %c0_98 = arith.constant 0 : index
    %199 = vector.load %arg31[%c0_96, %c0_97, %c0_98] : memref<8x2x32xf32, #tpu.memory_space<vmem>>, vector<8x2x32xf32>
    tpu.vector_store %arg31[%c0_96, %c0_97, %c0_98], %198 {strides = array<i32>} : memref<8x2x32xf32, #tpu.memory_space<vmem>>, vector<8x2x32xf32>,
    return
  }
  func.func @transform_0(%arg0: i32) -> (i32, i32, i32) {
    %c0_i32 = arith.constant 0 : i32
    %c0_i32_0 = arith.constant 0 : i32
    %c0_i32_1 = arith.constant 0 : i32
    %c0_i32_2 = arith.constant 0 : i32
    return %c0_i32, %c0_i32_0, %c0_i32_1 : i32, i32, i32
  }
  func.func @transform_1(%arg0: i32) -> (i32, i32, i32) {
    %c0_i32 = arith.constant 0 : i32
    %c0_i32_0 = arith.constant 0 : i32
    %c0_i32_1 = arith.constant 0 : i32
    %c0_i32_2 = arith.constant 0 : i32
    return %c0_i32, %c0_i32_0, %c0_i32_1 : i32, i32, i32
  }
  func.func @transform_2(%arg0: i32) -> (i32, i32, i32) {
    %c0_i32 = arith.constant 0 : i32
    %c0_i32_0 = arith.constant 0 : i32
    %c0_i32_1 = arith.constant 0 : i32
    %c0_i32_2 = arith.constant 0 : i32
    return %c0_i32, %c0_i32_0, %c0_i32_1 : i32, i32, i32
  }
  func.func @transform_3(%arg0: i32) -> (i32, i32, i32) {
    %c0_i32 = arith.constant 0 : i32
    %c0_i32_0 = arith.constant 0 : i32
    %c0_i32_1 = arith.constant 0 : i32
    %c0_i32_2 = arith.constant 0 : i32
    return %c0_i32, %c0_i32_0, %c0_i32_1 : i32, i32, i32
  }
  func.func @transform_4(%arg0: i32) -> (i32, i32) {
    %c0_i32 = arith.constant 0 : i32
    %c0_i32_0 = arith.constant 0 : i32
    %c0_i32_1 = arith.constant 0 : i32
    return %c0_i32, %c0_i32_0 : i32, i32
  }
  func.func @transform_5(%arg0: i32) -> (i32, i32) {
    %c0_i32 = arith.constant 0 : i32
    %c0_i32_0 = arith.constant 0 : i32
    %c0_i32_1 = arith.constant 0 : i32
    return %c0_i32, %c0_i32_0 : i32, i32
  }
  func.func @transform_6(%arg0: i32) -> (i32, i32) {
    %c0_i32 = arith.constant 0 : i32
    %c0_i32_0 = arith.constant 0 : i32
    %c0_i32_1 = arith.constant 0 : i32
    return %c0_i32, %c0_i32_0 : i32, i32
  }
  func.func @transform_7(%arg0: i32) -> (i32, i32) {
    %c0_i32 = arith.constant 0 : i32
    %c0_i32_0 = arith.constant 0 : i32
    %c0_i32_1 = arith.constant 0 : i32
    return %c0_i32, %c0_i32_0 : i32, i32
  }
  func.func @transform_8(%arg0: i32) -> (i32, i32) {
    %c0_i32 = arith.constant 0 : i32
    %c0_i32_0 = arith.constant 0 : i32
    %c0_i32_1 = arith.constant 0 : i32
    return %c0_i32, %c0_i32_0 : i32, i32
  }
  func.func @transform_9(%arg0: i32) -> (i32, i32) {
    %c0_i32 = arith.constant 0 : i32
    %c0_i32_0 = arith.constant 0 : i32
    %c0_i32_1 = arith.constant 0 : i32
    return %c0_i32, %c0_i32_0 : i32, i32
  }
  func.func @transform_10(%arg0: i32) -> (i32, i32) {
    %c0_i32 = arith.constant 0 : i32
    %c0_i32_0 = arith.constant 0 : i32
    %c0_i32_1 = arith.constant 0 : i32
    return %c0_i32, %c0_i32_0 : i32, i32
  }
  func.func @transform_11(%arg0: i32) -> (i32, i32) {
    %c0_i32 = arith.constant 0 : i32
    %c0_i32_0 = arith.constant 0 : i32
    %c0_i32_1 = arith.constant 0 : i32
    return %c0_i32, %c0_i32_0 : i32, i32
  }
  func.func @transform_12(%arg0: i32) -> (i32, i32) {
    %c0_i32 = arith.constant 0 : i32
    %c0_i32_0 = arith.constant 0 : i32
    %c0_i32_1 = arith.constant 0 : i32
    return %c0_i32, %c0_i32_0 : i32, i32
  }
  func.func @transform_13(%arg0: i32) -> (i32, i32) {
    %c0_i32 = arith.constant 0 : i32
    %c0_i32_0 = arith.constant 0 : i32
    %c0_i32_1 = arith.constant 0 : i32
    return %c0_i32, %c0_i32_0 : i32, i32
  }
  func.func @transform_14(%arg0: i32) -> (i32, i32) {
    %c0_i32 = arith.constant 0 : i32
    %c0_i32_0 = arith.constant 0 : i32
    %c0_i32_1 = arith.constant 0 : i32
    return %c0_i32, %c0_i32_0 : i32, i32
  }
  func.func @transform_15(%arg0: i32) -> (i32, i32) {
    %c0_i32 = arith.constant 0 : i32
    %c0_i32_0 = arith.constant 0 : i32
    %c0_i32_1 = arith.constant 0 : i32
    return %c0_i32, %c0_i32_0 : i32, i32
  }
  func.func @transform_16(%arg0: i32) -> (i32, i32) {
    %c0_i32 = arith.constant 0 : i32
    %c0_i32_0 = arith.constant 0 : i32
    %c0_i32_1 = arith.constant 0 : i32
    return %c0_i32, %c0_i32_0 : i32, i32
  }
  func.func @transform_17(%arg0: i32) -> (i32, i32) {
    %c0_i32 = arith.constant 0 : i32
    %c0_i32_0 = arith.constant 0 : i32
    %c0_i32_1 = arith.constant 0 : i32
    return %c0_i32, %c0_i32_0 : i32, i32
  }
  func.func @transform_18(%arg0: i32) -> (i32, i32) {
    %c0_i32 = arith.constant 0 : i32
    %c0_i32_0 = arith.constant 0 : i32
    %c0_i32_1 = arith.constant 0 : i32
    return %c0_i32, %c0_i32_0 : i32, i32
  }
  func.func @transform_19(%arg0: i32) -> (i32, i32) {
    %c0_i32 = arith.constant 0 : i32
    %c0_i32_0 = arith.constant 0 : i32
    %c0_i32_1 = arith.constant 0 : i32
    return %c0_i32, %c0_i32_0 : i32, i32
  }
  func.func @transform_20(%arg0: i32) -> (i32, i32) {
    %c0_i32 = arith.constant 0 : i32
    %c0_i32_0 = arith.constant 0 : i32
    %c0_i32_1 = arith.constant 0 : i32
    return %c0_i32, %c0_i32_0 : i32, i32
  }
  func.func @transform_21(%arg0: i32) -> (i32, i32) {
    %c0_i32 = arith.constant 0 : i32
    %c0_i32_0 = arith.constant 0 : i32
    %c0_i32_1 = arith.constant 0 : i32
    return %c0_i32, %c0_i32_0 : i32, i32
  }
  func.func @transform_22(%arg0: i32) -> (i32, i32) {
    %c0_i32 = arith.constant 0 : i32
    %c0_i32_0 = arith.constant 0 : i32
    %c0_i32_1 = arith.constant 0 : i32
    return %c0_i32, %c0_i32_0 : i32, i32
  }
  func.func @transform_23(%arg0: i32) -> (i32, i32) {
    %c0_i32 = arith.constant 0 : i32
    %c0_i32_0 = arith.constant 0 : i32
    %c0_i32_1 = arith.constant 0 : i32
    return %c0_i32, %c0_i32_0 : i32, i32
  }
  func.func @transform_24(%arg0: i32) -> (i32, i32) {
    %c0_i32 = arith.constant 0 : i32
    %c0_i32_0 = arith.constant 0 : i32
    %c0_i32_1 = arith.constant 0 : i32
    return %c0_i32, %c0_i32_0 : i32, i32
  }
  func.func @transform_25(%arg0: i32) -> (i32, i32) {
    %c0_i32 = arith.constant 0 : i32
    %c0_i32_0 = arith.constant 0 : i32
    %c0_i32_1 = arith.constant 0 : i32
    return %c0_i32, %c0_i32_0 : i32, i32
  }
  func.func @transform_26(%arg0: i32) -> (i32, i32) {
    %c0_i32 = arith.constant 0 : i32
    %c0_i32_0 = arith.constant 0 : i32
    %c0_i32_1 = arith.constant 0 : i32
    return %c0_i32, %c0_i32_0 : i32, i32
  }
  func.func @transform_27(%arg0: i32) -> (i32, i32) {
    %c0_i32 = arith.constant 0 : i32
    %c0_i32_0 = arith.constant 0 : i32
    %c0_i32_1 = arith.constant 0 : i32
    return %c0_i32, %c0_i32_0 : i32, i32
  }
  func.func @transform_28(%arg0: i32) -> (i32, i32) {
    %c0_i32 = arith.constant 0 : i32
    %c0_i32_0 = arith.constant 0 : i32
    %c0_i32_1 = arith.constant 0 : i32
    return %c0_i32, %c0_i32_0 : i32, i32
  }
  func.func @transform_29(%arg0: i32) -> (i32, i32) {
    %c0_i32 = arith.constant 0 : i32
    %c0_i32_0 = arith.constant 0 : i32
    %c0_i32_1 = arith.constant 0 : i32
    return %c0_i32, %c0_i32_0 : i32, i32
  }
  func.func @transform_30(%arg0: i32) -> (i32, i32, i32) {
    %c0_i32 = arith.constant 0 : i32
    %c0_i32_0 = arith.constant 0 : i32
    %c0_i32_1 = arith.constant 0 : i32
    %c0_i32_2 = arith.constant 0 : i32
    return %c0_i32, %c0_i32_0, %c0_i32_1 : i32, i32, i32
  }
}

</mosaic_0001>

<bundles_post_ra>
// kernel: tpu_custom_call.1
= control target key start
LH: loop header
LB: loop body
LE: loop exit
PB: predicated region body
PF: predicated region fallthrough
CT: control target
= control target key end

     0   :  { %s5973_s6 = smov 1   ;;  %s5974_s10 = smov 2   ;;  %s8020_s0 = inlined_call_operand.smem [shape: u32[31], index: -1, kind: input, shape index: {}] }
   0x1   :  { %s6045_s5 = sld [smem:[%s8020_s0]]   ;;  %s5975_s14 = smov 3  }
   0x2   :  { %s6050_s9 = sld [smem:[%s8020_s0 + %s5973_s6]]   ;;  %s5976_s18 = smov 4  }
   0x3   :  { %s6055_s13 = sld [smem:[%s8020_s0 + %s5974_s10]]   ;;  %s5977_s22 = smov 5  }
   0x4   :  { %s6060_s17 = sld [smem:[%s8020_s0 + %s5975_s14]]   ;;  %s5978_s26 = smov 6  }
   0x5   :  { %s6065_s21 = sld [smem:[%s8020_s0 + %s5976_s18]]   ;;  %s5979_s30 = smov 7  }
   0x6   :  { %s6070_s25 = sld [smem:[%s8020_s0 + %s5977_s22]]   ;;  %s5980_s4 = smov 8  }
   0x7   :  { %8026 = sst [smem:[#allocation39_spill]] %s6045_s5  ;;  %s5981_s10 = smov 9  }
   0x8   :  { %8027 = sst [smem:[#allocation40_spill]] %s6050_s9  ;;  %s5982_s15 = smov 10  }
   0x9   :  { %s6075_s29 = sld [smem:[%s8020_s0 + %s5978_s26]]   ;;  %s5983_s20 = smov 11  }
   0xa   :  { %s6080_s3 = sld [smem:[%s8020_s0 + %s5979_s30]]   ;;  %s5984_s26 = smov 12  }
   0xb   :  { %s6085_s8 = sld [smem:[%s8020_s0 + %s5980_s4]]   ;;  %s5985_s1 = smov 13  }
   0xc   :  { %8028 = sst [smem:[#allocation41_spill]] %s6070_s25  ;;  %s5986_s7 = smov 14  }
   0xd   :  { %s6090_s14 = sld [smem:[%s8020_s0 + %s5981_s10]]   ;;  %s5988_s22 = smov 16  }
   0xe   :  { %s6095_s19 = sld [smem:[%s8020_s0 + %s5982_s15]]   ;;  %s5987_s15 = smov 15  }
   0xf   :  { %s6100_s24 = sld [smem:[%s8020_s0 + %s5983_s20]]   ;;  %s5989_s28 = smov 17  }
  0x10   :  { %8029 = sst [smem:[#allocation42_spill]] %s6080_s3 }
  0x11   :  { %s6105_s30 = sld [smem:[%s8020_s0 + %s5984_s26]]  }
  0x12   :  { %s6110_s6 = sld [smem:[%s8020_s0 + %s5985_s1]]  }
  0x13   :  { %8030 = sst [smem:[#allocation43_spill]] %s6090_s14 }
  0x14   :  { %s6115_s12 = sld [smem:[%s8020_s0 + %s5986_s7]]   ;;  %s5990_s7 = smov 18  }
  0x15   :  { %8031 = sst [smem:[#allocation44_spill]] %s6100_s24 }
  0x16   :  { %s6120_s20 = sld [smem:[%s8020_s0 + %s5987_s15]]   ;;  %s5991_s15 = smov 19  }
  0x17   :  { %s6125_s27 = sld [smem:[%s8020_s0 + %s5988_s22]]   ;;  %s5992_s22 = smov 20  }
  0x18   :  { %8032 = sst [smem:[#allocation45_spill]] %s6110_s6 }
  0x19   :  { %s6130_s4 = sld [smem:[%s8020_s0 + %s5989_s28]]   ;;  %s5993_s28 = smov 21  }
  0x1a   :  { %s6135_s6 = sld [smem:[%s8020_s0 + %s5990_s7]]   ;;  %s5994_s7 = smov 22  }
  0x1b   :  { %s6140_s9 = sld [smem:[%s8020_s0 + %s5991_s15]]   ;;  %s5995_s15 = smov 23  }
  0x1c   :  { %s6145_s24 = sld [smem:[%s8020_s0 + %s5992_s22]]   ;;  %s5996_s22 = smov 24  }
  0x1d   :  { %s6150_s14 = sld [smem:[%s8020_s0 + %s5993_s28]]   ;;  %s5997_s28 = smov 25  }
  0x1e   :  { %s6155_s25 = sld [smem:[%s8020_s0 + %s5994_s7]]   ;;  %s5998_s7 = smov 26  }
  0x1f   :  { %s6160_s3 = sld [smem:[%s8020_s0 + %s5995_s15]]   ;;  %s5999_s15 = smov 27  }
  0x20   :  { %s6165_s5 = sld [smem:[%s8020_s0 + %s5996_s22]]   ;;  %s6000_s22 = smov 28  }
  0x23   :  { %8033 = sst [smem:[#allocation46_spill]] %s6150_s14 }
  0x24   :  { %8034 = sst [smem:[#allocation47_spill]] %s6155_s25 }
  0x25   :  { %8035 = sst [smem:[#allocation48_spill]] %s6160_s3 }
  0x26   :  { %8036 = sst [smem:[#allocation49_spill]] %s6165_s5 }
  0x27   :  { %s6170_s14 = sld [smem:[%s8020_s0 + %s5997_s28]]   ;;  %s6001_s28 = smov 29  }
  0x28   :  { %s6175_s25 = sld [smem:[%s8020_s0 + %s5998_s7]]   ;;  %s6002_s7 = smov 30  }
  0x29   :  { %s6180_s3 = sld [smem:[%s8020_s0 + %s5999_s15]]  }
  0x2a   :  { %s6185_s5 = sld [smem:[%s8020_s0 + %s6000_s22]]  }
  0x2d   :  { %8037 = sst [smem:[#allocation50_spill]] %s6170_s14 }
  0x2e   :  { %8038 = sst [smem:[#allocation51_spill]] %s6175_s25 }
  0x2f   :  { %s6190_s14 = sld [smem:[%s8020_s0 + %s6001_s28]]  }
  0x30   :  { %s6195_s25 = sld [smem:[%s8020_s0 + %s6002_s7]]  }
  0x31   :  { %66 = vsyncpa [#allocation3], 0 }
  0x32   :  { %67 = vsyncpa [#allocation6], 0 }
  0x33   :  { %68 = vsyncpa [#allocation9], 0 }
  0x34   :  { %69 = vsyncpa [#allocation12], 0 }
  0x35   :  { %70 = vsyncpa [#allocation15], 0 }
  0x36   :  { %71 = vsyncpa [#allocation18], 0 }
  0x37   :  { %72 = vsyncpa [#allocation21], 0 }
  0x38   :  { %73 = vsyncpa [#allocation24], 0 }
  0x39   :  { %74 = vsyncpa [#allocation27], 0 }
  0x3a   :  { %75 = vsyncpa [#allocation4], 0  ;;  %s97_s15 = sshll.u32 %s6060_s17, 4  ;;  %s6003_s16 = smov [#allocation5]   ;;  %s98_s15 = int_to_ptr.hbm [resolvable:$true] %s97_s15 }
  0x3b   :  { %s99_s18 = sshll.u32 %s6003_s16, 4  ;;  %s5545_s0 = sshra.s32 %s98_s15, 4  ;;  %s100_s18 = int_to_ptr.vmem [resolvable:$true] %s99_s18  ;;  %s5546_s0 = int_to_ptr.hbm [resolvable:$true] %s5545_s0 }
  0x3c   :  { %s5547_s22 = scalar_lea.hbm %s5546_s0, 32  ;;  %s5549_s23 = scalar_lea.hbm %s6060_s17, 32 }
  0x3d   :  { %p5548_p0 = scmp.ne.s32.totalorder %s5546_s0, %s5547_s22  ;;  %p5550_p1 = scmp.lt.s32.totalorder %s5546_s0, %s6060_s17 }
  0x3e   :  { %p5551_p2 = scmp.lt.s32.totalorder %s5549_s23, %s5547_s22 }
  0x40   :  { %p5552_p3 = por %p5551_p2, %p5550_p1 }
  0x42   :  { %p5553_p4 = pnand %p5552_p3, %p5548_p0 }
  0x44   :  { %5556 = shalt.err (!%p5553_p4)
}
  0x45   :  { %s6004_s26 = smov 32   ;;  %s6005_s28 = smov 2  }
  0x46   :  { %105 = dma.hbm_to_vmem [thread:$0]  %s98_s15, 512, %s100_s18, [#allocation6], %s6004_s26, %s6004_s26, %s6005_s28  }
  0x47   :  { %s125_s1 = sshll.u32 %s6075_s29, 4  ;;  %s6006_s2 = smov [#allocation8]   ;;  %s126_s1 = int_to_ptr.hbm [resolvable:$true] %s125_s1 }
  0x48   :  { %s127_s7 = sshll.u32 %s6006_s2, 4  ;;  %s155_s10 = sshll.u32 %s6095_s19, 4  ;;  %s128_s7 = int_to_ptr.vmem [resolvable:$true] %s127_s7  ;;  %s6205_s10 = int_to_ptr.hbm [resolvable:$true] %s155_s10 }
  0x49   :  { %s5569_s17 = sshra.s32 %s126_s1, 4  ;;  %s5573_s16 = scalar_lea.hbm %s6075_s29, 16  ;;  %s5570_s17 = int_to_ptr.hbm [resolvable:$true] %s5569_s17 }
  0x4a   :  { %s5571_s11 = scalar_lea.hbm %s5570_s17, 16  ;;  %p5574_p6 = scmp.lt.s32.totalorder %s5570_s17, %s6075_s29 }
  0x4b   :  { %p5572_p5 = scmp.ne.s32.totalorder %s5570_s17, %s5571_s11  ;;  %p5575_p7 = scmp.lt.s32.totalorder %s5573_s16, %s5571_s11 }
  0x4d   :  { %p5576_p8 = por %p5575_p7, %p5574_p6 }
  0x4f   :  { %p5577_p9 = pnand %p5576_p8, %p5572_p5 }
  0x51   :  { %5580 = shalt.err (!%p5577_p9)
}
  0x52   :  { %s6007_s0 = smov 64   ;;  %s6008_s15 = smov 4  }
  0x53   :  { %133 = dma.hbm_to_vmem [thread:$0]  %s126_s1, 256, %s128_s7, [#allocation9], %s6007_s0, %s6007_s0, %s6008_s15  }
  0x54   :  { %s185_s18 = sshll.u32 %s6115_s12, 4  ;;  %s6009_s22 = smov [#allocation11]   ;;  %s6213_s18 = int_to_ptr.hbm [resolvable:$true] %s185_s18 }
  0x55   :  { %s157_s23 = sshll.u32 %s6009_s22, 4  ;;  %s5593_s29 = sshra.s32 %s6205_s10, 4  ;;  %s158_s23 = int_to_ptr.vmem [resolvable:$true] %s157_s23  ;;  %s5594_s29 = int_to_ptr.hbm [resolvable:$true] %s5593_s29 }
  0x56   :  { %s5595_s2 = scalar_lea.hbm %s5594_s29, 16  ;;  %s5597_s17 = scalar_lea.hbm %s6095_s19, 16 }
  0x57   :  { %p5596_p10 = scmp.ne.s32.totalorder %s5594_s29, %s5595_s2  ;;  %p5598_p11 = scmp.lt.s32.totalorder %s5594_s29, %s6095_s19 }
  0x58   :  { %p5599_p12 = scmp.lt.s32.totalorder %s5597_s17, %s5595_s2 }
  0x5a   :  { %p5600_p13 = por %p5599_p12, %p5598_p11 }
  0x5c   :  { %p5601_p0 = pnand %p5600_p13, %p5596_p10 }
  0x5e   :  { %5604 = shalt.err (!%p5601_p0)
}
  0x5f   :  { %163 = dma.hbm_to_vmem [thread:$0]  %s6205_s10, 256, %s158_s23, [#allocation12], %s6007_s0, %s6007_s0, %s6008_s15  }
  0x60   :  { %s6010_s1 = smov [#allocation14]   ;;  %s209_s11 = sshll.u32 %s6125_s27, 4  ;;  %s6223_s11 = int_to_ptr.hbm [resolvable:$true] %s209_s11 }
  0x61   :  { %s187_s7 = sshll.u32 %s6010_s1, 4  ;;  %s5617_s19 = sshra.s32 %s6213_s18, 4  ;;  %s188_s7 = int_to_ptr.vmem [resolvable:$true] %s187_s7  ;;  %s5618_s19 = int_to_ptr.hbm [resolvable:$true] %s5617_s19 }
  0x62   :  { %s5619_s16 = scalar_lea.hbm %s5618_s19, 16  ;;  %s5621_s22 = scalar_lea.hbm %s6115_s12, 16 }
  0x63   :  { %p5620_p1 = scmp.ne.s32.totalorder %s5618_s19, %s5619_s16  ;;  %p5622_p2 = scmp.lt.s32.totalorder %s5618_s19, %s6115_s12 }
  0x64   :  { %p5623_p3 = scmp.lt.s32.totalorder %s5621_s22, %s5619_s16 }
  0x66   :  { %p5624_p4 = por %p5623_p3, %p5622_p2 }
  0x68   :  { %p5625_p5 = pnand %p5624_p4, %p5620_p1 }
  0x6a   :  { %5628 = shalt.err (!%p5625_p5)
}
  0x6b   :  { %193 = dma.hbm_to_vmem [thread:$0]  %s6213_s18, 256, %s188_s7, [#allocation15], %s6007_s0, %s6007_s0, %s6008_s15  }
  0x6c   :  { %s233_s10 = sshll.u32 %s6135_s6, 4  ;;  %s6011_s23 = smov [#allocation17]   ;;  %s6233_s10 = int_to_ptr.hbm [resolvable:$true] %s233_s10 }
  0x6d   :  { %s211_s29 = sshll.u32 %s6011_s23, 4  ;;  %s5641_s12 = sshra.s32 %s6223_s11, 4  ;;  %s212_s29 = int_to_ptr.vmem [resolvable:$true] %s211_s29  ;;  %s5642_s12 = int_to_ptr.hbm [resolvable:$true] %s5641_s12 }
  0x6e   :  { %s5643_s2 = scalar_lea.hbm %s5642_s12, 16  ;;  %s5645_s17 = scalar_lea.hbm %s6125_s27, 16 }
  0x6f   :  { %p5644_p6 = scmp.ne.s32.totalorder %s5642_s12, %s5643_s2  ;;  %p5646_p7 = scmp.lt.s32.totalorder %s5642_s12, %s6125_s27 }
  0x70   :  { %p5647_p8 = scmp.lt.s32.totalorder %s5645_s17, %s5643_s2 }
  0x72   :  { %p5648_p9 = por %p5647_p8, %p5646_p7 }
  0x74   :  { %p5649_p10 = pnand %p5648_p9, %p5644_p6 }
  0x76   :  { %5652 = shalt.err (!%p5649_p10)
}
  0x77   :  { %217 = dma.hbm_to_vmem [thread:$0]  %s6223_s11, 256, %s212_s29, [#allocation18], %s6007_s0, %s6007_s0, %s6008_s15  }
  0x78   :  { %s6012_s18 = smov [#allocation20]   ;;  %s257_s7 = sshll.u32 %s6145_s24, 4  ;;  %s6243_s7 = int_to_ptr.hbm [resolvable:$true] %s257_s7 }
  0x79   :  { %s235_s1 = sshll.u32 %s6012_s18, 4  ;;  %s5665_s27 = sshra.s32 %s6233_s10, 4  ;;  %s236_s1 = int_to_ptr.vmem [resolvable:$true] %s235_s1  ;;  %s5666_s27 = int_to_ptr.hbm [resolvable:$true] %s5665_s27 }
  0x7a   :  { %s5667_s19 = scalar_lea.hbm %s5666_s27, 16  ;;  %s5669_s16 = scalar_lea.hbm %s6135_s6, 16 }
  0x7b   :  { %p5668_p11 = scmp.ne.s32.totalorder %s5666_s27, %s5667_s19  ;;  %p5670_p12 = scmp.lt.s32.totalorder %s5666_s27, %s6135_s6 }
  0x7c   :  { %p5671_p13 = scmp.lt.s32.totalorder %s5669_s16, %s5667_s19 }
  0x7e   :  { %p5672_p0 = por %p5671_p13, %p5670_p12 }
  0x80   :  { %p5673_p1 = pnand %p5672_p0, %p5668_p11 }
  0x82   :  { %5676 = shalt.err (!%p5673_p1)
}
  0x83   :  { %241 = dma.hbm_to_vmem [thread:$0]  %s6233_s10, 256, %s236_s1, [#allocation21], %s6007_s0, %s6007_s0, %s6008_s15  }
  0x84   :  { %s84_s11 = sshll.u32 %s6055_s13, 4  ;;  %s6013_s22 = smov [#allocation23]   ;;  %s6253_s11 = int_to_ptr.hbm [resolvable:$true] %s84_s11 }
  0x85   :  { %s259_s23 = sshll.u32 %s6013_s22, 4  ;;  %s5689_s6 = sshra.s32 %s6243_s7, 4  ;;  %s260_s23 = int_to_ptr.vmem [resolvable:$true] %s259_s23  ;;  %s5690_s6 = int_to_ptr.hbm [resolvable:$true] %s5689_s6 }
  0x86   :  { %s5691_s29 = scalar_lea.hbm %s5690_s6, 16  ;;  %s5693_s12 = scalar_lea.hbm %s6145_s24, 16 }
  0x87   :  { %p5692_p2 = scmp.ne.s32.totalorder %s5690_s6, %s5691_s29  ;;  %p5694_p3 = scmp.lt.s32.totalorder %s5690_s6, %s6145_s24 }
  0x88   :  { %p5695_p4 = scmp.lt.s32.totalorder %s5693_s12, %s5691_s29 }
  0x8a   :  { %p5696_p5 = por %p5695_p4, %p5694_p3 }
  0x8c   :  { %p5697_p6 = pnand %p5696_p5, %p5692_p2 }
  0x8e   :  { %5700 = shalt.err (!%p5697_p6)
}
  0x8f   :  { %265 = dma.hbm_to_vmem [thread:$0]  %s6243_s7, 256, %s260_s23, [#allocation24], %s6007_s0, %s6007_s0, %s6008_s15  }
  0x90   :  { %s6014_s10 = smov [#allocation2]   ;;  %s110_s17 = sshll.u32 %s6065_s21, 4  ;;  %s6263_s17 = int_to_ptr.hbm [resolvable:$true] %s110_s17 }
  0x91   :  { %s86_s2 = sshll.u32 %s6014_s10, 4  ;;  %s5713_s24 = sshra.s32 %s6253_s11, 4  ;;  %s87_s2 = int_to_ptr.vmem [resolvable:$true] %s86_s2  ;;  %s5714_s24 = int_to_ptr.hbm [resolvable:$true] %s5713_s24 }
  0x92   :  { %s5715_s18 = scalar_lea.hbm %s5714_s24, 16  ;;  %s5717_s1 = scalar_lea.hbm %s6055_s13, 16 }
  0x93   :  { %p5716_p7 = scmp.ne.s32.totalorder %s5714_s24, %s5715_s18  ;;  %p5718_p8 = scmp.lt.s32.totalorder %s5714_s24, %s6055_s13 }
  0x94   :  { %p5719_p9 = scmp.lt.s32.totalorder %s5717_s1, %s5715_s18 }
  0x96   :  { %p5720_p10 = por %p5719_p9, %p5718_p8 }
  0x98   :  { %p5721_p11 = pnand %p5720_p10, %p5716_p7 }
  0x9a   :  { %5724 = shalt.err (!%p5721_p11)
}
  0x9b   :  { %92 = dma.hbm_to_vmem [thread:$0]  %s6253_s11, 256, %s87_s2, [#allocation3], %s6004_s26, %s6004_s26, %s6005_s28  }
  0x9c   :  { %s140_s7 = sshll.u32 %s6085_s8, 4  ;;  %s6015_s27 = smov [#allocation7]   ;;  %s6273_s7 = int_to_ptr.hbm [resolvable:$true] %s140_s7 }
  0x9d   :  { %s112_s19 = sshll.u32 %s6015_s27, 4  ;;  %s5737_s13 = sshra.s32 %s6263_s17, 4  ;;  %s113_s19 = int_to_ptr.vmem [resolvable:$true] %s112_s19  ;;  %s5738_s13 = int_to_ptr.hbm [resolvable:$true] %s5737_s13 }
  0x9e   :  { %s5739_s16 = scalar_lea.hbm %s5738_s13, 16  ;;  %s5741_s22 = scalar_lea.hbm %s6065_s21, 16 }
  0x9f   :  { %p5740_p12 = scmp.ne.s32.totalorder %s5738_s13, %s5739_s16  ;;  %p5742_p13 = scmp.lt.s32.totalorder %s5738_s13, %s6065_s21 }
  0xa0   :  { %p5743_p0 = scmp.lt.s32.totalorder %s5741_s22, %s5739_s16 }
  0xa2   :  { %p5744_p1 = por %p5743_p0, %p5742_p13 }
  0xa4   :  { %p5745_p2 = pnand %p5744_p1, %p5740_p12 }
  0xa6   :  { %5748 = shalt.err (!%p5745_p2)
}
  0xa7   :  { %118 = dma.hbm_to_vmem [thread:$0]  %s6263_s17, 256, %s113_s19, [#allocation6], %s6007_s0, %s6007_s0, %s6008_s15  }
  0xa8   :  { %s6016_s11 = smov [#allocation10]   ;;  %s170_s6 = sshll.u32 %s6105_s30, 4  ;;  %s6283_s6 = int_to_ptr.hbm [resolvable:$true] %s170_s6 }
  0xa9   :  { %s142_s23 = sshll.u32 %s6016_s11, 4  ;;  %s5761_s21 = sshra.s32 %s6273_s7, 4  ;;  %s143_s23 = int_to_ptr.vmem [resolvable:$true] %s142_s23  ;;  %s5762_s21 = int_to_ptr.hbm [resolvable:$true] %s5761_s21 }
  0xaa   :  { %s5763_s29 = scalar_lea.hbm %s5762_s21, 16  ;;  %s5765_s12 = scalar_lea.hbm %s6085_s8, 16 }
  0xab   :  { %p5764_p3 = scmp.ne.s32.totalorder %s5762_s21, %s5763_s29  ;;  %p5766_p4 = scmp.lt.s32.totalorder %s5762_s21, %s6085_s8 }
  0xac   :  { %p5767_p5 = scmp.lt.s32.totalorder %s5765_s12, %s5763_s29 }
  0xae   :  { %p5768_p6 = por %p5767_p5, %p5766_p4 }
  0xb0   :  { %p5769_p7 = pnand %p5768_p6, %p5764_p3 }
  0xb2   :  { %5772 = shalt.err (!%p5769_p7)
}
  0xb3   :  { %148 = dma.hbm_to_vmem [thread:$0]  %s6273_s7, 256, %s143_s23, [#allocation9], %s6007_s0, %s6007_s0, %s6008_s15  }
  0xb4   :  { %s199_s10 = sshll.u32 %s6120_s20, 4  ;;  %s6017_s2 = smov [#allocation13]   ;;  %s200_s10 = int_to_ptr.hbm [resolvable:$true] %s199_s10 }
  0xb5   :  { %s172_s17 = sshll.u32 %s6017_s2, 4  ;;  %s5785_s24 = sshra.s32 %s6283_s6, 4  ;;  %s173_s17 = int_to_ptr.vmem [resolvable:$true] %s172_s17  ;;  %s5786_s24 = int_to_ptr.hbm [resolvable:$true] %s5785_s24 }
  0xb6   :  { %s5787_s8 = scalar_lea.hbm %s5786_s24, 16  ;;  %s5789_s18 = scalar_lea.hbm %s6105_s30, 16 }
  0xb7   :  { %p5788_p8 = scmp.ne.s32.totalorder %s5786_s24, %s5787_s8  ;;  %p5790_p9 = scmp.lt.s32.totalorder %s5786_s24, %s6105_s30 }
  0xb8   :  { %p5791_p10 = scmp.lt.s32.totalorder %s5789_s18, %s5787_s8 }
  0xba   :  { %p5792_p11 = por %p5791_p10, %p5790_p9 }
  0xbc   :  { %p5793_p12 = pnand %p5792_p11, %p5788_p8 }
  0xbe   :  { %5796 = shalt.err (!%p5793_p12)
}
  0xbf   :  { %178 = dma.hbm_to_vmem [thread:$0]  %s6283_s6, 256, %s173_s17, [#allocation12], %s6007_s0, %s6007_s0, %s6008_s15  }
  0xc0   :  { %s6018_s1 = smov [#allocation16]   ;;  %s223_s27 = sshll.u32 %s6130_s4, 4  ;;  %s224_s27 = int_to_ptr.hbm [resolvable:$true] %s223_s27 }
  0xc1   :  { %s201_s7 = sshll.u32 %s6018_s1, 4  ;;  %s5809_s19 = sshra.s32 %s200_s10, 4  ;;  %s202_s7 = int_to_ptr.vmem [resolvable:$true] %s201_s7  ;;  %s5810_s19 = int_to_ptr.hbm [resolvable:$true] %s5809_s19 }
  0xc2   :  { %s5811_s30 = scalar_lea.hbm %s5810_s19, 1  ;;  %s5813_s13 = scalar_lea.hbm %s6120_s20, 1 }
  0xc3   :  { %p5812_p13 = scmp.ne.s32.totalorder %s5810_s19, %s5811_s30  ;;  %p5814_p0 = scmp.lt.s32.totalorder %s5810_s19, %s6120_s20 }
  0xc4   :  { %p5815_p1 = scmp.lt.s32.totalorder %s5813_s13, %s5811_s30 }
  0xc6   :  { %p5816_p2 = por %p5815_p1, %p5814_p0 }
  0xc8   :  { %p5817_p3 = pnand %p5816_p2, %p5812_p13 }
  0xca   :  { %5820 = shalt.err (!%p5817_p3)
}
  0xcb   :  { %204 = dma.hbm_to_vmem [thread:$0]  %s200_s10, 16, %s202_s7, [#allocation15]  }
  0xcc   :  { %s247_s0 = sshll.u32 %s6140_s9, 4  ;;  %s6019_s15 = smov [#allocation19]   ;;  %s248_s0 = int_to_ptr.hbm [resolvable:$true] %s247_s0 }
  0xcd   :  { %s225_s16 = sshll.u32 %s6019_s15, 4  ;;  %s5833_s22 = sshra.s32 %s224_s27, 4  ;;  %s226_s16 = int_to_ptr.vmem [resolvable:$true] %s225_s16  ;;  %s5834_s22 = int_to_ptr.hbm [resolvable:$true] %s5833_s22 }
  0xce   :  { %s5835_s11 = scalar_lea.hbm %s5834_s22, 1  ;;  %s5837_s23 = scalar_lea.hbm %s6130_s4, 1 }
  0xcf   :  { %p5836_p4 = scmp.ne.s32.totalorder %s5834_s22, %s5835_s11  ;;  %p5838_p5 = scmp.lt.s32.totalorder %s5834_s22, %s6130_s4 }
  0xd0   :  { %p5839_p6 = scmp.lt.s32.totalorder %s5837_s23, %s5835_s11 }
  0xd2   :  { %p5840_p7 = por %p5839_p6, %p5838_p5 }
  0xd4   :  { %p5841_p8 = pnand %p5840_p7, %p5836_p4 }
  0xd6   :  { %5844 = shalt.err (!%p5841_p8)
}
  0xd7   :  { %228 = dma.hbm_to_vmem [thread:$0]  %s224_s27, 16, %s226_s16, [#allocation18]  }
  0xd8   :  { %s8039_s20 = sld [smem:[#allocation46_spill]]  ;;  %s6020_s6 = smov [#allocation22]  }
  0xd9   :  { %s249_s21 = sshll.u32 %s6020_s6, 4  ;;  %s5857_s12 = sshra.s32 %s248_s0, 4  ;;  %s250_s21 = int_to_ptr.vmem [resolvable:$true] %s249_s21  ;;  %s5858_s12 = int_to_ptr.hbm [resolvable:$true] %s5857_s12 }
  0xda   :  { %s5859_s10 = scalar_lea.hbm %s5858_s12, 1  ;;  %s5861_s2 = scalar_lea.hbm %s6140_s9, 1 }
  0xdb   :  { %p5860_p9 = scmp.ne.s32.totalorder %s5858_s12, %s5859_s10  ;;  %p5862_p10 = scmp.lt.s32.totalorder %s5858_s12, %s6140_s9 }
  0xdc   :  { %p5863_p11 = scmp.lt.s32.totalorder %s5861_s2, %s5859_s10 }
  0xde   :  { %s271_s29 = sshll.u32 %s8039_s20, 4  ;;  %p5864_p12 = por %p5863_p11, %p5862_p10  ;;  %s272_s29 = int_to_ptr.hbm [resolvable:$true] %s271_s29 }
  0xe0   :  { %p5865_p13 = pnand %p5864_p12, %p5860_p9 }
  0xe2   :  { %5868 = shalt.err (!%p5865_p13)
}
  0xe3   :  { %252 = dma.hbm_to_vmem [thread:$0]  %s248_s0, 16, %s250_s21, [#allocation21]  }
  0xe4   :  { %s8040_s4 = sld [smem:[#allocation51_spill]]  ;;  %s6021_s24 = smov [#allocation25]  }
  0xe5   :  { %s273_s8 = sshll.u32 %s6021_s24, 4  ;;  %s5881_s18 = sshra.s32 %s272_s29, 4  ;;  %s274_s8 = int_to_ptr.vmem [resolvable:$true] %s273_s8  ;;  %s5882_s18 = int_to_ptr.hbm [resolvable:$true] %s5881_s18 }
  0xe6   :  { %s5883_s1 = scalar_lea.hbm %s5882_s18, 1  ;;  %s5885_s7 = scalar_lea.hbm %s8039_s20, 1 }
  0xe7   :  { %p5884_p0 = scmp.ne.s32.totalorder %s5882_s18, %s5883_s1  ;;  %p5886_p1 = scmp.lt.s32.totalorder %s5882_s18, %s8039_s20 }
  0xe8   :  { %p5887_p2 = scmp.lt.s32.totalorder %s5885_s7, %s5883_s1 }
  0xea   :  { %s290_s17 = sshll.u32 %s8040_s4, 4  ;;  %p5888_p3 = por %p5887_p2, %p5886_p1  ;;  %s291_s17 = int_to_ptr.hbm [resolvable:$true] %s290_s17 }
  0xec   :  { %p5889_p4 = pnand %p5888_p3, %p5884_p0 }
  0xee   :  { %5892 = shalt.err (!%p5889_p4)
}
  0xef   :  { %276 = dma.hbm_to_vmem [thread:$0]  %s272_s29, 16, %s274_s8, [#allocation24]  }
  0xf0   :  { %s6022_s9 = smov [#allocation26]   ;;  %s5905_s19 = sshra.s32 %s291_s17, 4  ;;  %s5906_s19 = int_to_ptr.hbm [resolvable:$true] %s5905_s19 }
  0xf1   :  { %s292_s27 = sshll.u32 %s6022_s9, 4  ;;  %s5907_s30 = scalar_lea.hbm %s5906_s19, 1  ;;  %s293_s27 = int_to_ptr.vmem [resolvable:$true] %s292_s27 }
  0xf2   :  { %p5908_p5 = scmp.ne.s32.totalorder %s5906_s19, %s5907_s30  ;;  %s5909_s13 = scalar_lea.hbm %s8040_s4, 1 }
  0xf3   :  { %p5910_p6 = scmp.lt.s32.totalorder %s5906_s19, %s8040_s4  ;;  %p5911_p7 = scmp.lt.s32.totalorder %s5909_s13, %s5907_s30 }
  0xf5   :  { %p5912_p8 = por %p5911_p7, %p5910_p6 }
  0xf7   :  { %p5913_p9 = pnand %p5912_p8, %p5908_p5 }
  0xf9   :  { %5916 = shalt.err (!%p5913_p9)
}
  0xfa   :  { %295 = dma.hbm_to_vmem [thread:$0]  %s291_s17, 16, %s293_s27, [#allocation27]  }
  0xfb   :  { %5953 = dma.done.wait [#allocation3], 256  }
  0xfc   :  { %5954 = vsyncadd [#allocation3], 4294967040 }
  0xfd   :  { %5955 = dma.done.wait [#allocation6], 768  }
  0xfe   :  { %5956 = vsyncadd [#allocation6], 4294966528 }
  0xff   :  { %5957 = dma.done.wait [#allocation9], 512  }
 0x100   :  { %5958 = vsyncadd [#allocation9], 4294966784 }
 0x101   :  { %5959 = dma.done.wait [#allocation12], 512  }
 0x102   :  { %5960 = vsyncadd [#allocation12], 4294966784 }
 0x103   :  { %5961 = dma.done.wait [#allocation15], 272  }
 0x104   :  { %5962 = vsyncadd [#allocation15], 4294967024 }
 0x105   :  { %5963 = dma.done.wait [#allocation18], 272  }
 0x106   :  { %5964 = vsyncadd [#allocation18], 4294967024 }
 0x107   :  { %5965 = dma.done.wait [#allocation21], 272  }
 0x108   :  { %5966 = vsyncadd [#allocation21], 4294967024 }
 0x109   :  { %5967 = dma.done.wait [#allocation24], 272  }
 0x10a   :  { %5968 = vsyncadd [#allocation24], 4294967024 }
 0x10b   :  { %5969 = dma.done.wait [#allocation27], 16  }
 0x10c   :  { %5970 = vsyncadd [#allocation27], 4294967280  ;;  %s8041_s0 = sld [smem:[#allocation39_spill]]  ;;  %v5360_v0 = vld [vmem:[#allocation8 + $0x8] sm:$0xff]  ;;  %v5358_v1 = vld [vmem:[#allocation7 + $0x8] sm:$0xff]  ;;  %vm471_vm0 = vcmask 261120  }
 0x10d   :  { %v5359_v2 = vld [vmem:[#allocation8] sm:$0xff]  ;;  %515 = vmatpush.bf16.msra.mxu1 %v5360_v0  ;;  %481 = vmatpush.bf16.msra.mxu0 %v5358_v1  ;;  %v395_v16 = vld [vmem:[#allocation2 + $0x8] sm:$0x3]  ;;  %v396_v17 = vld [vmem:[#allocation2 + $0xa] sm:$0x3]  ;;  %s8042_s15 = sld [smem:[#allocation42_spill]] }
 0x10e   :  { %v391_v10 = vld [vmem:[#allocation2] sm:$0x3]  ;;  %v392_v12 = vld [vmem:[#allocation2 + $0x2] sm:$0x3]  ;;  %v393_v13 = vld [vmem:[#allocation2 + $0x4] sm:$0x3] }
 0x10f   :  { %v394_v14 = vld [vmem:[#allocation2 + $0x6] sm:$0x3]  ;;  %v397_v18 = vld [vmem:[#allocation2 + $0xc] sm:$0x3]  ;;  %v398_v22 = vld [vmem:[#allocation2 + $0xe] sm:$0x3] }
 0x110   :  { %v5357_v24 = vld [vmem:[#allocation7] sm:$0xff]  ;;  %v5362_v25 = vld [vmem:[#allocation10 + $0x8] sm:$0xff]  ;;  %s8043_s16 = sld [smem:[#allocation41_spill]]  ;;  %s6023_s22 = smov 112   ;;  %v6026_v58 = vmov 1983009808  }
 0x111   :  { %516 = vmatpush.bf16.msra.mxu1 %v5359_v2  ;;  %482 = vmatpush.bf16.msra.mxu0 %v5357_v24  ;;  %v5361_v28 = vld [vmem:[#allocation10] sm:$0xff]  ;;  %s6024_s11 = smov 120   ;;  %s8044_s23 = sld [smem:[#allocation43_spill]]  ;;  %v630_v59 = vunpack.c.l.s4 %v6026_v58  ;;  %vm639_vm1 = vcmask 1047556   ;;  %vm1321_vm2 = vcmask 64512   ;;  %vm1573_vm3 = vcmask 1043456  }
 0x112   :  { %v6315_v3 = vld [vmem:[%s8041_s0] sm:$0x3]  ;;  %v6318_v4 = vld [vmem:[%s8041_s0 + $0x2] sm:$0x3]  ;;  %v6321_v5 = vld [vmem:[%s8041_s0 + $0x4] sm:$0x3]  ;;  %580 = vmatpush.bf16.msra.mxu2 %v5362_v25 }
 0x113   :  { %v6324_v6 = vld [vmem:[%s8041_s0 + $0x6] sm:$0x3]  ;;  %v6327_v7 = vld [vmem:[%s8041_s0 + $0x8] sm:$0x3]  ;;  %v6330_v8 = vld [vmem:[%s8041_s0 + $0xa] sm:$0x3]  ;;  %v415_v15 = vadd.f32 %v391_v10, %v6315_v3  ;;  %v416_v19 = vadd.f32 %v392_v12, %v6318_v4  ;;  %v417_v20 = vadd.f32 %v393_v13, %v6321_v5  ;;  %v6397_v0 = vunpack.c.0.s8 %v630_v59 }
 0x114   :  { %v6333_v9 = vld [vmem:[%s8041_s0 + $0xc] sm:$0x3]  ;;  %v6336_v11 = vld [vmem:[%s8041_s0 + $0xe] sm:$0x3]  ;;  %v418_v21 = vadd.f32 %v394_v14, %v6324_v6  ;;  %v419_v23 = vadd.f32 %v395_v16, %v6327_v7  ;;  %v420_v26 = vadd.f32 %v396_v17, %v6330_v8  ;;  %v5443_v36 = vld [vmem:[%s8042_s15] ss:$0 sm:$0xff] }
 0x115   :  { %431 = vst [vmem:[#allocation1] ss:$4 sm:$0xff] %v415_v15  ;;  %v421_v27 = vadd.f32 %v397_v18, %v6333_v9  ;;  %v422_v29 = vadd.f32 %v398_v22, %v6336_v11  ;;  %s6025_s20 = smov 104   ;;  %v6027_v17 = vmov 1934713408   ;;  %s6028_s6 = smov 8  }
 0x116   :  { %433 = vst [vmem:[#allocation1 + $0x1] ss:$4 sm:$0xff] %v416_v19  ;;  %581 = vmatpush.bf16.msra.mxu2 %v5361_v28  ;;  %v5444_v43 = vld [vmem:[%s8043_s16] ss:$0 sm:$0xff]  ;;  %v644_v18 = vunpack.c.l.s4 %v6027_v17  ;;  %s6029_s21 = smov 16   ;;  %s8045_s29 = sld [smem:[#allocation44_spill]] }
 0x117   :  { %435 = vst [vmem:[#allocation1 + $0x2] ss:$4 sm:$0xff] %v417_v20  ;;  %v5445_v51 = vld [vmem:[%s8044_s23] ss:$0 sm:$0xff]  ;;  %s6030_s12 = smov 24   ;;  %vm1984_vm4 = vcmask 130048  }
 0x118   :  { %437 = vst [vmem:[#allocation1 + $0x3] ss:$4 sm:$0xff] %v418_v21  ;;  %vm1987_vm5 = vcmask 195584   ;;  %s8046_s10 = sld [smem:[#allocation49_spill]]  ;;  %s5174_s8 = sshll.u32 %s6195_s25, 4  ;;  %s5175_s8 = int_to_ptr.hbm [resolvable:$true] %s5174_s8 }
 0x119   :  { %439 = vst [vmem:[#allocation1 + $0x20] ss:$4 sm:$0xff] %v419_v23  ;;  %s8047_s2 = sld [smem:[#allocation50_spill]]  ;;  %s5941_s18 = sshra.s32 %s5175_s8, 4  ;;  %s5942_s18 = int_to_ptr.hbm [resolvable:$true] %s5941_s18 }
 0x11a   :  { %441 = vst [vmem:[#allocation1 + $0x21] ss:$4 sm:$0xff] %v420_v26  ;;  %s8048_s4 = sld [smem:[#allocation40_spill]]  ;;  %s5943_s1 = scalar_lea.hbm %s5942_s18, 16 }
 0x11b   :  { %443 = vst [vmem:[#allocation1 + $0x22] ss:$4 sm:$0xff] %v421_v27  ;;  %s8049_s17 = sld [smem:[#allocation45_spill]]  ;;  %p5944_p10 = scmp.ne.s32.totalorder %s5942_s18, %s5943_s1 }
 0x11c   :  { %445 = vst [vmem:[#allocation1 + $0x23] ss:$4 sm:$0xff] %v422_v29  ;;  %v6407_v29 = vunpack.c.0.s8 %v644_v18  ;;  %s8054_s24 = sld [smem:[#allocation48_spill]]  ;;  %s5945_s7 = scalar_lea.hbm %s6195_s25, 16 }
 0x11d   :  { %p5946_p11 = scmp.lt.s32.totalorder %s5942_s18, %s6195_s25  ;;  %p5947_p12 = scmp.lt.s32.totalorder %s5945_s7, %s5943_s1 }
 0x11f   :  { %v446_v30 = vld.sshfl [vmem:[#allocation1] sm:$0xff pattern:$0x73625140]  ;;  %p5948_p13 = por %p5947_p12, %p5946_p11 }
 0x120   :  { %531 = vst [vmem:[#allocation1] ss:$4 sm:$0xff] %v6315_v3 }
 0x121   :  { %533 = vst [vmem:[#allocation1 + $0x1] ss:$4 sm:$0xff] %v6318_v4  ;;  %p5949_p0 = pnand %p5948_p13, %p5944_p10 }
 0x122   :  { %535 = vst [vmem:[#allocation1 + $0x2] ss:$4 sm:$0xff] %v6321_v5 }
 0x123   :  { %v447_v31 = vld.sshfl [vmem:[#allocation1 + $0x20] sm:$0xff pattern:$0x73625140]  ;;  %537 = vst [vmem:[#allocation1 + $0x3] ss:$4 sm:$0xff] %v6324_v6 }
 0x124   :  { %v450_v32 = vpack.c.bf16 %v447_v31, %v446_v30  ;;  %539 = vst [vmem:[#allocation1 + $0x20] ss:$4 sm:$0xff] %v6327_v7 }
 0x125   :  { %541 = vst [vmem:[#allocation1 + $0x21] ss:$4 sm:$0xff] %v6330_v8 }
 0x126   :  { %5242 = vmatmul.msk.bf16.vlgmr.msra.gmra.mxu1 %vm471_vm0, %v450_v32  ;;  %543 = vst [vmem:[#allocation1 + $0x22] ss:$4 sm:$0xff] %v6333_v9  ;;  %5233 = vmatmul.msk.bf16.vlgmr.msra.gmra.mxu0 %vm471_vm0, %v450_v32 }
 0x127   :  { %545 = vst [vmem:[#allocation1 + $0x23] ss:$4 sm:$0xff] %v6336_v11 }
 0x12a   :  { %v546_v33 = vld.sshfl [vmem:[#allocation1] sm:$0xff pattern:$0x73625140] }
 0x12e   :  { %v547_v34 = vld.sshfl [vmem:[#allocation1 + $0x20] sm:$0xff pattern:$0x73625140] }
 0x12f   :  { %v550_v35 = vpack.c.bf16 %v547_v34, %v546_v33 }
 0x131   :  { %5251 = vmatmul.msk.bf16.vlgmr.msra.gmra.mxu2 %vm471_vm0, %v550_v35 }
 0x1a3   :  { %v518_v37 = vpop.f32.mrf.mxu1  ;;  %v484_v39 = vpop.f32.mrf.mxu0 }
 0x1a4   :  { %v519_v38 = vadd.f32 %v5443_v36, %v518_v37  ;;  %v485_v48 = vadd.f32 %v5444_v43, %v484_v39 }
 0x1a6   :  { %v833_v40 = vpack.c.bf16 %v519_v38, %v519_v38  ;;  %v6376_v49 = vpack.c.bf16 %v485_v48, %v485_v48 }
 0x1a8   :  { %841 = vrot.lane.b32.xlu2 %v833_v40, %s6023_s22  ;;  %837 = vrot.lane.b32.xlu0 %v833_v40, %s6024_s11  ;;  %v852_v10 = vshrl.u32 %v833_v40, 16 }
 0x1ab   :  { %v520_v41 = vpop.f32.mrf.mxu1  ;;  %v486_v45 = vpop.f32.mrf.mxu0 }
 0x1ac   :  { %v521_v42 = vadd.f32 %v5443_v36, %v520_v41  ;;  %v487_v46 = vadd.f32 %v5444_v43, %v486_v45 }
 0x1ae   :  { %v6361_v44 = vpack.c.bf16 %v521_v42, %v521_v42  ;;  %v6368_v47 = vpack.c.bf16 %v487_v46, %v487_v46 }
 0x1b0   :  { %843 = vrot.lane.b32.xlu1 %v6361_v44, %s6023_s22  ;;  %845 = vrot.lane.b32.xlu2 %v833_v40, %s6025_s20  ;;  %v864_v24 = vshrl.u32 %v6361_v44, 16  ;;  %v619_v46 = vshrl.u32 %v6368_v47, 16 }
 0x1b1   :  { %839 = vrot.lane.b32.xlu0 %v6361_v44, %s6024_s11 }
 0x1b4   :  { %v583_v50 = vpop.f32.mrf.mxu2 }
 0x1b5   :  { %v584_v52 = vadd.f32 %v5445_v51, %v583_v50  ;;  %v607_v50 = vshrl.u32 %v6376_v49, 16 }
 0x1b7   :  { %v6387_v54 = vpack.c.bf16 %v584_v52, %v584_v52 }
 0x1b8   :  { %847 = vrot.lane.b32.xlu1 %v6361_v44, %s6025_s20  ;;  %598 = vrot.lane.b32.xlu2 %v6368_v47, %s6023_s22 }
 0x1b9   :  { %594 = vrot.lane.b32.xlu0 %v6368_v47, %s6024_s11 }
 0x1bc   :  { %v585_v55 = vpop.f32.mrf.mxu2 }
 0x1bd   :  { %v586_v56 = vadd.f32 %v5445_v51, %v585_v55 }
 0x1bf   :  { %v6391_v57 = vpack.c.bf16 %v586_v56, %v586_v56 }
 0x1c0   :  { %600 = vrot.lane.b32.xlu2 %v6376_v49, %s6025_s20  ;;  %592 = vrot.lane.b32.xlu1 %v6376_v49, %s6024_s11 }
 0x1c1   :  { %602 = vrot.lane.b32.xlu0 %v6368_v47, %s6025_s20 }
 0x1c8   :  { %596 = vrot.lane.b32.xlu1 %v6376_v49, %s6023_s22  ;;  %1081 = vrot.lane.b32.xlu2 %v6387_v54, %s6024_s11 }
 0x1c9   :  { %1087 = vrot.lane.b32.xlu0 %v6391_v57, %s6023_s22 }
 0x1d0   :  { %1083 = vrot.lane.b32.xlu1 %v6391_v57, %s6024_s11 }
 0x202   :  { %v842_v53 = vpop.permute.xlu2 %841 }
 0x203   :  { %v858_v12 = vshrl.u32 %v842_v53, 16 }
 0x20a   :  { %v846_v60 = vpop.permute.xlu2 %845 }
 0x20b   :  { %v859_v63 = vshrl.u32 %v846_v60, 16  ;;  %v857_v1 = vpack.i.b16 %v846_v60, %v842_v53 }
 0x20d   :  { %v860_v14 = vpack.i.b16 %v859_v63, %v858_v12  ;;  %v882_v15 = vperm.slane %v857_v1, %v6397_v0 }
 0x20f   :  { %v908_v23 = vperm.slane %v860_v14, %v6397_v0  ;;  %v883_v25 = vrot.slane %v882_v15, 4 }
 0x211   :  { %v909_v33 = vrot.slane %v908_v23, 4 }
 0x212   :  { %v6401_v20 = vpop.permute.xlu2 %598 }
 0x213   :  { %v625_v58 = vshrl.u32 %v6401_v20, 16 }
 0x21a   :  { %v838_v61 = vpop.permute.xlu0 %837  ;;  %v6426_v52 = vpop.permute.xlu2 %600 }
 0x21b   :  { %v853_v62 = vshrl.u32 %v838_v61, 16  ;;  %v851_v2 = vpack.i.b16 %v838_v61, %v833_v40  ;;  %v614_v12 = vshrl.u32 %v6426_v52, 16 }
 0x21d   :  { %v854_v13 = vpack.i.b16 %v853_v62, %v852_v10  ;;  %v877_v16 = vperm.slane %v851_v2, %v6397_v0 }
 0x21f   :  { %v903_v21 = vperm.slane %v854_v13, %v6397_v0  ;;  %v885_v26 = vrot.slane %v877_v16, 4  ;;  %v884_v30 = vsel %vm639_vm1, %v883_v25, %v877_v16 }
 0x220   :  { %v6413_v36 = vperm.slane %v884_v30, %v6407_v29 }
 0x221   :  { %v911_v31 = vrot.slane %v903_v21, 4  ;;  %v886_v34 = vsel %vm639_vm1, %v882_v15, %v885_v26  ;;  %v910_v37 = vsel %vm639_vm1, %v909_v33, %v903_v21 }
 0x222   :  { %v844_v19 = vpop.permute.xlu1 %843  ;;  %v6419_v45 = vperm.slane %v886_v34, %v6407_v29  ;;  %v6424_v51 = vperm.slane %v910_v37, %v6407_v29  ;;  %v895_v59 = vrot.slane %v6413_v36, 4 }
 0x223   :  { %v840_v22 = vpop.permute.xlu0 %839  ;;  %v912_v40 = vsel %vm639_vm1, %v908_v23, %v911_v31  ;;  %v870_v41 = vshrl.u32 %v844_v19, 16 }
 0x224   :  { %v863_v27 = vpack.i.b16 %v840_v22, %v6361_v44  ;;  %v865_v28 = vshrl.u32 %v840_v22, 16  ;;  %v6432_v60 = vperm.slane %v912_v40, %v6407_v29  ;;  %v897_v10 = vrot.slane %v6419_v45, 4 }
 0x225   :  { %v921_v15 = vrot.slane %v6424_v51, 4 }
 0x226   :  { %v866_v32 = vpack.i.b16 %v865_v28, %v864_v24  ;;  %v929_v35 = vperm.slane %v863_v27, %v6397_v0  ;;  %v6447_v24 = vsel %vm639_vm1, 0, %v895_v59 }
 0x227   :  { %v6464_v40 = vsel %vm639_vm1, 0, %v921_v15 }
 0x228   :  { %v955_v38 = vperm.slane %v866_v32, %v6397_v0  ;;  %v937_v53 = vrot.slane %v929_v35, 4 }
 0x22a   :  { %v848_v39 = vpop.permute.xlu1 %847  ;;  %v963_v61 = vrot.slane %v955_v38, 4 }
 0x22b   :  { %v869_v42 = vpack.i.b16 %v848_v39, %v844_v19  ;;  %v871_v43 = vshrl.u32 %v848_v39, 16  ;;  %v595_v44 = vpop.permute.xlu0 %594  ;;  %v923_v19 = vrot.slane %v6432_v60, 4 }
 0x22c   :  { %v620_v48 = vshrl.u32 %v595_v44, 16  ;;  %v618_v2 = vpack.i.b16 %v595_v44, %v6368_v47 }
 0x22d   :  { %v872_v55 = vpack.i.b16 %v871_v43, %v870_v41  ;;  %v934_v56 = vperm.slane %v869_v42, %v6397_v0  ;;  %v6468_v41 = vsel %vm639_vm1, 0, %v923_v19 }
 0x22e   :  { %v621_v14 = vpack.i.b16 %v620_v48, %v619_v46  ;;  %v685_v26 = vperm.slane %v618_v2, %v6397_v0 }
 0x22f   :  { %v935_v62 = vrot.slane %v934_v56, 4  ;;  %v938_v63 = vsel %vm639_vm1, %v934_v56, %v937_v53  ;;  %v960_v1 = vperm.slane %v872_v55, %v6397_v0 }
 0x230   :  { %v946_v13 = vperm.slane %v938_v63, %v6407_v29  ;;  %v711_v32 = vperm.slane %v621_v14, %v6397_v0  ;;  %v693_v43 = vrot.slane %v685_v26, 4 }
 0x231   :  { %v936_v16 = vsel %vm639_vm1, %v935_v62, %v929_v35  ;;  %v961_v17 = vrot.slane %v960_v1, 4  ;;  %v964_v18 = vsel %vm639_vm1, %v960_v1, %v963_v61 }
 0x232   :  { %v942_v21 = vperm.slane %v936_v16, %v6407_v29  ;;  %v949_v22 = vrot.slane %v946_v13, 4  ;;  %v972_v47 = vperm.slane %v964_v18, %v6407_v29  ;;  %v593_v23 = vpop.permute.xlu1 %592  ;;  %v719_v53 = vrot.slane %v711_v32, 4 }
 0x233   :  { %v962_v25 = vsel %vm639_vm1, %v961_v17, %v955_v38  ;;  %v603_v27 = vpop.permute.xlu0 %602  ;;  %v606_v28 = vpack.i.b16 %v593_v23, %v6376_v49  ;;  %v608_v33 = vshrl.u32 %v593_v23, 16  ;;  %v6461_v38 = vsel %vm639_vm1, 0, %v897_v10 }
 0x234   :  { %v947_v30 = vrot.slane %v942_v21, 4  ;;  %v968_v31 = vperm.slane %v962_v25, %v6407_v29  ;;  %v6455_v34 = vsel %vm639_vm1, 0, %v949_v22  ;;  %v6457_v35 = vrot.slane %v972_v47, 4 }
 0x235   :  { %v624_v37 = vpack.i.b16 %v603_v27, %v6401_v20  ;;  %v626_v39 = vshrl.u32 %v603_v27, 16  ;;  %v632_v49 = vperm.slane %v606_v28, %v6397_v0  ;;  %v1001_v20 = vrot.slane %v6455_v34, 4 }
 0x236   :  { %v948_v42 = vsel %vm639_vm1, 0, %v947_v30  ;;  %v973_v48 = vrot.slane %v968_v31, 4  ;;  %v609_v55 = vpack.i.b16 %v608_v33, %v607_v50  ;;  %v6475_v56 = vsel %vm639_vm1, 0, %v6457_v35 }
 0x237   :  { %v627_v44 = vpack.i.b16 %v626_v39, %v625_v58  ;;  %v690_v46 = vperm.slane %v624_v37, %v6397_v0  ;;  %v995_v63 = vrot.slane %v948_v42, 4  ;;  %v641_v58 = vrot.slane %v632_v49, 4 }
 0x238   :  { %v982_v10 = vsel %vm639_vm1, %v949_v22, %v6419_v45  ;;  %v659_v18 = vperm.slane %v609_v55, %v6397_v0  ;;  %v977_v45 = vsel %vm639_vm1, %v947_v30, %v6413_v36  ;;  %v974_v22 = vsel %vm639_vm1, 0, %v973_v48 }
 0x239   :  { %v691_v59 = vrot.slane %v690_v46, 4  ;;  %v694_v61 = vsel %vm639_vm1, %v690_v46, %v693_v43  ;;  %v716_v62 = vperm.slane %v627_v44, %v6397_v0  ;;  %v986_v27 = vperm.slane %v982_v10, %v6397_v0 }
 0x23a   :  { %v702_v1 = vperm.slane %v694_v61, %v6407_v29  ;;  %v597_v2 = vpop.permute.xlu1 %596  ;;  %v1039_v34 = vrot.slane %v6475_v56, 4  ;;  %v667_v37 = vrot.slane %v659_v18, 4  ;;  %v981_v30 = vperm.slane %v977_v45, %v6397_v0 }
 0x23b   :  { %v692_v13 = vsel %vm639_vm1, %v691_v59, %v685_v26  ;;  %v717_v50 = vrot.slane %v716_v62, 4  ;;  %v720_v14 = vsel %vm639_vm1, %v716_v62, %v719_v53  ;;  %v612_v15 = vpack.i.b16 %v6426_v52, %v597_v2 }
 0x23c   :  { %v698_v16 = vperm.slane %v692_v13, %v6407_v29  ;;  %v728_v17 = vperm.slane %v720_v14, %v6407_v29  ;;  %v613_v19 = vshrl.u32 %v597_v2, 16  ;;  %v705_v21 = vrot.slane %v702_v1, 4 }
 0x23d   :  { %v718_v47 = vsel %vm639_vm1, %v717_v50, %v711_v32  ;;  %v637_v23 = vperm.slane %v612_v15, %v6397_v0  ;;  %v996_v53 = vsel %vm639_vm1, %v995_v63, %v6447_v24  ;;  %v987_v61 = vrot.slane %v986_v27, 4 }
 0x23e   :  { %v703_v25 = vrot.slane %v698_v16, 4  ;;  %v724_v26 = vperm.slane %v718_v47, %v6407_v29  ;;  %v6495_v28 = vrot.slane %v728_v17, 4  ;;  %v615_v31 = vpack.i.b16 %v614_v12, %v613_v19 }
 0x23f   :  { %v638_v33 = vrot.slane %v637_v23, 4  ;;  %v642_v32 = vsel %vm639_vm1, %v637_v23, %v641_v58  ;;  %v6507_v42 = vsel %vm639_vm1, 0, %v705_v21  ;;  %v1033_v12 = vrot.slane %v974_v22, 4 }
 0x240   :  { %v650_v36 = vperm.slane %v642_v32, %v6407_v29  ;;  %v6504_v39 = vsel %vm639_vm1, 0, %v703_v25  ;;  %v664_v52 = vperm.slane %v615_v31, %v6397_v0  ;;  %v6511_v44 = vrot.slane %v724_v26, 4 }
 0x241   :  { %v640_v43 = vsel %vm639_vm1, %v638_v33, %v632_v49  ;;  %v732_v55 = vsel %vm639_vm1, 0, %v6495_v28  ;;  %v751_v62 = vrot.slane %v6504_v39, 4  ;;  %v757_v49 = vrot.slane %v6507_v42, 4 }
 0x242   :  { %v646_v46 = vperm.slane %v640_v43, %v6407_v29  ;;  %v665_v56 = vrot.slane %v664_v52, 4  ;;  %v668_v59 = vsel %vm639_vm1, %v664_v52, %v667_v37  ;;  %v653_v1 = vrot.slane %v650_v36, 4 }
 0x243   :  { %v6522_v58 = vperm.slane %v668_v59, %v6407_v29  ;;  %v988_v24 = vsel %vm639_vm1, %v987_v61, %v981_v30  ;;  %v1002_v63 = vsel %vm639_vm1, %v1001_v20, %v6461_v38  ;;  %v795_v13 = vrot.slane %v732_v55, 4 }
 0x244   :  { %v651_v2 = vrot.slane %v646_v46, 4  ;;  %v666_v10 = vsel %vm639_vm1, %v665_v56, %v659_v18  ;;  %v1015_v15 = vsel %vm639_vm1, %v973_v48, %v6424_v51  ;;  %v6536_v16 = vsel %vm639_vm1, 0, %v6511_v44 }
 0x245   :  { %v6529_v50 = vperm.slane %v666_v10, %v6407_v29  ;;  %v679_v14 = vrot.slane %v6522_v58, 4  ;;  %v992_v17 = vperm.slane %v988_v24, %v6407_v29  ;;  %v1000_v18 = vperm.slane %v996_v53, %v6397_v0 }
 0x246   :  { %v1006_v38 = vperm.slane %v1002_v63, %v6397_v0  ;;  %v6542_v20 = vsel %vm639_vm1, 0, %v653_v1  ;;  %v738_v47 = vsel %vm639_vm1, %v705_v21, %v650_v36  ;;  %v1020_v51 = vsel %vm639_vm1, %v6457_v35, %v6432_v60 }
 0x247   :  { %v680_v19 = vsel %vm639_vm1, 0, %v679_v14  ;;  %v652_v48 = vsel %vm639_vm1, 0, %v651_v2  ;;  %v677_v23 = vrot.slane %v6529_v50, 4  ;;  %v1019_v22 = vperm.slane %v1015_v15, %v6397_v0 }
 0x248   :  { %v1007_v45 = vrot.slane %v1006_v38, 4  ;;  %v6553_v26 = vsel %vm639_vm1, %v795_v13, %v680_v19  ;;  %v1024_v27 = vperm.slane %v1020_v51, %v6397_v0  ;;  %v1034_v31 = vsel %vm639_vm1, %v1033_v12, %v6464_v40 }
 0x249   :  { %v1040_v21 = vsel %vm639_vm1, %v1039_v34, %v6468_v41  ;;  %v1038_v35 = vperm.slane %v1034_v31, %v6397_v0  ;;  %v993_v32 = vrot.slane %v992_v17, 4  ;;  %v733_v30 = vsel %vm639_vm1, %v703_v25, %v646_v46 }
 0x24a   :  { %v1008_v60 = vsel %vm639_vm1, %v1007_v45, %v1000_v18  ;;  %v1044_v33 = vperm.slane %v1040_v21, %v6397_v0  ;;  %v1025_v36 = vrot.slane %v1024_v27, 4  ;;  %v742_v43 = vperm.slane %v738_v47, %v6397_v0 }
 0x24b   :  { %v1012_v37 = vperm.slane %v1008_v60, %v6407_v29  ;;  %v1056_v52 = vshrl.u32 %v992_v17, 16  ;;  %v994_v40 = vsel %vm639_vm1, 0, %v993_v32  ;;  %v737_v41 = vperm.slane %v733_v30, %v6397_v0 }
 0x24c   :  { %v1045_v53 = vrot.slane %v1044_v33, 4  ;;  %v1026_v55 = vsel %vm639_vm1, %v1025_v36, %v1019_v22  ;;  %v1062_v1 = vshrl.u32 %v994_v40, 16  ;;  %v743_v2 = vrot.slane %v742_v43, 4 }
 0x24d   :  { %v1055_v34 = vpack.i.b16 %v1012_v37, %v992_v17  ;;  %v1057_v12 = vshrl.u32 %v1012_v37, 16  ;;  %v1013_v56 = vrot.slane %v1012_v37, 4  ;;  %v1030_v59 = vperm.slane %v1026_v55, %v6407_v29 }
 0x24e   :  { %v1046_v61 = vsel %vm639_vm1, %v1045_v53, %v1038_v35  ;;  %v744_v22 = vsel %vm639_vm1, %v743_v2, %v737_v41  ;;  %v752_v60 = vsel %vm639_vm1, %v751_v62, %v652_v48  ;;  %v678_v36 = vsel %vm639_vm1, 0, %v677_v23 }
 0x24f   :  { %v1326_v25 = vsel %vm1321_vm2, %v1055_v34, 0  ;;  %v1058_v46 = vpack.i.b16 %v1057_v12, %v1056_v52  ;;  %v1050_v10 = vperm.slane %v1046_v61, %v6407_v29  ;;  %v1014_v24 = vsel %vm639_vm1, 0, %v1013_v56 }
 0x250   :  { %1335 = vmatpush.bf16.xpose.msra.mxu3 %v1326_v25  ;;  %v1061_v63 = vpack.i.b16 %v1014_v24, %v994_v40  ;;  %v1068_v13 = vshrl.u32 %v1030_v59, 16  ;;  %v1063_v14 = vshrl.u32 %v1014_v24, 16  ;;  %v1031_v15 = vrot.slane %v1030_v59, 4 }
 0x251   :  { %v1345_v17 = vsel %vm1321_vm2, %v1058_v46, 0  ;;  %v1067_v18 = vpack.i.b16 %v1050_v10, %v1030_v59  ;;  %v1069_v38 = vshrl.u32 %v1050_v10, 16  ;;  %v1051_v19 = vrot.slane %v1050_v10, 4 }
 0x252   :  { %1354 = vmatpush.bf16.xpose.msrb.mxu0 %v1345_v17  ;;  %v1364_v47 = vsel %vm1321_vm2, %v1061_v63, 0  ;;  %v1064_v51 = vpack.i.b16 %v1063_v14, %v1062_v1  ;;  %v1032_v45 = vsel %vm639_vm1, 0, %v1031_v15  ;;  %v748_v43 = vperm.slane %v744_v22, %v6407_v29 }
 0x253   :  { %v1402_v27 = vsel %vm1321_vm2, %v1067_v18, 0  ;;  %1373 = vmatpush.bf16.xpose.msrb.mxu1 %v1364_v47  ;;  %v1070_v31 = vpack.i.b16 %v1069_v38, %v1068_v13  ;;  %v1052_v21 = vsel %vm639_vm1, 0, %v1051_v19  ;;  %v1074_v32 = vshrl.u32 %v1032_v45, 16 }
 0x254   :  { %v1383_v35 = vsel %vm1321_vm2, %v1064_v51, 0  ;;  %v1073_v33 = vpack.i.b16 %v1052_v21, %v1032_v45  ;;  %v1075_v37 = vshrl.u32 %v1052_v21, 16  ;;  %v758_v39 = vsel %vm639_vm1, %v757_v49, %v6542_v20 }
 0x255   :  { %v1421_v30 = vsel %vm1321_vm2, %v1070_v31, 0  ;;  %1392 = vmatpush.bf16.xpose.msrb.mxu2 %v1383_v35  ;;  %v756_v52 = vperm.slane %v752_v60, %v6397_v0  ;;  %v762_v53 = vperm.slane %v758_v39, %v6397_v0  ;;  %v789_v23 = vrot.slane %v6536_v16, 4 }
 0x256   :  { %v1440_v62 = vsel %vm1321_vm2, %v1073_v33, 0  ;;  %v1076_v48 = vpack.i.b16 %v1075_v37, %v1074_v32  ;;  %v776_v40 = vsel %vm639_vm1, %v6495_v28, %v6522_v58  ;;  %v800_v49 = vperm.slane %v6553_v26, %v6397_v0 }
 0x257   :  { %v763_v42 = vrot.slane %v762_v53, 4  ;;  %v749_v20 = vrot.slane %v748_v43, 4  ;;  %v790_v34 = vsel %vm639_vm1, %v789_v23, %v678_v36  ;;  %v780_v12 = vperm.slane %v776_v40, %v6397_v0 }
 0x258   :  { %1411 = vmatpush.bf16.xpose.msrb.mxu3 %v1402_v27  ;;  %v1459_v41 = vsel %vm1321_vm2, %v1076_v48, 0  ;;  %v771_v16 = vsel %vm639_vm1, %v6511_v44, %v6529_v50  ;;  %v812_v58 = vshrl.u32 %v748_v43, 16  ;;  %v794_v56 = vperm.slane %v790_v34, %v6397_v0 }
 0x259   :  { %v764_v55 = vsel %vm639_vm1, %v763_v42, %v756_v52  ;;  %v801_v59 = vrot.slane %v800_v49, 4  ;;  %v750_v1 = vsel %vm639_vm1, 0, %v749_v20  ;;  %v781_v25 = vrot.slane %v780_v12, 4 }
 0x25a   :  { %1430 = vmatpush.bf16.xpose.msra.mxu0 %v1421_v30  ;;  %v768_v28 = vperm.slane %v764_v55, %v6407_v29  ;;  %v775_v46 = vperm.slane %v771_v16, %v6397_v0  ;;  %v818_v50 = vshrl.u32 %v750_v1, 16 }
 0x25b   :  { %1449 = vmatpush.bf16.xpose.msra.mxu1 %v1440_v62  ;;  %v802_v13 = vsel %vm639_vm1, %v801_v59, %v794_v56 }
 0x25c   :  { %v811_v61 = vpack.i.b16 %v768_v28, %v748_v43  ;;  %v813_v26 = vshrl.u32 %v768_v28, 16  ;;  %v769_v2 = vrot.slane %v768_v28, 4  ;;  %v782_v15 = vsel %vm639_vm1, %v781_v25, %v775_v46 }
 0x25d   :  { %1468 = vmatpush.bf16.xpose.msra.mxu2 %v1459_v41  ;;  %v806_v17 = vperm.slane %v802_v13, %v6407_v29  ;;  %v786_v18 = vperm.slane %v782_v15, %v6407_v29 }
 0x25e   :  { %5252 = vmatmul.msk.bf16.vlgmr.msra.gmra.mxu3 %vm1321_vm2, %v811_v61  ;;  %v814_v10 = vpack.i.b16 %v813_v26, %v812_v58  ;;  %v770_v24 = vsel %vm639_vm1, 0, %v769_v2  ;;  %v6643_v61 = vpop.permute.xlu2 %1081  ;;  %v6645_v26 = vpop.permute.xlu0 %1087 }
 0x25f   :  { %v817_v44 = vpack.i.b16 %v770_v24, %v750_v1  ;;  %v819_v63 = vshrl.u32 %v770_v24, 16  ;;  %v807_v38 = vrot.slane %v806_v17, 4  ;;  %v787_v19 = vrot.slane %v786_v18, 4  ;;  %v6647_v2 = vpop.permute.xlu1 %1083 }
 0x260   :  { %5253 = vmatmul.msk.bf16.vlgmr.msrb.gmra.mxu0 %vm1321_vm2, %v814_v10  ;;  %v825_v47 = vshrl.u32 %v806_v17, 16  ;;  %v823_v45 = vpack.i.b16 %v806_v17, %v786_v18  ;;  %v824_v22 = vshrl.u32 %v786_v18, 16 }
 0x261   :  { %5254 = vmatmul.msk.bf16.vlgmr.msrb.gmra.mxu1 %vm1321_vm2, %v817_v44  ;;  %v820_v14 = vpack.i.b16 %v819_v63, %v818_v50  ;;  %v808_v51 = vsel %vm639_vm1, 0, %v807_v38  ;;  %v788_v27 = vsel %vm639_vm1, 0, %v787_v19 }
 0x262   :  { %v831_v31 = vshrl.u32 %v808_v51, 16  ;;  %v826_v21 = vpack.i.b16 %v825_v47, %v824_v22  ;;  %v829_v60 = vpack.i.b16 %v808_v51, %v788_v27  ;;  %v830_v35 = vshrl.u32 %v788_v27, 16 }
 0x263   :  { %5255 = vmatmul.msk.bf16.vlgmr.msrb.gmra.mxu2 %vm1321_vm2, %v820_v14 }
 0x264   :  { %v832_v33 = vpack.i.b16 %v831_v31, %v830_v35 }
 0x26e   :  { %5256 = vmatmul.msk.bf16.vlgmr.msrb.gmra.mxu3 %vm1321_vm2, %v823_v45 }
 0x270   :  { %5257 = vmatmul.msk.bf16.vlgmr.msra.gmra.mxu0 %vm1321_vm2, %v826_v21 }
 0x271   :  { %5258 = vmatmul.msk.bf16.vlgmr.msra.gmra.mxu1 %vm1321_vm2, %v829_v60 }
 0x273   :  { %5259 = vmatmul.msk.bf16.vlgmr.msra.gmra.mxu2 %vm1321_vm2, %v832_v33 }
 0x2dd   :  { %v1356_v32 = vpop.f32.mrf.mxu0 }
 0x2de   :  { %v1375_v37 = vpop.f32.mrf.mxu1  ;;  %v1477_v36 = vsel %vm1321_vm2, %v1356_v32, -inf }
 0x2df   :  { %1478 = vmax.xlane.f32.xlu2 %v1477_v36  ;;  %v1480_v52 = vsel %vm1321_vm2, %v1375_v37, -inf }
 0x2e1   :  { %v1337_v30 = vpop.f32.mrf.mxu3 }
 0x2e2   :  { %v1474_v43 = vsel %vm1321_vm2, %v1337_v30, -inf }
 0x2e3   :  { %1475 = vmax.xlane.f32.xlu0 %v1474_v43 }
 0x2e5   :  { %v1358_v39 = vpop.f32.mrf.mxu0 }
 0x2e6   :  { %v1377_v62 = vpop.f32.mrf.mxu1  ;;  %v1394_v48 = vpop.f32.mrf.mxu2 }
 0x2e7   :  { %1481 = vmax.xlane.f32.xlu2 %v1480_v52  ;;  %v1483_v53 = vsel %vm1321_vm2, %v1394_v48, -inf }
 0x2e8   :  { %1484 = vmax.xlane.f32.xlu1 %v1483_v53 }
 0x2e9   :  { %v1339_v23 = vpop.f32.mrf.mxu3 }
 0x2ea   :  { %v1096_v23 = vshrl.u32 %v6387_v54, 16 }
 0x2ed   :  { %v1432_v40 = vpop.f32.mrf.mxu0 }
 0x2ee   :  { %v1396_v41 = vpop.f32.mrf.mxu2  ;;  %v6630_v42 = vpop.f32.mrf.mxu1  ;;  %v1489_v49 = vsel %vm1321_vm2, %v1432_v40, -inf }
 0x2ef   :  { %1490 = vmax.xlane.f32.xlu2 %v1489_v49  ;;  %v1492_v20 = vsel %vm1321_vm2, %v6630_v42, -inf }
 0x2f0   :  { %1493 = vmax.xlane.f32.xlu0 %v1492_v20  ;;  %v1095_v20 = vpack.i.b16 %v6643_v61, %v6387_v54 }
 0x2f1   :  { %v1413_v34 = vpop.f32.mrf.mxu3 }
 0x2f2   :  { %v1486_v58 = vsel %vm1321_vm2, %v1413_v34, -inf }
 0x2f5   :  { %v1434_v12 = vpop.f32.mrf.mxu0 }
 0x2f6   :  { %v1453_v55 = vpop.f32.mrf.mxu1  ;;  %v1470_v16 = vpop.f32.mrf.mxu2  ;;  %v1108_v12 = vshrl.u32 %v6391_v57, 16 }
 0x2f7   :  { %v1495_v28 = vsel %vm1321_vm2, %v1470_v16, -inf  ;;  %v1109_v55 = vshrl.u32 %v6647_v2, 16 }
 0x2f8   :  { %1496 = vmax.xlane.f32.xlu1 %v1495_v28  ;;  %1487 = vmax.xlane.f32.xlu0 %v1486_v58  ;;  %v1121_v58 = vperm.slane %v1095_v20, %v6397_v0 }
 0x2f9   :  { %v1415_v56 = vpop.f32.mrf.mxu3 }
 0x2fe   :  { %v1472_v59 = vpop.f32.mrf.mxu2 }
 0x2ff   :  { %v1107_v59 = vpack.i.b16 %v6647_v2, %v6391_v57 }
 0x307   :  { %1089 = vrot.lane.b32.xlu2 %v6387_v54, %s6025_s20 }
 0x30c   :  { %1085 = vrot.lane.b32.xlu0 %v6387_v54, %s6023_s22 }
 0x311   :  { %1091 = vrot.lane.b32.xlu1 %v6391_v57, %s6025_s20 }
 0x352   :  { %v1479_v1 = vpop.xlane.xlu2 %1478 }
 0x353   :  { %v1499_v25 = vsub.f32 %v1356_v32, %v1479_v1 }
 0x355   :  { %v1508_v46 = vmul.f32 1.442695, %v1499_v25  ;;  %v1110_v25 = vpack.i.b16 %v1109_v55, %v1108_v12 }
 0x356   :  { %v1476_v10 = vpop.xlane.xlu0 %1475 }
 0x357   :  { %5459 = vpow2.f32 %v1508_v46  ;;  %v1498_v24 = vsub.f32 %v1337_v30, %v1476_v10 }
 0x359   :  { %v1506_v44 = vmul.f32 1.442695, %v1498_v24  ;;  %v1129_v24 = vrot.slane %v1121_v58, 4 }
 0x35a   :  { %v1482_v50 = vpop.xlane.xlu2 %1481 }
 0x35b   :  { %5461 = vpow2.f32 %v1506_v44  ;;  %v1500_v63 = vsub.f32 %v1375_v37, %v1482_v50  ;;  %v1485_v13 = vpop.xlane.xlu1 %1484 }
 0x35c   :  { %v1501_v14 = vsub.f32 %v1394_v48, %v1485_v13  ;;  %v1173_v13 = vperm.slane %v1107_v59, %v6397_v0 }
 0x35d   :  { %v6649_v15 = vpop.eup %5459  ;;  %v1510_v17 = vmul.f32 1.442695, %v1500_v63 }
 0x35e   :  { %v1512_v18 = vmul.f32 1.442695, %v1501_v14  ;;  %v1525_v38 = vsel %vm1321_vm2, %v6649_v15, 0.0  ;;  %v1199_v14 = vperm.slane %v1110_v25, %v6397_v0 }
 0x35f   :  { %1526 = vadd.xlane.f32.xlu2 %v1525_v38  ;;  %v1114_v38 = vshrl.u32 %v6645_v26, 16 }
 0x360   :  { %5463 = vpow2.f32 %v1512_v18 }
 0x361   :  { %v6653_v19 = vpop.eup %5461  ;;  %5465 = vpow2.f32 %v1510_v17 }
 0x362   :  { %v1491_v47 = vpop.xlane.xlu2 %1490  ;;  %v1522_v51 = vsel %vm1321_vm2, %v6653_v19, 0.0 }
 0x363   :  { %v1503_v45 = vsub.f32 %v1432_v40, %v1491_v47  ;;  %1523 = vadd.xlane.f32.xlu1 %v1522_v51  ;;  %v1494_v22 = vpop.xlane.xlu0 %1493  ;;  %v1097_v40 = vshrl.u32 %v6643_v61, 16 }
 0x364   :  { %v1504_v62 = vsub.f32 %v6630_v42, %v1494_v22 }
 0x365   :  { %v1516_v27 = vmul.f32 1.442695, %v1503_v45 }
 0x366   :  { %v6657_v31 = vpop.eup %5463  ;;  %v1518_v52 = vmul.f32 1.442695, %v1504_v62 }
 0x367   :  { %v6659_v21 = vpop.eup %5465  ;;  %v1531_v60 = vsel %vm1321_vm2, %v6657_v31, 0.0  ;;  %5467 = vpow2.f32 %v1516_v27 }
 0x368   :  { %1532 = vadd.xlane.f32.xlu0 %v1531_v60  ;;  %v1528_v35 = vsel %vm1321_vm2, %v6659_v21, 0.0 }
 0x36b   :  { %1529 = vadd.xlane.f32.xlu1 %v1528_v35  ;;  %v1497_v33 = vpop.xlane.xlu1 %1496  ;;  %v1488_v32 = vpop.xlane.xlu0 %1487 }
 0x36c   :  { %v1505_v37 = vsub.f32 %v1470_v16, %v1497_v33  ;;  %v1502_v36 = vsub.f32 %v1413_v34, %v1488_v32  ;;  %v1098_v34 = vpack.i.b16 %v1097_v40, %v1096_v23  ;;  %v1090_v16 = vpop.permute.xlu2 %1089 }
 0x36d   :  { %v6665_v39 = vpop.eup %5467  ;;  %v1103_v46 = vshrl.u32 %v1090_v16, 16 }
 0x36e   :  { %v1520_v30 = vmul.f32 1.442695, %v1505_v37  ;;  %v1514_v43 = vmul.f32 1.442695, %v1502_v36  ;;  %v1537_v48 = vsel %vm1321_vm2, %v6665_v39, 0.0  ;;  %v1147_v56 = vperm.slane %v1098_v34, %v6397_v0 }
 0x36f   :  { %v1181_v37 = vrot.slane %v1173_v13, 4 }
 0x370   :  { %5469 = vpow2.f32 %v1520_v30  ;;  %v1155_v63 = vrot.slane %v1147_v56, 4 }
 0x371   :  { %5471 = vpow2.f32 %v1514_v43  ;;  %v1207_v43 = vrot.slane %v1199_v14, 4 }
 0x372   :  { %5473 = vpow2.f32 %v1518_v52 }
 0x373   :  { %1538 = vadd.xlane.f32.xlu1 %v1537_v48 }
 0x376   :  { %v6670_v53 = vpop.eup %5469 }
 0x377   :  { %v6674_v41 = vpop.eup %5471  ;;  %v1543_v49 = vsel %vm1321_vm2, %v6670_v53, 0.0 }
 0x378   :  { %1544 = vadd.xlane.f32.xlu2 %v1543_v49  ;;  %v1534_v42 = vsel %vm1321_vm2, %v6674_v41, 0.0  ;;  %v6684_v28 = vpop.eup %5473 }
 0x379   :  { %1535 = vadd.xlane.f32.xlu0 %v1534_v42  ;;  %v1540_v10 = vsel %vm1321_vm2, %v6684_v28, 0.0 }
 0x37e   :  { %v1086_v1 = vpop.permute.xlu0 %1085 }
 0x37f   :  { %v1101_v54 = vpack.i.b16 %v1090_v16, %v1086_v1  ;;  %v1102_v61 = vshrl.u32 %v1086_v1, 16 }
 0x381   :  { %v1104_v44 = vpack.i.b16 %v1103_v46, %v1102_v61  ;;  %v1126_v50 = vperm.slane %v1101_v54, %v6397_v0  ;;  %1541 = vadd.xlane.f32.xlu0 %v1540_v10 }
 0x383   :  { %v1127_v17 = vrot.slane %v1126_v50, 4  ;;  %v1130_v57 = vsel %vm639_vm1, %v1126_v50, %v1129_v24  ;;  %v1152_v2 = vperm.slane %v1104_v44, %v6397_v0  ;;  %v1092_v18 = vpop.permute.xlu1 %1091 }
 0x384   :  { %v1138_v47 = vperm.slane %v1130_v57, %v6407_v29  ;;  %v1113_v51 = vpack.i.b16 %v1092_v18, %v6645_v26  ;;  %v1115_v45 = vshrl.u32 %v1092_v18, 16 }
 0x385   :  { %v1128_v22 = vsel %vm639_vm1, %v1127_v17, %v1121_v58  ;;  %v1153_v27 = vrot.slane %v1152_v2, 4  ;;  %v1156_v60 = vsel %vm639_vm1, %v1152_v2, %v1155_v63 }
 0x386   :  { %v1134_v35 = vperm.slane %v1128_v22, %v6407_v29  ;;  %v1164_v33 = vperm.slane %v1156_v60, %v6407_v29  ;;  %v1116_v32 = vpack.i.b16 %v1115_v45, %v1114_v38  ;;  %v1178_v30 = vperm.slane %v1113_v51, %v6397_v0 }
 0x387   :  { %v1154_v36 = vsel %vm639_vm1, %v1153_v27, %v1147_v56  ;;  %v1141_v62 = vrot.slane %v1138_v47, 4 }
 0x388   :  { %v1160_v26 = vperm.slane %v1154_v36, %v6407_v29  ;;  %v1139_v48 = vrot.slane %v1134_v35, 4  ;;  %v1179_v52 = vrot.slane %v1178_v30, 4  ;;  %v1182_v23 = vsel %vm639_vm1, %v1178_v30, %v1181_v37 }
 0x389   :  { %v1204_v40 = vperm.slane %v1116_v32, %v6397_v0  ;;  %v1167_v49 = vrot.slane %v1164_v33, 4  ;;  %v1190_v42 = vperm.slane %v1182_v23, %v6407_v29  ;;  %v1142_v1 = vsel %vm639_vm1, 0, %v1141_v62 }
 0x38a   :  { %v1165_v20 = vrot.slane %v1160_v26, 4  ;;  %v1180_v34 = vsel %vm639_vm1, %v1179_v52, %v1173_v13  ;;  %v1140_v59 = vsel %vm639_vm1, 0, %v1139_v48 }
 0x38b   :  { %v1205_v12 = vrot.slane %v1204_v40, 4  ;;  %v1208_v55 = vsel %vm639_vm1, %v1204_v40, %v1207_v43  ;;  %v1186_v16 = vperm.slane %v1180_v34, %v6407_v29  ;;  %v1193_v58 = vrot.slane %v1190_v42, 4 }
 0x38c   :  { %v1216_v56 = vperm.slane %v1208_v55, %v6407_v29  ;;  %v1166_v24 = vsel %vm639_vm1, 0, %v1165_v20  ;;  %v1168_v44 = vsel %vm639_vm1, 0, %v1167_v49 }
 0x38d   :  { %v1206_v25 = vsel %vm639_vm1, %v1205_v12, %v1199_v14  ;;  %v1191_v46 = vrot.slane %v1186_v16, 4  ;;  %v1194_v54 = vsel %vm639_vm1, 0, %v1193_v58  ;;  %v1226_v50 = vsel %vm639_vm1, %v1193_v58, %v1138_v47 }
 0x38e   :  { %v1212_v61 = vperm.slane %v1206_v25, %v6407_v29  ;;  %v1219_v10 = vrot.slane %v1216_v56, 4  ;;  %v1245_v63 = vrot.slane %v1194_v54, 4  ;;  %v1230_v2 = vperm.slane %v1226_v50, %v6397_v0 }
 0x38f   :  { %v1192_v13 = vsel %vm639_vm1, 0, %v1191_v46  ;;  %v1221_v14 = vsel %vm639_vm1, %v1191_v46, %v1134_v35 }
 0x390   :  { %v1217_v17 = vrot.slane %v1212_v61, 4  ;;  %v1220_v57 = vsel %vm639_vm1, 0, %v1219_v10  ;;  %v1239_v18 = vrot.slane %v1192_v13, 4  ;;  %v1246_v38 = vsel %vm639_vm1, %v1245_v63, %v1142_v1 }
 0x391   :  { %v1264_v51 = vsel %vm639_vm1, %v1219_v10, %v1164_v33  ;;  %v1283_v22 = vrot.slane %v1220_v57, 4  ;;  %v1225_v47 = vperm.slane %v1221_v14, %v6397_v0  ;;  %v1250_v27 = vperm.slane %v1246_v38, %v6397_v0 }
 0x392   :  { %v1218_v45 = vsel %vm639_vm1, 0, %v1217_v17  ;;  %v1231_v32 = vrot.slane %v1230_v2, 4  ;;  %v1240_v37 = vsel %vm639_vm1, %v1239_v18, %v1140_v59  ;;  %v1259_v35 = vsel %vm639_vm1, %v1217_v17, %v1160_v26 }
 0x393   :  { %v1277_v60 = vrot.slane %v1218_v45, 4  ;;  %v1244_v36 = vperm.slane %v1240_v37, %v6397_v0  ;;  %v1251_v30 = vrot.slane %v1250_v27, 4  ;;  %v1263_v43 = vperm.slane %v1259_v35, %v6397_v0 }
 0x394   :  { %v1268_v33 = vperm.slane %v1264_v51, %v6397_v0  ;;  %v1232_v62 = vsel %vm639_vm1, %v1231_v32, %v1225_v47  ;;  %v1284_v52 = vsel %vm639_vm1, %v1283_v22, %v1168_v44 }
 0x395   :  { %v1278_v48 = vsel %vm639_vm1, %v1277_v60, %v1166_v24  ;;  %v1236_v23 = vperm.slane %v1232_v62, %v6407_v29  ;;  %v1252_v40 = vsel %vm639_vm1, %v1251_v30, %v1244_v36  ;;  %v1288_v20 = vperm.slane %v1284_v52, %v6397_v0 }
 0x396   :  { %v1269_v49 = vrot.slane %v1268_v33, 4  ;;  %v1256_v26 = vperm.slane %v1252_v40, %v6407_v29  ;;  %v1282_v42 = vperm.slane %v1278_v48, %v6397_v0 }
 0x397   :  { %v1300_v34 = vshrl.u32 %v1236_v23, 16  ;;  %v1237_v55 = vrot.slane %v1236_v23, 4  ;;  %v1289_v59 = vrot.slane %v1288_v20, 4 }
 0x398   :  { %v1270_v12 = vsel %vm639_vm1, %v1269_v49, %v1263_v43  ;;  %v1299_v16 = vpack.i.b16 %v1256_v26, %v1236_v23  ;;  %v1301_v58 = vshrl.u32 %v1256_v26, 16  ;;  %v1257_v25 = vrot.slane %v1256_v26, 4 }
 0x399   :  { %v1274_v56 = vperm.slane %v1270_v12, %v6407_v29  ;;  %v1238_v1 = vsel %vm639_vm1, 0, %v1237_v55  ;;  %v1290_v61 = vsel %vm639_vm1, %v1289_v59, %v1282_v42 }
 0x39a   :  { %v1575_v46 = vsel %vm1573_vm3, %v1299_v16, 0  ;;  %v1302_v54 = vpack.i.b16 %v1301_v58, %v1300_v34  ;;  %v1294_v10 = vperm.slane %v1290_v61, %v6407_v29  ;;  %v1258_v24 = vsel %vm639_vm1, 0, %v1257_v25 }
 0x39b   :  { %1584 = vmatpush.bf16.msra.mxu3 %v1575_v46  ;;  %v1312_v44 = vshrl.u32 %v1274_v56, 16  ;;  %v1275_v50 = vrot.slane %v1274_v56, 4  ;;  %v1305_v13 = vpack.i.b16 %v1258_v24, %v1238_v1  ;;  %v1306_v17 = vshrl.u32 %v1238_v1, 16 }
 0x39c   :  { %v1594_v63 = vsel %vm1573_vm3, %v1302_v54, 0  ;;  %v1307_v57 = vshrl.u32 %v1258_v24, 16  ;;  %v1311_v14 = vpack.i.b16 %v1294_v10, %v1274_v56  ;;  %v1313_v2 = vshrl.u32 %v1294_v10, 16 }
 0x39d   :  { %1603 = vmatpush.bf16.msrb.mxu0 %v1594_v63  ;;  %v1276_v18 = vsel %vm639_vm1, 0, %v1275_v50  ;;  %v1295_v38 = vrot.slane %v1294_v10, 4  ;;  %v1613_v51 = vsel %vm1573_vm3, %v1305_v13, 0 }
 0x39e   :  { %v1308_v45 = vpack.i.b16 %v1307_v57, %v1306_v17  ;;  %v1651_v22 = vsel %vm1573_vm3, %v1311_v14, 0  ;;  %1622 = vmatpush.bf16.msrb.mxu1 %v1613_v51  ;;  %v1314_v47 = vpack.i.b16 %v1313_v2, %v1312_v44  ;;  %v1318_v37 = vshrl.u32 %v1276_v18, 16 }
 0x39f   :  { %v1296_v27 = vsel %vm639_vm1, 0, %v1295_v38  ;;  %1660 = vmatpush.bf16.msrb.mxu3 %v1651_v22 }
 0x3a0   :  { %v1632_v60 = vsel %vm1573_vm3, %v1308_v45, 0  ;;  %v1317_v32 = vpack.i.b16 %v1296_v27, %v1276_v18  ;;  %v1319_v35 = vshrl.u32 %v1296_v27, 16  ;;  %v1670_v36 = vsel %vm1573_vm3, %v1314_v47, 0 }
 0x3a1   :  { %1641 = vmatpush.bf16.msrb.mxu2 %v1632_v60  ;;  %1679 = vmatpush.bf16.msra.mxu0 %v1670_v36 }
 0x3a2   :  { %v1689_v30 = vsel %vm1573_vm3, %v1317_v32, 0  ;;  %v1320_v43 = vpack.i.b16 %v1319_v35, %v1318_v37 }
 0x3a3   :  { %1698 = vmatpush.bf16.msra.mxu1 %v1689_v30 }
 0x3a4   :  { %v1708_v33 = vsel %vm1573_vm3, %v1320_v43, 0 }
 0x3a5   :  { %1717 = vmatpush.bf16.msra.mxu2 %v1708_v33 }
 0x3d2   :  { %v1527_v62 = vpop.xlane.xlu2 %1526 }
 0x3d3   :  { %5475 = vrcp.f32 %v1527_v62 }
 0x3d6   :  { %v1524_v48 = vpop.xlane.xlu1 %1523 }
 0x3d7   :  { %5477 = vrcp.f32 %v1524_v48 }
 0x3d9   :  { %v5476_v52 = vpop.eup %5475 }
 0x3da   :  { %v1555_v23 = vmul.f32 %v5476_v52, %v6649_v15 }
 0x3db   :  { %v1533_v40 = vpop.xlane.xlu0 %1532 }
 0x3dc   :  { %v1563_v49 = vpack.c.bf16 %v1555_v23, %v1555_v23  ;;  %5479 = vrcp.f32 %v1533_v40 }
 0x3dd   :  { %v5478_v26 = vpop.eup %5477 }
 0x3de   :  { %v1554_v42 = vmul.f32 %v5478_v26, %v6653_v19  ;;  %v1530_v20 = vpop.xlane.xlu1 %1529  ;;  %5261 = vmatmul.msk.bf16.vlgmr.msrb.gmra.mxu0 %vm1321_vm2, %v1563_v49 }
 0x3df   :  { %5481 = vrcp.f32 %v1530_v20 }
 0x3e0   :  { %v1562_v34 = vpack.c.bf16 %v1554_v42, %v1554_v42 }
 0x3e2   :  { %v5480_v12 = vpop.eup %5479  ;;  %5260 = vmatmul.msk.bf16.vlgmr.msra.gmra.mxu3 %vm1321_vm2, %v1562_v34 }
 0x3e3   :  { %v1557_v55 = vmul.f32 %v5480_v12, %v6657_v31 }
 0x3e5   :  { %v5482_v16 = vpop.eup %5481  ;;  %v1565_v58 = vpack.c.bf16 %v1557_v55, %v1557_v55 }
 0x3e6   :  { %v1556_v15 = vmul.f32 %v5482_v16, %v6659_v21  ;;  %v1539_v56 = vpop.xlane.xlu1 %1538 }
 0x3e7   :  { %5483 = vrcp.f32 %v1539_v56  ;;  %5263 = vmatmul.msk.bf16.vlgmr.msrb.gmra.mxu2 %vm1321_vm2, %v1565_v58 }
 0x3e8   :  { %v1564_v59 = vpack.c.bf16 %v1556_v15, %v1556_v15 }
 0x3ea   :  { %5262 = vmatmul.msk.bf16.vlgmr.msrb.gmra.mxu1 %vm1321_vm2, %v1564_v59 }
 0x3eb   :  { %v1545_v19 = vpop.xlane.xlu2 %1544 }
 0x3ec   :  { %5485 = vrcp.f32 %v1545_v19  ;;  %v1536_v1 = vpop.xlane.xlu0 %1535 }
 0x3ed   :  { %v5484_v25 = vpop.eup %5483  ;;  %5487 = vrcp.f32 %v1536_v1 }
 0x3ee   :  { %v1559_v46 = vmul.f32 %v5484_v25, %v6665_v39 }
 0x3f0   :  { %v1567_v54 = vpack.c.bf16 %v1559_v46, %v1559_v46 }
 0x3f2   :  { %v5486_v31 = vpop.eup %5485  ;;  %5265 = vmatmul.msk.bf16.vlgmr.msra.gmra.mxu0 %vm1321_vm2, %v1567_v54 }
 0x3f3   :  { %v5488_v61 = vpop.eup %5487  ;;  %v1561_v21 = vmul.f32 %v5486_v31, %v6670_v53 }
 0x3f4   :  { %v1558_v10 = vmul.f32 %v5488_v61, %v6674_v41  ;;  %v1542_v24 = vpop.xlane.xlu0 %1541 }
 0x3f5   :  { %v1569_v44 = vpack.c.bf16 %v1561_v21, %v1561_v21  ;;  %5489 = vrcp.f32 %v1542_v24 }
 0x3f6   :  { %v1566_v50 = vpack.c.bf16 %v1558_v10, %v1558_v10 }
 0x3f7   :  { %5267 = vmatmul.msk.bf16.vlgmr.msra.gmra.mxu2 %vm1321_vm2, %v1569_v44 }
 0x3f8   :  { %5264 = vmatmul.msk.bf16.vlgmr.msrb.gmra.mxu3 %vm1321_vm2, %v1566_v50 }
 0x3fb   :  { %v5490_v63 = vpop.eup %5489 }
 0x3fc   :  { %v1560_v39 = vmul.f32 %v5490_v63, %v6684_v28 }
 0x3fe   :  { %v1568_v13 = vpack.c.bf16 %v1560_v39, %v1560_v39 }
 0x400   :  { %5266 = vmatmul.msk.bf16.vlgmr.msra.gmra.mxu1 %vm1321_vm2, %v1568_v13 }
 0x45b   :  { %v1605_v17 = vpop.f32.mrf.mxu0 }
 0x45c   :  { %v1724_v14 = vpack.c.bf16 %v1605_v17, %v1605_v17 }
 0x45e   :  { %v1735_v18 = vshrl.u32 %v1724_v14, 16 }
 0x463   :  { %v1607_v57 = vpop.f32.mrf.mxu0 }
 0x465   :  { %v1586_v53 = vpop.f32.mrf.mxu3 }
 0x466   :  { %v1723_v2 = vpack.c.bf16 %v1586_v53, %v1586_v53 }
 0x467   :  { %v1624_v41 = vpop.f32.mrf.mxu1 }
 0x468   :  { %v1733_v38 = vpack.i.b16 %v1724_v14, %v1723_v2  ;;  %v1734_v51 = vshrl.u32 %v1723_v2, 16  ;;  %v1725_v45 = vpack.c.bf16 %v1624_v41, %v1624_v41 }
 0x46a   :  { %v1736_v22 = vpack.i.b16 %v1735_v18, %v1734_v51  ;;  %v1643_v47 = vpop.f32.mrf.mxu2  ;;  %v1759_v60 = vperm.slane %v1733_v38, %v6397_v0  ;;  %v1740_v32 = vshrl.u32 %v1725_v45, 16 }
 0x46b   :  { %v1726_v27 = vpack.c.bf16 %v1643_v47, %v1643_v47 }
 0x46c   :  { %v1785_v28 = vperm.slane %v1736_v22, %v6397_v0  ;;  %v1767_v48 = vrot.slane %v1759_v60, 4 }
 0x46d   :  { %v1739_v37 = vpack.i.b16 %v1726_v27, %v1725_v45  ;;  %v1741_v35 = vshrl.u32 %v1726_v27, 16  ;;  %v1588_v36 = vpop.f32.mrf.mxu3 }
 0x46e   :  { %v1793_v52 = vrot.slane %v1785_v28, 4 }
 0x46f   :  { %v1742_v30 = vpack.i.b16 %v1741_v35, %v1740_v32  ;;  %v1764_v43 = vperm.slane %v1739_v37, %v6397_v0  ;;  %v1626_v33 = vpop.f32.mrf.mxu1  ;;  %v1681_v62 = vpop.f32.mrf.mxu0 }
 0x470   :  { %v1728_v46 = vpack.c.bf16 %v1681_v62, %v1681_v62 }
 0x471   :  { %v1765_v23 = vrot.slane %v1764_v43, 4  ;;  %v1790_v40 = vperm.slane %v1742_v30, %v6397_v0  ;;  %v1768_v49 = vsel %vm639_vm1, %v1764_v43, %v1767_v48 }
 0x472   :  { %v1645_v26 = vpop.f32.mrf.mxu2  ;;  %v1776_v55 = vperm.slane %v1768_v49, %v6407_v29  ;;  %v1747_v39 = vshrl.u32 %v1728_v46, 16 }
 0x473   :  { %v1791_v42 = vrot.slane %v1790_v40, 4  ;;  %v1794_v20 = vsel %vm639_vm1, %v1790_v40, %v1793_v52  ;;  %v1766_v34 = vsel %vm639_vm1, %v1765_v23, %v1759_v60 }
 0x474   :  { %v1802_v12 = vperm.slane %v1794_v20, %v6407_v29  ;;  %v1772_v56 = vperm.slane %v1766_v34, %v6407_v29  ;;  %v1779_v25 = vrot.slane %v1776_v55, 4 }
 0x475   :  { %v1792_v16 = vsel %vm639_vm1, %v1791_v42, %v1785_v28 }
 0x476   :  { %v1798_v58 = vperm.slane %v1792_v16, %v6407_v29  ;;  %v1805_v15 = vrot.slane %v1802_v12, 4  ;;  %v1777_v21 = vrot.slane %v1772_v56, 4  ;;  %v1780_v63 = vsel %vm639_vm1, 0, %v1779_v25 }
 0x477   :  { %v1683_v59 = vpop.f32.mrf.mxu0  ;;  %v1899_v47 = vrot.slane %v1780_v63, 4 }
 0x478   :  { %v1803_v19 = vrot.slane %v1798_v58, 4  ;;  %v1806_v1 = vsel %vm639_vm1, 0, %v1805_v15  ;;  %v1778_v2 = vsel %vm639_vm1, 0, %v1777_v21 }
 0x479   :  { %v1905_v31 = vrot.slane %v1806_v1, 4  ;;  %v1859_v36 = vrot.slane %v1778_v2, 4  ;;  %v1900_v23 = vsel %vm639_vm1, %v1899_v47, %v1776_v55 }
 0x47a   :  { %v1804_v54 = vsel %vm639_vm1, 0, %v1803_v19  ;;  %v1719_v61 = vpop.f32.mrf.mxu2  ;;  %v1904_v59 = vperm.slane %v1900_v23, %v6397_v0 }
 0x47b   :  { %v1865_v10 = vrot.slane %v1804_v54, 4  ;;  %v1662_v24 = vpop.f32.mrf.mxu3  ;;  %v1730_v44 = vpack.c.bf16 %v1719_v61, %v1719_v61  ;;  %v1906_v17 = vsel %vm639_vm1, %v1905_v31, %v1802_v12  ;;  %v1860_v12 = vsel %vm639_vm1, %v1859_v36, %v1772_v56 }
 0x47c   :  { %v1727_v50 = vpack.c.bf16 %v1662_v24, %v1662_v24  ;;  %v1910_v27 = vperm.slane %v1906_v17, %v6397_v0  ;;  %v1864_v31 = vperm.slane %v1860_v12, %v6397_v0 }
 0x47d   :  { %v1700_v13 = vpop.f32.mrf.mxu1  ;;  %v1866_v41 = vsel %vm639_vm1, %v1865_v10, %v1798_v58  ;;  %v1753_v18 = vshrl.u32 %v1730_v44, 16 }
 0x47e   :  { %v1745_v57 = vpack.i.b16 %v1728_v46, %v1727_v50  ;;  %v1746_v14 = vshrl.u32 %v1727_v50, 16  ;;  %v1729_v53 = vpack.c.bf16 %v1700_v13, %v1700_v13  ;;  %v1870_v43 = vperm.slane %v1866_v41, %v6397_v0 }
 0x47f   :  { %v1911_v26 = vrot.slane %v1910_v27, 4 }
 0x480   :  { %v1748_v38 = vpack.i.b16 %v1747_v39, %v1746_v14  ;;  %v1811_v51 = vperm.slane %v1745_v57, %v6397_v0  ;;  %v1751_v45 = vpack.i.b16 %v1730_v44, %v1729_v53  ;;  %v1752_v22 = vshrl.u32 %v1729_v53, 16 }
 0x481   :  { %v1871_v19 = vrot.slane %v1870_v43, 4  ;;  %v1912_v56 = vsel %vm639_vm1, %v1911_v26, %v1904_v59 }
 0x482   :  { %v1819_v60 = vrot.slane %v1811_v51, 4  ;;  %v1837_v28 = vperm.slane %v1748_v38, %v6397_v0  ;;  %v1754_v32 = vpack.i.b16 %v1753_v18, %v1752_v22  ;;  %v1816_v37 = vperm.slane %v1751_v45, %v6397_v0  ;;  %v1721_v35 = vpop.f32.mrf.mxu2 }
 0x483   :  { %v1664_v30 = vpop.f32.mrf.mxu3  ;;  %v1872_v63 = vsel %vm639_vm1, %v1871_v19, %v1864_v31  ;;  %v1916_v13 = vperm.slane %v1912_v56, %v6407_v29 }
 0x484   :  { %v1845_v33 = vrot.slane %v1837_v28, 4  ;;  %v1817_v62 = vrot.slane %v1816_v37, 4  ;;  %v1820_v48 = vsel %vm639_vm1, %v1816_v37, %v1819_v60  ;;  %v1842_v52 = vperm.slane %v1754_v32, %v6397_v0 }
 0x485   :  { %v1828_v40 = vperm.slane %v1820_v48, %v6407_v29  ;;  %v1702_v49 = vpop.f32.mrf.mxu1  ;;  %v1876_v2 = vperm.slane %v1872_v63, %v6407_v29  ;;  %v1917_v22 = vrot.slane %v1916_v13, 4  ;;  %v1954_v35 = vshrl.u32 %v1916_v13, 16 }
 0x486   :  { %v1818_v42 = vsel %vm639_vm1, %v1817_v62, %v1811_v51  ;;  %v1843_v20 = vrot.slane %v1842_v52, 4  ;;  %v1846_v34 = vsel %vm639_vm1, %v1842_v52, %v1845_v33 }
 0x487   :  { %v1824_v16 = vperm.slane %v1818_v42, %v6407_v29  ;;  %v1831_v58 = vrot.slane %v1828_v40, 4  ;;  %v1854_v15 = vperm.slane %v1846_v34, %v6407_v29  ;;  %v1918_v36 = vsel %vm639_vm1, 0, %v1917_v22 }
 0x488   :  { %v1844_v55 = vsel %vm639_vm1, %v1843_v20, %v1837_v28  ;;  %v1877_v28 = vrot.slane %v1876_v2, 4  ;;  %v1942_v48 = vshrl.u32 %v1876_v2, 16  ;;  %v1960_v20 = vshrl.u32 %v1918_v36, 16 }
 0x489   :  { %v1829_v1 = vrot.slane %v1824_v16, 4  ;;  %v1832_v25 = vsel %vm639_vm1, 0, %v1831_v58  ;;  %v1850_v46 = vperm.slane %v1844_v55, %v6407_v29  ;;  %v1857_v54 = vrot.slane %v1854_v15, 4 }
 0x48a   :  { %v1919_v61 = vrot.slane %v1832_v25, 4  ;;  %v1878_v52 = vsel %vm639_vm1, 0, %v1877_v28 }
 0x48b   :  { %v1830_v21 = vsel %vm639_vm1, 0, %v1829_v1  ;;  %v1855_v10 = vrot.slane %v1850_v46, 4  ;;  %v1858_v24 = vsel %vm639_vm1, 0, %v1857_v54  ;;  %v1948_v59 = vshrl.u32 %v1878_v52, 16 }
 0x48c   :  { %v1879_v44 = vrot.slane %v1830_v21, 4  ;;  %v1925_v50 = vrot.slane %v1858_v24, 4  ;;  %v1920_v57 = vsel %vm639_vm1, %v1919_v61, %v1828_v40 }
 0x48d   :  { %v1856_v39 = vsel %vm639_vm1, 0, %v1855_v10  ;;  %v1924_v38 = vperm.slane %v1920_v57, %v6397_v0 }
 0x48e   :  { %v1885_v17 = vrot.slane %v1856_v39, 4  ;;  %v1926_v14 = vsel %vm639_vm1, %v1925_v50, %v1854_v15  ;;  %v1880_v41 = vsel %vm639_vm1, %v1879_v44, %v1824_v16  ;;  %v5364_v39 = vld [vmem:[#allocation11 + $0x8] sm:$0xff] }
 0x48f   :  { %v1930_v53 = vperm.slane %v1926_v14, %v6397_v0  ;;  %v1884_v47 = vperm.slane %v1880_v41, %v6397_v0  ;;  %2018 = vmatpush.bf16.msra.mxu3 %v5364_v39 }
 0x490   :  { %v1886_v18 = vsel %vm639_vm1, %v1885_v17, %v1850_v46 }
 0x491   :  { %v1931_v51 = vrot.slane %v1930_v53, 4  ;;  %v1890_v45 = vperm.slane %v1886_v18, %v6397_v0  ;;  %v5446_v18 = vld [vmem:[%s8045_s29] ss:$0 sm:$0xff] }
 0x493   :  { %v1891_v27 = vrot.slane %v1890_v45, 4  ;;  %v1932_v60 = vsel %vm639_vm1, %v1931_v51, %v1924_v38 }
 0x494   :  { %v1936_v32 = vperm.slane %v1932_v60, %v6407_v29 }
 0x495   :  { %v1892_v37 = vsel %vm639_vm1, %v1891_v27, %v1884_v47 }
 0x496   :  { %v1896_v30 = vperm.slane %v1892_v37, %v6407_v29  ;;  %v1955_v43 = vshrl.u32 %v1936_v32, 16  ;;  %v1937_v33 = vrot.slane %v1936_v32, 4  ;;  %v1953_v62 = vpack.i.b16 %v1936_v32, %v1916_v13  ;;  %v5363_v13 = vld [vmem:[#allocation11] sm:$0xff] }
 0x497   :  { %2019 = vmatpush.bf16.msra.mxu3 %v5363_v13 }
 0x498   :  { %v1943_v23 = vshrl.u32 %v1896_v30, 16  ;;  %v1956_v40 = vpack.i.b16 %v1955_v43, %v1954_v35  ;;  %v1897_v49 = vrot.slane %v1896_v30, 4  ;;  %v1938_v26 = vsel %vm639_vm1, 0, %v1937_v33 }
 0x499   :  { %v1959_v42 = vpack.i.b16 %v1938_v26, %v1918_v36  ;;  %v1961_v34 = vshrl.u32 %v1938_v26, 16  ;;  %v1941_v12 = vpack.i.b16 %v1896_v30, %v1876_v2  ;;  %v1964_v46 = vunpack.c.l.b16 %v1953_v62 }
 0x49a   :  { %v1944_v16 = vpack.i.b16 %v1943_v23, %v1942_v48  ;;  %v1898_v58 = vsel %vm639_vm1, 0, %v1897_v49  ;;  %v1967_v25 = vunpack.c.l.b16 %v1956_v40  ;;  %v6031_v23 = vmov 32.0  }
 0x49b   :  { %v1947_v15 = vpack.i.b16 %v1898_v58, %v1878_v52  ;;  %v1949_v55 = vshrl.u32 %v1898_v58, 16  ;;  %v1962_v19 = vpack.i.b16 %v1961_v34, %v1960_v20  ;;  %v1963_v54 = vunpack.c.l.b16 %v1941_v12 }
 0x49c   :  { %v1966_v1 = vunpack.c.l.b16 %v1944_v16  ;;  %v1972_v61 = vunpack.c.l.b16 %v1959_v42  ;;  %5491 = vrcp.f32 %v6031_v23  ;;  %v6033_v42 = vmov 842150450  }
 0x49d   :  { %v1971_v31 = vunpack.c.l.b16 %v1947_v15  ;;  %v1950_v56 = vpack.i.b16 %v1949_v55, %v1948_v59  ;;  %v1965_v10 = vpack.c.b16 %v1964_v46, %v1963_v54  ;;  %v1977_v50 = vunpack.c.l.b16 %v1962_v19 }
 0x49e   :  { %v1968_v21 = vpack.c.b16 %v1967_v25, %v1966_v1  ;;  %v2097_v20 = vunpack.c.l.s4 %v6033_v42  ;;  %v6034_v34 = vmov 1414812756   ;;  %v6035_v16 = vmov 1987475062  }
 0x49f   :  { %v1973_v24 = vpack.c.b16 %v1972_v61, %v1971_v31  ;;  %v1976_v44 = vunpack.c.l.b16 %v1950_v56  ;;  %v2101_v12 = vunpack.c.l.s4 %v6034_v34  ;;  %v2105_v58 = vunpack.c.l.s4 %v6035_v16 }
 0x4a0   :  { %1969 = vrot.lane.b32.xlu2 %v1968_v21, %s6028_s6  ;;  %v6858_v55 = vunpack.c.0.s8 %v2097_v20 }
 0x4a1   :  { %1974 = vrot.lane.b32.xlu1 %v1973_v24, %s6029_s21  ;;  %v1978_v63 = vpack.c.b16 %v1977_v50, %v1976_v44  ;;  %v6860_v19 = vunpack.c.0.s8 %v2101_v12  ;;  %v6862_v1 = vunpack.c.0.s8 %v2105_v58  ;;  %v5366_v58 = vld [vmem:[#allocation13 + $0x8] sm:$0xff] }
 0x4a2   :  { %2356 = vmatpush.bf16.msrb.mxu0 %v5366_v58 }
 0x4a3   :  { %1979 = vrot.lane.b32.xlu0 %v1978_v63, %s6030_s12 }
 0x4fa   :  { %v1970_v17 = vpop.permute.xlu2 %1969 }
 0x4fb   :  { %v1983_v57 = vsel %vm1321_vm2, %v1965_v10, %v1970_v17 }
 0x513   :  { %v1975_v14 = vpop.permute.xlu1 %1974 }
 0x514   :  { %v1986_v53 = vsel %vm1984_vm4, %v1983_v57, %v1975_v14 }
 0x515   :  { %v1980_v2 = vpop.permute.xlu0 %1979 }
 0x516   :  { %v1989_v41 = vsel %vm1987_vm5, %v1986_v53, %v1980_v2 }
 0x517   :  { %5276 = vmatmul.msk.bf16.vlgmr.msra.gmra.mxu3 %vm471_vm0, %v1989_v41 }
 0x59a   :  { %v2021_v38 = vpop.f32.mrf.mxu3 }
 0x59b   :  { %v2022_v51 = vadd.f32 %v5446_v18, %v2021_v38 }
 0x59d   :  { %v2028_v45 = vrot.slane %v2022_v51, 2  ;;  %v2029_v22 = vrot.slane %v2022_v51, 4  ;;  %v2030_v47 = vrot.slane %v2022_v51, 6  ;;  %v2040_v27 = vadd.f32 %v2022_v51, %v6315_v3 }
 0x59f   :  { %v2041_v60 = vadd.f32 %v2028_v45, %v6318_v4  ;;  %v2042_v28 = vadd.f32 %v2029_v22, %v6321_v5  ;;  %v2043_v32 = vadd.f32 %v2030_v47, %v6324_v6  ;;  %2056 = vst [vmem:[#allocation1] ss:$4 sm:$0xff] %v2040_v27 }
 0x5a1   :  { %2058 = vst [vmem:[#allocation1 + $0x1] ss:$4 sm:$0xff] %v2041_v60 }
 0x5a2   :  { %2060 = vst [vmem:[#allocation1 + $0x2] ss:$4 sm:$0xff] %v2042_v28  ;;  %v2023_v37 = vpop.f32.mrf.mxu3 }
 0x5a3   :  { %2062 = vst [vmem:[#allocation1 + $0x3] ss:$4 sm:$0xff] %v2043_v32  ;;  %v2024_v35 = vadd.f32 %v5446_v18, %v2023_v37 }
 0x5a5   :  { %v2031_v36 = vrot.slane %v2024_v35, 2  ;;  %v2032_v30 = vrot.slane %v2024_v35, 4  ;;  %v2033_v43 = vrot.slane %v2024_v35, 6  ;;  %v2044_v33 = vadd.f32 %v2024_v35, %v6327_v7  ;;  %v5492_v7 = vpop.eup %5491 }
 0x5a6   :  { %vm2086_vm6 = vweird.f32 %v5492_v7 }
 0x5a7   :  { %v2045_v62 = vadd.f32 %v2031_v36, %v6330_v8  ;;  %v2046_v3 = vadd.f32 %v2032_v30, %v6333_v9  ;;  %v2047_v4 = vadd.f32 %v2033_v43, %v6336_v11  ;;  %2064 = vst [vmem:[#allocation1 + $0x20] ss:$4 sm:$0xff] %v2044_v33  ;;  %v2082_v8 = vmul.f32 32.0, %v5492_v7 }
 0x5a8   :  { %v6032_v11 = vmov 269488144  }
 0x5a9   :  { %2066 = vst [vmem:[#allocation1 + $0x21] ss:$4 sm:$0xff] %v2045_v62  ;;  %v2083_v40 = vsub.f32 1.0, %v2082_v8  ;;  %v2093_v26 = vunpack.c.l.s4 %v6032_v11  ;;  %v6914_v8 = vld [vmem:[%s8047_s2] ss:$0 sm:$0xff] }
 0x5aa   :  { %v2071_v5 = vld.sshfl [vmem:[#allocation1] sm:$0xff pattern:$0x73625140]  ;;  %2068 = vst [vmem:[#allocation1 + $0x22] ss:$4 sm:$0xff] %v2046_v3 }
 0x5ab   :  { %2070 = vst [vmem:[#allocation1 + $0x23] ss:$4 sm:$0xff] %v2047_v4  ;;  %v2075_v6 = vsel %vm471_vm0, %v2071_v5, 0.0  ;;  %v2084_v9 = vmul.f32 %v5492_v7, %v2083_v40  ;;  %v6856_v59 = vunpack.c.0.s8 %v2093_v26 }
 0x5ac   :  { %2076 = vadd.xlane.f32.xlu2 %v2075_v6 }
 0x5ad   :  { %v2085_v49 = vadd.f32 %v5492_v7, %v2084_v9 }
 0x5af   :  { %v6854_v15 = vsel %vm2086_vm6, %v5492_v7, %v2085_v49 }
 0x5b2   :  { %v2072_v48 = vld.sshfl [vmem:[#allocation1 + $0x20] sm:$0xff pattern:$0x73625140] }
 0x5b3   :  { %v2078_v52 = vsel %vm471_vm0, %v2072_v48, 0.0 }
 0x5b4   :  { %2079 = vadd.xlane.f32.xlu0 %v2078_v52  ;;  %v6911_v52 = vld [vmem:[%s8046_s10] ss:$0 sm:$0xff] }
 0x5b5   :  { %v2259_v49 = vrot.slane %v6911_v52, 2  ;;  %v2260_v11 = vrot.slane %v6911_v52, 4  ;;  %v2261_v26 = vrot.slane %v6911_v52, 6 }
 0x61f   :  { %v2077_v25 = vpop.xlane.xlu2 %2076 }
 0x620   :  { %v2088_v46 = vmul.f32 %v6854_v15, %v2077_v25  ;;  %v2277_v25 = vrot.slane %v6914_v8, 2 }
 0x622   :  { %v2095_v54 = vperm.slane %v2088_v46, %v6856_v59  ;;  %v2099_v31 = vperm.slane %v2088_v46, %v6858_v55  ;;  %v2103_v61 = vperm.slane %v2088_v46, %v6860_v19  ;;  %v2107_v56 = vperm.slane %v2088_v46, %v6862_v1 }
 0x623   :  { %v2278_v46 = vrot.slane %v6914_v8, 4 }
 0x624   :  { %v6869_v21 = vsub.f32 %v2040_v27, %v2095_v54  ;;  %v6871_v10 = vsub.f32 %v2041_v60, %v2099_v31  ;;  %v6873_v24 = vsub.f32 %v2042_v28, %v2103_v61  ;;  %v6875_v44 = vsub.f32 %v2043_v32, %v2107_v56 }
 0x625   :  { %v2279_v54 = vrot.slane %v6914_v8, 6 }
 0x626   :  { %v2140_v50 = vmul.f32 %v6869_v21, %v6869_v21  ;;  %v2141_v63 = vmul.f32 %v6871_v10, %v6871_v10  ;;  %v2142_v39 = vmul.f32 %v6873_v24, %v6873_v24  ;;  %v2143_v13 = vmul.f32 %v6875_v44, %v6875_v44 }
 0x627   :  { %v2080_v17 = vpop.xlane.xlu0 %2079 }
 0x628   :  { %2156 = vst [vmem:[#allocation1] ss:$4 sm:$0xff] %v2140_v50  ;;  %v2089_v57 = vmul.f32 %v6854_v15, %v2080_v17 }
 0x629   :  { %2158 = vst [vmem:[#allocation1 + $0x1] ss:$4 sm:$0xff] %v2141_v63 }
 0x62a   :  { %2160 = vst [vmem:[#allocation1 + $0x2] ss:$4 sm:$0xff] %v2142_v39  ;;  %v2111_v14 = vperm.slane %v2089_v57, %v6856_v59  ;;  %v2115_v53 = vperm.slane %v2089_v57, %v6858_v55  ;;  %v2119_v2 = vperm.slane %v2089_v57, %v6860_v19  ;;  %v2123_v41 = vperm.slane %v2089_v57, %v6862_v1 }
 0x62b   :  { %2162 = vst [vmem:[#allocation1 + $0x3] ss:$4 sm:$0xff] %v2143_v13 }
 0x62c   :  { %v6890_v18 = vsub.f32 %v2044_v33, %v2111_v14  ;;  %v6892_v38 = vsub.f32 %v2045_v62, %v2115_v53  ;;  %v6894_v51 = vsub.f32 %v2046_v3, %v2119_v2  ;;  %v6896_v45 = vsub.f32 %v2047_v4, %v2123_v41  ;;  %v5365_v53 = vld [vmem:[#allocation13] sm:$0xff] }
 0x62d   :  { %2357 = vmatpush.bf16.msrb.mxu0 %v5365_v53  ;;  %v384_v53 = vld [vmem:[%s8048_s4 + $0x12] sm:$0x3] }
 0x62e   :  { %v2144_v22 = vmul.f32 %v6890_v18, %v6890_v18  ;;  %v2145_v47 = vmul.f32 %v6892_v38, %v6892_v38  ;;  %v2146_v27 = vmul.f32 %v6894_v51, %v6894_v51  ;;  %v2147_v60 = vmul.f32 %v6896_v45, %v6896_v45 }
 0x630   :  { %2164 = vst [vmem:[#allocation1 + $0x20] ss:$4 sm:$0xff] %v2144_v22  ;;  %v5537_v22 = vld [vmem:[#allocation2] sm:$0x3] }
 0x631   :  { %2166 = vst [vmem:[#allocation1 + $0x21] ss:$4 sm:$0xff] %v2145_v47 }
 0x632   :  { %v2171_v28 = vld.sshfl [vmem:[#allocation1] sm:$0xff pattern:$0x73625140]  ;;  %2168 = vst [vmem:[#allocation1 + $0x22] ss:$4 sm:$0xff] %v2146_v27 }
 0x633   :  { %2170 = vst [vmem:[#allocation1 + $0x23] ss:$4 sm:$0xff] %v2147_v60  ;;  %v2175_v32 = vsel %vm471_vm0, %v2171_v28, 0.0  ;;  %v5538_v27 = vld [vmem:[#allocation2 + $0x2] sm:$0x3] }
 0x634   :  { %2176 = vadd.xlane.f32.xlu1 %v2175_v32  ;;  %v5539_v28 = vld [vmem:[#allocation2 + $0x4] sm:$0x3] }
 0x63a   :  { %v2172_v37 = vld.sshfl [vmem:[#allocation1 + $0x20] sm:$0xff pattern:$0x73625140] }
 0x63b   :  { %v2178_v35 = vsel %vm471_vm0, %v2172_v37, 0.0  ;;  %v5368_v37 = vld [vmem:[#allocation14 + $0x8] sm:$0xff] }
 0x63c   :  { %2179 = vadd.xlane.f32.xlu2 %v2178_v35  ;;  %v5540_v35 = vld [vmem:[#allocation2 + $0x6] sm:$0x3]  ;;  %2461 = vmatpush.bf16.msrb.mxu1 %v5368_v37  ;;  %v403_v37 = vld [vmem:[#allocation5 + $0x8] sm:$0x3] }
 0x6a7   :  { %v2177_v36 = vpop.xlane.xlu1 %2176 }
 0x6a8   :  { %v2181_v30 = vmul.f32 %v2177_v36, %v6854_v15 }
 0x6aa   :  { %v2183_v43 = vadd.f32 1e-05, %v2181_v30 }
 0x6ac   :  { %5493 = vrsqrt.f32 %v2183_v43  ;;  %vm2191_vm8 = vweird.f32 %v2183_v43 }
 0x6af   :  { %v2180_v33 = vpop.xlane.xlu2 %2179 }
 0x6b0   :  { %v2182_v62 = vmul.f32 %v2180_v33, %v6854_v15 }
 0x6b2   :  { %v5494_v3 = vpop.eup %5493  ;;  %v2184_v4 = vadd.f32 1e-05, %v2182_v62 }
 0x6b3   :  { %v2186_v5 = vmul.f32 %v5494_v3, %v2183_v43  ;;  %vm2192_vm7 = vweird.f32 %v5494_v3 }
 0x6b4   :  { %5495 = vrsqrt.f32 %v2184_v4  ;;  %vm2193_vm9 = vmor %vm2191_vm8, %vm2192_vm7  ;;  %vm2201_vm11 = vweird.f32 %v2184_v4  ;;  %vm5159_vm8 = vcmask 254976  }
 0x6b5   :  { %v2187_v6 = vmul.f32 %v5494_v3, %v2186_v5 }
 0x6b7   :  { %v2188_v48 = vmul.f32 0.5, %v2187_v6 }
 0x6b9   :  { %v2189_v23 = vsub.f32 1.5, %v2188_v48 }
 0x6ba   :  { %v5496_v7 = vpop.eup %5495 }
 0x6bb   :  { %v2190_v40 = vmul.f32 %v5494_v3, %v2189_v23  ;;  %v2196_v9 = vmul.f32 %v5496_v7, %v2184_v4  ;;  %vm2202_vm10 = vweird.f32 %v5496_v7  ;;  %v6963_v23 = vld [vmem:[%s8048_s4] sm:$0x3] }
 0x6bc   :  { %vm2203_vm12 = vmor %vm2201_vm11, %vm2202_vm10 }
 0x6bd   :  { %v2194_v42 = vsel %vm2193_vm9, %v5494_v3, %v2190_v40  ;;  %v2197_v31 = vmul.f32 %v5496_v7, %v2196_v9 }
 0x6be   :  { %v2210_v20 = vperm.slane %v2194_v42, %v6856_v59  ;;  %v2214_v34 = vperm.slane %v2194_v42, %v6858_v55  ;;  %v2218_v12 = vperm.slane %v2194_v42, %v6860_v19  ;;  %v2222_v16 = vperm.slane %v2194_v42, %v6862_v1  ;;  %v5367_v42 = vld [vmem:[#allocation14] sm:$0xff] }
 0x6bf   :  { %v2198_v39 = vmul.f32 0.5, %v2197_v31  ;;  %2462 = vmatpush.bf16.msrb.mxu1 %v5367_v42 }
 0x6c0   :  { %v2247_v61 = vmul.f32 %v2210_v20, %v6869_v21  ;;  %v2248_v56 = vmul.f32 %v2214_v34, %v6871_v10  ;;  %v2249_v50 = vmul.f32 %v2218_v12, %v6873_v24  ;;  %v2250_v63 = vmul.f32 %v2222_v16, %v6875_v44  ;;  %v6967_v20 = vld [vmem:[%s8048_s4 + $0x2] sm:$0x3]  ;;  %v400_v34 = vld [vmem:[#allocation5 + $0x2] sm:$0x3]  ;;  %v6980_v16 = vld [vmem:[%s8048_s4 + $0x6] sm:$0x3] }
 0x6c1   :  { %v2199_v2 = vsub.f32 1.5, %v2198_v39  ;;  %v5542_v39 = vld [vmem:[#allocation2 + $0xa] sm:$0x3] }
 0x6c2   :  { %v2265_v13 = vmul.f32 %v6911_v52, %v2247_v61  ;;  %v2266_v17 = vmul.f32 %v2259_v49, %v2248_v56  ;;  %v2267_v57 = vmul.f32 %v2260_v11, %v2249_v50  ;;  %v2268_v14 = vmul.f32 %v2261_v26, %v2250_v63 }
 0x6c3   :  { %v2200_v41 = vmul.f32 %v5496_v7, %v2199_v2  ;;  %v408_v2 = vld [vmem:[#allocation5 + $0x12] sm:$0x3] }
 0x6c4   :  { %v6936_v21 = vadd.f32 %v6914_v8, %v2265_v13  ;;  %v6940_v10 = vadd.f32 %v2277_v25, %v2266_v17  ;;  %v6944_v24 = vadd.f32 %v2278_v46, %v2267_v57  ;;  %v6948_v44 = vadd.f32 %v2279_v54, %v2268_v14  ;;  %v5543_v13 = vld [vmem:[#allocation2 + $0xc] sm:$0x3]  ;;  %v5544_v57 = vld [vmem:[#allocation2 + $0xe] sm:$0x3]  ;;  %v407_v14 = vld [vmem:[#allocation5 + $0x10] sm:$0x3] }
 0x6c5   :  { %v2204_v30 = vsel %vm2203_vm12, %v5496_v7, %v2200_v41  ;;  %v399_v7 = vld [vmem:[#allocation5] sm:$0x3]  ;;  %v385_v41 = vld [vmem:[%s8048_s4 + $0x14] sm:$0x3] }
 0x6c6   :  { %v2291_v47 = vadd.f32 %v5537_v22, %v6936_v21  ;;  %v2292_v60 = vadd.f32 %v5538_v27, %v6940_v10  ;;  %v2293_v32 = vadd.f32 %v5539_v28, %v6944_v24  ;;  %v2294_v36 = vadd.f32 %v5540_v35, %v6948_v44  ;;  %v409_v22 = vld [vmem:[#allocation5 + $0x14] sm:$0x3]  ;;  %v410_v27 = vld [vmem:[#allocation5 + $0x16] sm:$0x3] }
 0x6c7   :  { %v2226_v43 = vperm.slane %v2204_v30, %v6856_v59  ;;  %v2230_v33 = vperm.slane %v2204_v30, %v6858_v55  ;;  %v2234_v62 = vperm.slane %v2204_v30, %v6860_v19  ;;  %v2238_v3 = vperm.slane %v2204_v30, %v6862_v1  ;;  %v381_v30 = vld [vmem:[%s8048_s4 + $0xc] sm:$0x3] }
 0x6c8   :  { %2307 = vst [vmem:[#allocation1] ss:$4 sm:$0xff] %v2291_v47  ;;  %v2364_v58 = vadd.f32 %v399_v7, %v6963_v23  ;;  %v386_v47 = vld [vmem:[%s8048_s4 + $0x16] sm:$0x3]  ;;  %v2373_v28 = vadd.f32 %v408_v2, %v384_v53  ;;  %v2374_v35 = vadd.f32 %v409_v22, %v385_v41  ;;  %v5450_v2 = vld [vmem:[#allocation16] ss:$0 sm:$0xff] }
 0x6c9   :  { %2309 = vst [vmem:[#allocation1 + $0x1] ss:$4 sm:$0xff] %v2292_v60  ;;  %v2251_v4 = vmul.f32 %v2226_v43, %v6890_v18  ;;  %v2252_v5 = vmul.f32 %v2230_v33, %v6892_v38  ;;  %v2253_v6 = vmul.f32 %v2234_v62, %v6894_v51  ;;  %v2254_v48 = vmul.f32 %v2238_v3, %v6896_v45  ;;  %v6974_v51 = vld [vmem:[%s8048_s4 + $0x4] sm:$0x3]  ;;  %v401_v45 = vld [vmem:[#allocation5 + $0x4] sm:$0x3] }
 0x6ca   :  { %2311 = vst [vmem:[#allocation1 + $0x2] ss:$4 sm:$0xff] %v2293_v32  ;;  %v2366_v56 = vadd.f32 %v401_v45, %v6974_v51  ;;  %v379_v32 = vld [vmem:[%s8048_s4 + $0x8] sm:$0x3]  ;;  %v404_v43 = vld [vmem:[#allocation5 + $0xa] sm:$0x3]  ;;  %v2375_v33 = vadd.f32 %v410_v27, %v386_v47 }
 0x6cb   :  { %2313 = vst [vmem:[#allocation1 + $0x3] ss:$4 sm:$0xff] %v2294_v36  ;;  %v2269_v40 = vmul.f32 %v6911_v52, %v2251_v4  ;;  %v2270_v9 = vmul.f32 %v2259_v49, %v2252_v5  ;;  %v2271_v18 = vmul.f32 %v2260_v11, %v2253_v6  ;;  %v2272_v38 = vmul.f32 %v2261_v26, %v2254_v48  ;;  %v402_v49 = vld [vmem:[#allocation5 + $0x6] sm:$0x3]  ;;  %v5541_v26 = vld [vmem:[#allocation2 + $0x8] sm:$0x3] }
 0x6cc   :  { %v2365_v11 = vadd.f32 %v400_v34, %v6967_v20  ;;  %v2367_v63 = vadd.f32 %v402_v49, %v6980_v16  ;;  %v380_v36 = vld [vmem:[%s8048_s4 + $0xa] sm:$0x3]  ;;  %v405_v3 = vld [vmem:[#allocation5 + $0xc] sm:$0x3]  ;;  %v382_v4 = vld [vmem:[%s8048_s4 + $0xe] sm:$0x3]  ;;  %v2368_v6 = vadd.f32 %v403_v37, %v379_v32 }
 0x6cd   :  { %v6977_v12 = vadd.f32 %v6914_v8, %v2269_v40  ;;  %v6985_v31 = vadd.f32 %v2277_v25, %v2270_v9  ;;  %v6990_v52 = vadd.f32 %v2278_v46, %v2271_v18  ;;  %v6996_v50 = vadd.f32 %v2279_v54, %v2272_v38  ;;  %v7003_v54 = vld [vmem:[%s8048_s4 + $0x10] sm:$0x3]  ;;  %v406_v5 = vld [vmem:[#allocation5 + $0xe] sm:$0x3]  ;;  %v387_v34 = vld [vmem:[%s8048_s4 + $0x18] sm:$0x3] }
 0x6ce   :  { %v2372_v60 = vadd.f32 %v407_v14, %v7003_v54  ;;  %v2369_v48 = vadd.f32 %v404_v43, %v380_v36  ;;  %v2370_v7 = vadd.f32 %v405_v3, %v381_v30  ;;  %v2371_v9 = vadd.f32 %v406_v5, %v382_v4  ;;  %v411_v18 = vld [vmem:[#allocation5 + $0x18] sm:$0x3]  ;;  %v388_v38 = vld [vmem:[%s8048_s4 + $0x1a] sm:$0x3]  ;;  %v389_v45 = vld [vmem:[%s8048_s4 + $0x1c] sm:$0x3] }
 0x6cf   :  { %v2295_v61 = vadd.f32 %v5541_v26, %v6977_v12  ;;  %v2296_v46 = vadd.f32 %v5542_v39, %v6985_v31  ;;  %v2297_v17 = vadd.f32 %v5543_v13, %v6990_v52  ;;  %v2298_v8 = vadd.f32 %v5544_v57, %v6996_v50  ;;  %v412_v49 = vld [vmem:[#allocation5 + $0x1a] sm:$0x3]  ;;  %v390_v26 = vld [vmem:[%s8048_s4 + $0x1e] sm:$0x3]  ;;  %v5449_v43 = vld [vmem:[%s8049_s17] ss:$0 sm:$0xff] }
 0x6d0   :  { %v5369_v57 = vld [vmem:[#allocation17] sm:$0xff] }
 0x6d1   :  { %2315 = vst [vmem:[#allocation1 + $0x20] ss:$4 sm:$0xff] %v2295_v61  ;;  %v414_v61 = vld [vmem:[#allocation5 + $0x1e] sm:$0x3] }
 0x6d2   :  { %v2322_v25 = vld.sshfl [vmem:[#allocation1] sm:$0xff pattern:$0x73625140]  ;;  %2317 = vst [vmem:[#allocation1 + $0x21] ss:$4 sm:$0xff] %v2296_v46  ;;  %v2379_v39 = vadd.f32 %v414_v61, %v390_v26 }
 0x6d3   :  { %2396 = vst [vmem:[#allocation1] ss:$4 sm:$0xff] %v2364_v58 }
 0x6d4   :  { %2398 = vst [vmem:[#allocation1 + $0x1] ss:$4 sm:$0xff] %v2365_v11  ;;  %v413_v11 = vld [vmem:[#allocation5 + $0x1c] sm:$0x3] }
 0x6d5   :  { %2400 = vst [vmem:[#allocation1 + $0x2] ss:$4 sm:$0xff] %v2366_v56  ;;  %v2376_v56 = vadd.f32 %v411_v18, %v387_v34 }
 0x6d6   :  { %2402 = vst [vmem:[#allocation1 + $0x3] ss:$4 sm:$0xff] %v2367_v63  ;;  %v2377_v63 = vadd.f32 %v412_v49, %v388_v38 }
 0x6d7   :  { %2319 = vst [vmem:[#allocation1 + $0x22] ss:$4 sm:$0xff] %v2297_v17  ;;  %v5370_v17 = vld [vmem:[#allocation17 + $0x8] sm:$0xff] }
 0x6d8   :  { %2321 = vst [vmem:[#allocation1 + $0x23] ss:$4 sm:$0xff] %v2298_v8  ;;  %2555 = vmatpush.bf16.msrb.mxu2 %v5370_v17 }
 0x6dc   :  { %2556 = vmatpush.bf16.msrb.mxu2 %v5369_v57 }
 0x6dd   :  { %v2411_v62 = vld.sshfl [vmem:[#allocation1] sm:$0xff pattern:$0x73625140] }
 0x6de   :  { %2413 = vst [vmem:[#allocation1] ss:$4 sm:$0xff] %v2372_v60 }
 0x6df   :  { %2414 = vst [vmem:[#allocation1 + $0x1] ss:$4 sm:$0xff] %v2373_v28  ;;  %v2323_v40 = vld.sshfl [vmem:[#allocation1 + $0x20] sm:$0xff pattern:$0x73625140] }
 0x6e0   :  { %2415 = vst [vmem:[#allocation1 + $0x2] ss:$4 sm:$0xff] %v2374_v35  ;;  %v2326_v42 = vpack.c.bf16 %v2323_v40, %v2322_v25  ;;  %v2378_v25 = vadd.f32 %v413_v11, %v389_v45  ;;  %v7071_v40 = vld [vmem:[#allocation19] ss:$0 sm:$0xff] }
 0x6e1   :  { %2416 = vst [vmem:[#allocation1 + $0x3] ss:$4 sm:$0xff] %v2375_v33 }
 0x6e2   :  { %2404 = vst [vmem:[#allocation1 + $0x20] ss:$4 sm:$0xff] %v2368_v6  ;;  %5285 = vmatmul.msk.bf16.vlgmr.msrb.gmra.mxu0 %vm471_vm0, %v2326_v42 }
 0x6e3   :  { %2406 = vst [vmem:[#allocation1 + $0x21] ss:$4 sm:$0xff] %v2369_v48 }
 0x6e4   :  { %2408 = vst [vmem:[#allocation1 + $0x22] ss:$4 sm:$0xff] %v2370_v7 }
 0x6e5   :  { %2410 = vst [vmem:[#allocation1 + $0x23] ss:$4 sm:$0xff] %v2371_v9 }
 0x6e8   :  { %v2421_v58 = vld.sshfl [vmem:[#allocation1] sm:$0xff pattern:$0x73625140] }
 0x6e9   :  { %2490 = vst [vmem:[#allocation1] ss:$4 sm:$0xff] %v6963_v23 }
 0x6ea   :  { %2492 = vst [vmem:[#allocation1 + $0x1] ss:$4 sm:$0xff] %v6967_v20 }
 0x6eb   :  { %2494 = vst [vmem:[#allocation1 + $0x2] ss:$4 sm:$0xff] %v6974_v51 }
 0x6ec   :  { %2496 = vst [vmem:[#allocation1 + $0x3] ss:$4 sm:$0xff] %v6980_v16  ;;  %v2412_v46 = vld.sshfl [vmem:[#allocation1 + $0x20] sm:$0xff pattern:$0x73625140] }
 0x6ed   :  { %2417 = vst [vmem:[#allocation1 + $0x20] ss:$4 sm:$0xff] %v2376_v56  ;;  %v2427_v13 = vpack.c.bf16 %v2412_v46, %v2411_v62 }
 0x6ee   :  { %2418 = vst [vmem:[#allocation1 + $0x21] ss:$4 sm:$0xff] %v2377_v63 }
 0x6ef   :  { %2419 = vst [vmem:[#allocation1 + $0x22] ss:$4 sm:$0xff] %v2378_v25  ;;  %5294 = vmatmul.msk.bf16.vlgmr.msrb.gmra.mxu1 %vm471_vm0, %v2427_v13 }
 0x6f0   :  { %2420 = vst [vmem:[#allocation1 + $0x23] ss:$4 sm:$0xff] %v2379_v39 }
 0x6f3   :  { %v2505_v23 = vld.sshfl [vmem:[#allocation1] sm:$0xff pattern:$0x73625140] }
 0x6f4   :  { %2507 = vst [vmem:[#allocation1] ss:$4 sm:$0xff] %v7003_v54 }
 0x6f5   :  { %2508 = vst [vmem:[#allocation1 + $0x1] ss:$4 sm:$0xff] %v384_v53 }
 0x6f6   :  { %2509 = vst [vmem:[#allocation1 + $0x2] ss:$4 sm:$0xff] %v385_v41 }
 0x6f7   :  { %2510 = vst [vmem:[#allocation1 + $0x3] ss:$4 sm:$0xff] %v386_v47  ;;  %v2422_v20 = vld.sshfl [vmem:[#allocation1 + $0x20] sm:$0xff pattern:$0x73625140] }
 0x6f8   :  { %2498 = vst [vmem:[#allocation1 + $0x20] ss:$4 sm:$0xff] %v379_v32  ;;  %v2428_v51 = vpack.c.bf16 %v2422_v20, %v2421_v58 }
 0x6f9   :  { %2500 = vst [vmem:[#allocation1 + $0x21] ss:$4 sm:$0xff] %v380_v36 }
 0x6fa   :  { %2502 = vst [vmem:[#allocation1 + $0x22] ss:$4 sm:$0xff] %v381_v30 }
 0x6fb   :  { %2504 = vst [vmem:[#allocation1 + $0x23] ss:$4 sm:$0xff] %v382_v4 }
 0x6fe   :  { %v2515_v54 = vld.sshfl [vmem:[#allocation1] sm:$0xff pattern:$0x73625140] }
 0x6ff   :  { %5295 = vmatmul.msk.bf16.gmra.mxu1 %vm471_vm0, %v2428_v51 }
 0x702   :  { %v2506_v16 = vld.sshfl [vmem:[#allocation1 + $0x20] sm:$0xff pattern:$0x73625140] }
 0x703   :  { %2511 = vst [vmem:[#allocation1 + $0x20] ss:$4 sm:$0xff] %v387_v34  ;;  %v2521_v8 = vpack.c.bf16 %v2506_v16, %v2505_v23 }
 0x704   :  { %2512 = vst [vmem:[#allocation1 + $0x21] ss:$4 sm:$0xff] %v388_v38 }
 0x705   :  { %2513 = vst [vmem:[#allocation1 + $0x22] ss:$4 sm:$0xff] %v389_v45  ;;  %5304 = vmatmul.msk.bf16.vlgmr.msrb.gmra.mxu2 %vm471_vm0, %v2521_v8 }
 0x706   :  { %2514 = vst [vmem:[#allocation1 + $0x23] ss:$4 sm:$0xff] %v390_v26 }
 0x70d   :  { %v2516_v14 = vld.sshfl [vmem:[#allocation1 + $0x20] sm:$0xff pattern:$0x73625140] }
 0x70e   :  { %v2522_v53 = vpack.c.bf16 %v2516_v14, %v2515_v54 }
 0x715   :  { %5305 = vmatmul.msk.bf16.gmra.mxu2 %vm471_vm0, %v2522_v53 }
 0x75f   :  { %v2359_v28 = vpop.f32.mrf.mxu0 }
 0x760   :  { %v2360_v6 = vadd.f32 %v5449_v43, %v2359_v28 }
 0x762   :  { %v7061_v48 = vpack.c.bf16 %v2360_v6, %v2360_v6 }
 0x767   :  { %v2361_v30 = vpop.f32.mrf.mxu0 }
 0x768   :  { %v2362_v33 = vadd.f32 %v5449_v43, %v2361_v30  ;;  %v2587_v43 = vshrl.u32 %v7061_v48, 16 }
 0x76a   :  { %v7047_v5 = vpack.c.bf16 %v2362_v33, %v2362_v33 }
 0x76c   :  { %v2464_v41 = vpop.f32.mrf.mxu1  ;;  %v2599_v17 = vshrl.u32 %v7047_v5, 16 }
 0x76d   :  { %v2465_v22 = vadd.f32 %v5450_v2, %v2464_v41 }
 0x76f   :  { %v2812_v47 = vpack.c.bf16 %v2465_v22, %v2465_v22 }
 0x771   :  { %2836 = vrot.lane.b32.xlu1 %v2812_v47, %s6025_s20  ;;  %2828 = vrot.lane.b32.xlu0 %v2812_v47, %s6023_s22  ;;  %v2847_v61 = vshrl.u32 %v2812_v47, 16 }
 0x772   :  { %2820 = vrot.lane.b32.xlu2 %v2812_v47, %s6024_s11 }
 0x774   :  { %v2466_v27 = vpop.f32.mrf.mxu1 }
 0x775   :  { %v2467_v60 = vadd.f32 %v5450_v2, %v2466_v27 }
 0x777   :  { %v7030_v32 = vpack.c.bf16 %v2467_v60, %v2467_v60 }
 0x779   :  { %2830 = vrot.lane.b32.xlu1 %v7030_v32, %s6023_s22  ;;  %2822 = vrot.lane.b32.xlu0 %v7030_v32, %s6024_s11 }
 0x77a   :  { %2838 = vrot.lane.b32.xlu2 %v7030_v32, %s6025_s20 }
 0x77c   :  { %v2469_v37 = vpop.f32.mrf.mxu1 }
 0x77d   :  { %v2470_v35 = vadd.f32 %v5450_v2, %v2469_v37 }
 0x77f   :  { %v7038_v36 = vpack.c.bf16 %v2470_v35, %v2470_v35  ;;  %v2859_v35 = vshrl.u32 %v7030_v32, 16 }
 0x781   :  { %2824 = vrot.lane.b32.xlu0 %v7038_v36, %s6024_s11  ;;  %v2871_v30 = vshrl.u32 %v7038_v36, 16 }
 0x782   :  { %2832 = vrot.lane.b32.xlu2 %v7038_v36, %s6023_s22 }
 0x784   :  { %v2471_v62 = vpop.f32.mrf.mxu1 }
 0x785   :  { %v2472_v3 = vadd.f32 %v5450_v2, %v2471_v62 }
 0x787   :  { %v7045_v4 = vpack.c.bf16 %v2472_v3, %v2472_v3 }
 0x788   :  { %v2558_v9 = vpop.f32.mrf.mxu2 }
 0x789   :  { %2826 = vrot.lane.b32.xlu1 %v7045_v4, %s6024_s11  ;;  %2840 = vrot.lane.b32.xlu0 %v7038_v36, %s6025_s20  ;;  %v2559_v42 = vadd.f32 %v7071_v40, %v2558_v9 }
 0x78a   :  { %2574 = vrot.lane.b32.xlu2 %v7047_v5, %s6024_s11 }
 0x78b   :  { %v7074_v34 = vpack.c.bf16 %v2559_v42, %v2559_v42 }
 0x790   :  { %v2560_v38 = vpop.f32.mrf.mxu2 }
 0x791   :  { %2842 = vrot.lane.b32.xlu1 %v7045_v4, %s6025_s20  ;;  %2834 = vrot.lane.b32.xlu0 %v7045_v4, %s6023_s22  ;;  %v2561_v45 = vadd.f32 %v7071_v40, %v2560_v38 }
 0x792   :  { %2582 = vrot.lane.b32.xlu2 %v7047_v5, %s6025_s20 }
 0x793   :  { %v7081_v49 = vpack.c.bf16 %v2561_v45, %v2561_v45 }
 0x798   :  { %v2563_v16 = vpop.f32.mrf.mxu2 }
 0x799   :  { %2572 = vrot.lane.b32.xlu1 %v7061_v48, %s6024_s11  ;;  %2578 = vrot.lane.b32.xlu0 %v7047_v5, %s6023_s22  ;;  %v2564_v8 = vadd.f32 %v7071_v40, %v2563_v16 }
 0x79a   :  { %3318 = vrot.lane.b32.xlu2 %v7081_v49, %s6023_s22 }
 0x79b   :  { %v7097_v22 = vpack.c.bf16 %v2564_v8, %v2564_v8 }
 0x7a1   :  { %2576 = vrot.lane.b32.xlu1 %v7061_v48, %s6023_s22  ;;  %2580 = vrot.lane.b32.xlu0 %v7061_v48, %s6025_s20 }
 0x7a9   :  { %3308 = vrot.lane.b32.xlu1 %v7074_v34, %s6024_s11  ;;  %3316 = vrot.lane.b32.xlu0 %v7074_v34, %s6023_s22 }
 0x7b1   :  { %3326 = vrot.lane.b32.xlu1 %v7081_v49, %s6025_s20  ;;  %3310 = vrot.lane.b32.xlu0 %v7081_v49, %s6024_s11 }
 0x7b9   :  { %3312 = vrot.lane.b32.xlu0 %v7097_v22, %s6024_s11 }
 0x7cc   :  { %v2821_v7 = vpop.permute.xlu2 %2820 }
 0x7cd   :  { %v2848_v58 = vshrl.u32 %v2821_v7, 16  ;;  %v2846_v26 = vpack.i.b16 %v2821_v7, %v2812_v47 }
 0x7cf   :  { %v2849_v56 = vpack.i.b16 %v2848_v58, %v2847_v61  ;;  %v2896_v63 = vperm.slane %v2846_v26, %v6397_v0 }
 0x7d1   :  { %v2922_v46 = vperm.slane %v2849_v56, %v6397_v0  ;;  %v2904_v54 = vrot.slane %v2896_v63, 4 }
 0x7d3   :  { %v2930_v47 = vrot.slane %v2922_v46, 4 }
 0x7d4   :  { %v2839_v18 = vpop.permute.xlu2 %2838 }
 0x7d5   :  { %v2866_v33 = vshrl.u32 %v2839_v18, 16 }
 0x7dc   :  { %v7083_v11 = vpop.permute.xlu2 %2832 }
 0x7e3   :  { %v2837_v25 = vpop.permute.xlu1 %2836  ;;  %v2829_v39 = vpop.permute.xlu0 %2828 }
 0x7e4   :  { %v2854_v13 = vshrl.u32 %v2837_v25, 16  ;;  %v2852_v23 = vpack.i.b16 %v2837_v25, %v2829_v39  ;;  %v2853_v20 = vshrl.u32 %v2829_v39, 16  ;;  %v2575_v51 = vpop.permute.xlu2 %2574 }
 0x7e5   :  { %v2600_v57 = vshrl.u32 %v2575_v51, 16  ;;  %v2598_v2 = vpack.i.b16 %v2575_v51, %v7047_v5 }
 0x7e6   :  { %v2855_v14 = vpack.i.b16 %v2854_v13, %v2853_v20  ;;  %v2901_v53 = vperm.slane %v2852_v23, %v6397_v0  ;;  %v2883_v13 = vshrl.u32 %v7045_v4, 16 }
 0x7e7   :  { %v2601_v41 = vpack.i.b16 %v2600_v57, %v2599_v17  ;;  %v7116_v9 = vperm.slane %v2598_v2, %v6397_v0  ;;  %v2565_v17 = vpop.f32.mrf.mxu2 }
 0x7e8   :  { %v2902_v27 = vrot.slane %v2901_v53, 4  ;;  %v2905_v60 = vsel %vm639_vm1, %v2901_v53, %v2904_v54  ;;  %v2927_v28 = vperm.slane %v2855_v14, %v6397_v0 }
 0x7e9   :  { %v7102_v37 = vperm.slane %v2905_v60, %v6407_v29  ;;  %v7119_v42 = vperm.slane %v2601_v41, %v6397_v0 }
 0x7ea   :  { %v2903_v62 = vsel %vm639_vm1, %v2902_v27, %v2896_v63  ;;  %v2928_v3 = vrot.slane %v2927_v28, 4  ;;  %v2931_v5 = vsel %vm639_vm1, %v2927_v28, %v2930_v47  ;;  %v2566_v27 = vadd.f32 %v7071_v40, %v2565_v17 }
 0x7eb   :  { %v2909_v6 = vperm.slane %v2903_v62, %v6407_v29  ;;  %v7113_v7 = vperm.slane %v2931_v5, %v6407_v29  ;;  %v2831_v38 = vpop.permute.xlu1 %2830  ;;  %v2823_v45 = vpop.permute.xlu0 %2822  ;;  %v2916_v25 = vrot.slane %v7102_v37, 4  ;;  %v2698_v57 = vrot.slane %v7119_v42, 4 }
 0x7ec   :  { %v2929_v58 = vsel %vm639_vm1, %v2928_v3, %v2922_v46  ;;  %v2864_v26 = vpack.i.b16 %v2839_v18, %v2831_v38  ;;  %v2865_v61 = vshrl.u32 %v2831_v38, 16  ;;  %v2858_v56 = vpack.i.b16 %v2823_v45, %v7030_v32  ;;  %v7139_v3 = vpop.permute.xlu2 %2582 }
 0x7ed   :  { %v2914_v63 = vrot.slane %v2909_v6, 4  ;;  %v2935_v39 = vperm.slane %v2929_v58, %v6407_v29  ;;  %v2860_v51 = vshrl.u32 %v2823_v45, 16  ;;  %v2877_v46 = vshrl.u32 %v7083_v11, 16 }
 0x7ee   :  { %v2867_v23 = vpack.i.b16 %v2866_v33, %v2865_v61  ;;  %v2953_v20 = vperm.slane %v2864_v26, %v6397_v0  ;;  %v2948_v16 = vperm.slane %v2858_v56, %v6397_v0  ;;  %v2942_v18 = vrot.slane %v7113_v7, 4 }
 0x7ef   :  { %v2672_v32 = vrot.slane %v7116_v9, 4  ;;  %v2861_v14 = vpack.i.b16 %v2860_v51, %v2859_v35  ;;  %v2915_v2 = vsel %vm639_vm1, 0, %v2914_v63  ;;  %v2917_v41 = vsel %vm639_vm1, 0, %v2916_v25 }
 0x7f0   :  { %v2954_v8 = vrot.slane %v2953_v20, 4  ;;  %v2979_v54 = vperm.slane %v2867_v23, %v6397_v0  ;;  %v2956_v53 = vrot.slane %v2948_v16, 4  ;;  %v2940_v47 = vrot.slane %v2935_v39, 4 }
 0x7f1   :  { %v2974_v62 = vperm.slane %v2861_v14, %v6397_v0  ;;  %v7142_v5 = vsel %vm639_vm1, 0, %v2942_v18  ;;  %v7146_v58 = vpack.c.bf16 %v2566_v27, %v2566_v27 }
 0x7f2   :  { %v2980_v60 = vrot.slane %v2979_v54, 4  ;;  %v2955_v28 = vsel %vm639_vm1, %v2954_v8, %v2948_v16  ;;  %v2957_v33 = vsel %vm639_vm1, %v2953_v20, %v2956_v53  ;;  %v2606_v20 = vshrl.u32 %v7139_v3, 16 }
 0x7f3   :  { %v2961_v35 = vperm.slane %v2955_v28, %v6407_v29  ;;  %v2965_v38 = vperm.slane %v2957_v33, %v6407_v29  ;;  %v2825_v45 = vpop.permute.xlu0 %2824  ;;  %v2982_v26 = vrot.slane %v2974_v62, 4  ;;  %3322 = vrot.lane.b32.xlu0 %v7146_v58, %s6023_s22  ;;  %3314 = vrot.lane.b32.xlu2 %v7146_v58, %s6024_s11  ;;  %v2941_v51 = vsel %vm639_vm1, 0, %v2940_v47 }
 0x7f4   :  { %v2981_v40 = vsel %vm639_vm1, %v2980_v60, %v2974_v62  ;;  %v2870_v61 = vpack.i.b16 %v2825_v45, %v7038_v36  ;;  %v2872_v56 = vshrl.u32 %v2825_v45, 16 }
 0x7f5   :  { %v2966_v63 = vrot.slane %v2961_v35, 4  ;;  %v2968_v25 = vrot.slane %v2965_v38, 4  ;;  %v2987_v23 = vperm.slane %v2981_v40, %v6407_v29  ;;  %v2983_v16 = vsel %vm639_vm1, %v2979_v54, %v2982_v26 }
 0x7f6   :  { %v2873_v17 = vpack.i.b16 %v2872_v56, %v2871_v30  ;;  %v3000_v36 = vperm.slane %v2870_v61, %v6397_v0  ;;  %v2991_v14 = vperm.slane %v2983_v16, %v6407_v29 }
 0x7f7   :  { %v2967_v18 = vsel %vm639_vm1, 0, %v2966_v63  ;;  %v2969_v8 = vsel %vm639_vm1, 0, %v2968_v25  ;;  %v2992_v53 = vrot.slane %v2987_v23, 4  ;;  %v3100_v27 = vsel %vm639_vm1, %v2966_v63, %v2909_v6 }
 0x7f8   :  { %v3105_v60 = vsel %vm639_vm1, %v2968_v25, %v7102_v37  ;;  %v3118_v28 = vrot.slane %v2967_v18, 4  ;;  %v3124_v33 = vrot.slane %v2969_v8, 4  ;;  %v2994_v54 = vrot.slane %v2991_v14, 4 }
 0x7f9   :  { %v2993_v47 = vsel %vm639_vm1, 0, %v2992_v53  ;;  %v3104_v30 = vperm.slane %v3100_v27, %v6397_v0  ;;  %v3109_v62 = vperm.slane %v3105_v60, %v6397_v0  ;;  %v3176_v45 = vsel %vm639_vm1, %v2992_v53, %v2935_v39 }
 0x7fa   :  { %v3119_v35 = vsel %vm639_vm1, %v3118_v28, %v2915_v2  ;;  %v3125_v38 = vsel %vm639_vm1, %v3124_v33, %v2917_v41  ;;  %v3194_v40 = vrot.slane %v2993_v47, 4  ;;  %v7172_v6 = vsel %vm639_vm1, 0, %v2994_v54 }
 0x7fb   :  { %v3110_v37 = vrot.slane %v3109_v62, 4  ;;  %v3123_v26 = vperm.slane %v3119_v35, %v6397_v0  ;;  %v3180_v61 = vperm.slane %v3176_v45, %v6397_v0  ;;  %v2827_v56 = vpop.permute.xlu1 %2826  ;;  %v2841_v63 = vpop.permute.xlu0 %2840  ;;  %v3181_v25 = vsel %vm639_vm1, %v2994_v54, %v7113_v7  ;;  %3330 = vrot.lane.b32.xlu2 %v7146_v58, %s6025_s20 }
 0x7fc   :  { %v7179_v2 = vsel %vm639_vm1, %v3194_v40, %v2941_v51  ;;  %v3200_v41 = vrot.slane %v7172_v6, 4  ;;  %v3008_v39 = vrot.slane %v3000_v36, 4  ;;  %v3026_v23 = vperm.slane %v2873_v17, %v6397_v0 }
 0x7fd   :  { %v2882_v16 = vpack.i.b16 %v2827_v56, %v7045_v4  ;;  %v2884_v18 = vshrl.u32 %v2827_v56, 16  ;;  %v2876_v8 = vpack.i.b16 %v2841_v63, %v7083_v11  ;;  %v2878_v14 = vshrl.u32 %v2841_v63, 16 }
 0x7fe   :  { %v3111_v53 = vsel %vm639_vm1, %v3110_v37, %v3104_v30  ;;  %v3129_v7 = vperm.slane %v3125_v38, %v6397_v0  ;;  %v3185_v51 = vperm.slane %v3181_v25, %v6397_v0  ;;  %v3034_v27 = vrot.slane %v3026_v23, 4 }
 0x7ff   :  { %v2885_v60 = vpack.i.b16 %v2884_v18, %v2883_v13  ;;  %v3052_v17 = vperm.slane %v2882_v16, %v6397_v0  ;;  %v3005_v28 = vperm.slane %v2876_v8, %v6397_v0  ;;  %v2879_v33 = vpack.i.b16 %v2878_v14, %v2877_v46 }
 0x800   :  { %v7197_v47 = vperm.slane %v3111_v53, %v6407_v29  ;;  %v3130_v54 = vrot.slane %v3129_v7, 4  ;;  %v3186_v30 = vrot.slane %v3185_v51, 4 }
 0x801   :  { %v3060_v62 = vrot.slane %v3052_v17, 4  ;;  %v3078_v35 = vperm.slane %v2885_v60, %v6397_v0  ;;  %v3006_v38 = vrot.slane %v3005_v28, 4  ;;  %v3009_v45 = vsel %vm639_vm1, %v3005_v28, %v3008_v39 }
 0x802   :  { %v3017_v4 = vperm.slane %v3009_v45, %v6407_v29  ;;  %v3031_v13 = vperm.slane %v2879_v33, %v6397_v0  ;;  %v3131_v40 = vsel %vm639_vm1, %v3130_v54, %v3123_v26  ;;  %v3255_v11 = vshrl.u32 %v7197_v47, 16 }
 0x803   :  { %v3086_v46 = vrot.slane %v3078_v35, 4  ;;  %v3007_v37 = vsel %vm639_vm1, %v3006_v38, %v3000_v36  ;;  %v2843_v56 = vpop.permute.xlu1 %2842  ;;  %v2835_v63 = vpop.permute.xlu0 %2834  ;;  %v7207_v25 = vperm.slane %v3131_v40, %v6407_v29  ;;  %v3187_v16 = vsel %vm639_vm1, %v3186_v30, %v3180_v61 }
 0x804   :  { %v3013_v39 = vperm.slane %v3007_v37, %v6407_v29  ;;  %v3020_v18 = vrot.slane %v3017_v4, 4  ;;  %v3032_v8 = vrot.slane %v3031_v13, 4  ;;  %v3035_v14 = vsel %vm639_vm1, %v3031_v13, %v3034_v27 }
 0x805   :  { %v3043_v26 = vperm.slane %v3035_v14, %v6407_v29  ;;  %v2890_v53 = vshrl.u32 %v2843_v56, 16  ;;  %v2888_v7 = vpack.i.b16 %v2843_v56, %v2835_v63  ;;  %v2889_v51 = vshrl.u32 %v2835_v63, 16 }
 0x806   :  { %v3018_v60 = vrot.slane %v3013_v39, 4  ;;  %v3021_v36 = vsel %vm639_vm1, 0, %v3020_v18  ;;  %v3033_v28 = vsel %vm639_vm1, %v3032_v8, %v3026_v23  ;;  %v3254_v33 = vpack.i.b16 %v7207_v25, %v7197_v47 }
 0x807   :  { %v3039_v61 = vperm.slane %v3033_v28, %v6407_v29  ;;  %v3046_v54 = vrot.slane %v3043_v26, 4  ;;  %v2891_v30 = vpack.i.b16 %v2890_v53, %v2889_v51  ;;  %v3057_v38 = vperm.slane %v2888_v7, %v6397_v0 }
 0x808   :  { %v3019_v27 = vsel %vm639_vm1, 0, %v3018_v60  ;;  %v7220_v45 = vunpack.c.l.b16 %v3254_v33  ;;  %v3256_v13 = vshrl.u32 %v7207_v25, 16  ;;  %v7224_v40 = vperm.slane %v3187_v16, %v6407_v29 }
 0x809   :  { %v3044_v37 = vrot.slane %v3039_v61, 4  ;;  %v3047_v23 = vsel %vm639_vm1, 0, %v3046_v54  ;;  %v3058_v56 = vrot.slane %v3057_v38, 4  ;;  %v3061_v63 = vsel %vm639_vm1, %v3057_v38, %v3060_v62 }
 0x80a   :  { %v3069_v18 = vperm.slane %v3061_v63, %v6407_v29  ;;  %v3083_v8 = vperm.slane %v2891_v30, %v6397_v0  ;;  %v7230_v14 = vpack.i.b16 %v3256_v13, %v3255_v11  ;;  %v7242_v62 = vsel %vm639_vm1, %v3200_v41, %v7142_v5 }
 0x80b   :  { %v7235_v7 = vsel %vm639_vm1, 0, %v3044_v37  ;;  %v3059_v16 = vsel %vm639_vm1, %v3058_v56, %v3052_v17  ;;  %v2573_v51 = vpop.permute.xlu1 %2572  ;;  %v2579_v60 = vpop.permute.xlu0 %2578  ;;  %v3116_v28 = vrot.slane %v7197_v47, 4 }
 0x80c   :  { %v3065_v11 = vperm.slane %v3059_v16, %v6407_v29  ;;  %v3072_v33 = vrot.slane %v3069_v18, 4  ;;  %v3084_v54 = vrot.slane %v3083_v8, 4  ;;  %v3087_v30 = vsel %vm639_vm1, %v3083_v8, %v3086_v46 }
 0x80d   :  { %v3095_v38 = vperm.slane %v3087_v30, %v6407_v29  ;;  %v2586_v17 = vpack.i.b16 %v2573_v51, %v7061_v48  ;;  %v2588_v13 = vshrl.u32 %v2573_v51, 16  ;;  %v2604_v37 = vpack.i.b16 %v7139_v3, %v2579_v60 }
 0x80e   :  { %v3070_v56 = vrot.slane %v3065_v11, 4  ;;  %v3073_v6 = vsel %vm639_vm1, 0, %v3072_v33  ;;  %v3085_v5 = vsel %vm639_vm1, %v3084_v54, %v3078_v35  ;;  %v3143_v41 = vsel %vm639_vm1, %v3072_v33, %v3017_v4 }
 0x80f   :  { %v3091_v63 = vperm.slane %v3085_v5, %v6407_v29  ;;  %v3098_v18 = vrot.slane %v3095_v38, 4  ;;  %v3147_v16 = vperm.slane %v3143_v41, %v6397_v0  ;;  %v3162_v46 = vrot.slane %v3073_v6, 4 }
 0x810   :  { %v3071_v8 = vsel %vm639_vm1, 0, %v3070_v56  ;;  %v3138_v30 = vsel %vm639_vm1, %v3070_v56, %v3013_v39  ;;  %v2589_v51 = vpack.i.b16 %v2588_v13, %v2587_v43  ;;  %v2612_v11 = vperm.slane %v2586_v17, %v6397_v0 }
 0x811   :  { %v3096_v53 = vrot.slane %v3091_v63, 4  ;;  %v3099_v35 = vsel %vm639_vm1, 0, %v3098_v18  ;;  %v3142_v4 = vperm.slane %v3138_v30, %v6397_v0  ;;  %v3148_v33 = vrot.slane %v3147_v16, 4 }
 0x812   :  { %v3156_v54 = vrot.slane %v3071_v8, 4  ;;  %v3163_v38 = vsel %vm639_vm1, %v3162_v46, %v3021_v36  ;;  %v3219_v6 = vsel %vm639_vm1, %v3098_v18, %v3043_v26  ;;  %v3238_v5 = vrot.slane %v3099_v35, 4 }
 0x813   :  { %v7265_v41 = vsel %vm639_vm1, 0, %v3096_v53  ;;  %v3167_v48 = vperm.slane %v3163_v38, %v6397_v0  ;;  %v7269_v43 = vsel %vm639_vm1, %v3096_v53, %v3039_v61  ;;  %v3223_v39 = vperm.slane %v3219_v6, %v6397_v0  ;;  %v2577_v17 = vpop.permute.xlu1 %2576  ;;  %v2581_v13 = vpop.permute.xlu0 %2580 }
 0x814   :  { %v7273_v56 = vsel %vm639_vm1, %v3156_v54, %v3019_v27  ;;  %v3232_v36 = vrot.slane %v7265_v41, 4  ;;  %v7277_v26 = vsel %vm639_vm1, %v3238_v5, %v3047_v23  ;;  %v2620_v63 = vrot.slane %v2612_v11, 4 }
 0x815   :  { %v7279_v18 = vrot.slane %v3223_v39, 4  ;;  %v2638_v16 = vperm.slane %v2589_v51, %v6397_v0  ;;  %v2605_v46 = vshrl.u32 %v2579_v60, 16  ;;  %v2669_v61 = vperm.slane %v2604_v37, %v6397_v0 }
 0x816   :  { %v2593_v53 = vshrl.u32 %v2577_v17, 16  ;;  %v2592_v8 = vpack.i.b16 %v2581_v13, %v2577_v17  ;;  %v2594_v30 = vshrl.u32 %v2581_v13, 16  ;;  %v3149_v35 = vsel %vm639_vm1, %v3148_v33, %v3142_v4 }
 0x817   :  { %v2646_v27 = vrot.slane %v2638_v16, 4  ;;  %v2607_v54 = vpack.i.b16 %v2606_v20, %v2605_v46  ;;  %v2670_v38 = vrot.slane %v2669_v61, 4  ;;  %v2673_v23 = vsel %vm639_vm1, %v2669_v61, %v2672_v32 }
 0x818   :  { %v2681_v6 = vperm.slane %v2673_v23, %v6407_v29  ;;  %v2595_v51 = vpack.i.b16 %v2594_v30, %v2593_v53  ;;  %v2617_v60 = vperm.slane %v2592_v8, %v6397_v0  ;;  %v7292_v37 = vperm.slane %v3149_v35, %v6407_v29 }
 0x819   :  { %v2671_v4 = vsel %vm639_vm1, %v2670_v38, %v7116_v9  ;;  %v2695_v33 = vperm.slane %v2607_v54, %v6397_v0  ;;  %v3161_v3 = vperm.slane %v7273_v56, %v6397_v0  ;;  %v3168_v20 = vrot.slane %v3167_v48, 4 }
 0x81a   :  { %v2677_v5 = vperm.slane %v2671_v4, %v6407_v29  ;;  %v2684_v32 = vrot.slane %v2681_v6, 4  ;;  %v2618_v39 = vrot.slane %v2617_v60, 4  ;;  %v2621_v17 = vsel %vm639_vm1, %v2617_v60, %v2620_v63 }
 0x81b   :  { %v2696_v13 = vrot.slane %v2695_v33, 4  ;;  %v2699_v46 = vsel %vm639_vm1, %v2695_v33, %v2698_v57  ;;  %v2629_v61 = vperm.slane %v2621_v17, %v6407_v29  ;;  %v2643_v9 = vperm.slane %v2595_v51, %v6397_v0 }
 0x81c   :  { %v2682_v53 = vrot.slane %v2677_v5, 4  ;;  %v2685_v8 = vsel %vm639_vm1, 0, %v2684_v32  ;;  %v2707_v48 = vperm.slane %v2699_v46, %v6407_v29  ;;  %v2619_v56 = vsel %vm639_vm1, %v2618_v39, %v2612_v11 }
 0x81d   :  { %v2697_v30 = vsel %vm639_vm1, %v2696_v13, %v7119_v42  ;;  %v2736_v63 = vrot.slane %v2685_v8, 4  ;;  %v2625_v35 = vperm.slane %v2619_v56, %v6407_v29  ;;  %v2632_v54 = vrot.slane %v2629_v61, 4 }
 0x81e   :  { %v2683_v57 = vsel %vm639_vm1, 0, %v2682_v53  ;;  %v2703_v38 = vperm.slane %v2697_v30, %v6407_v29  ;;  %v2710_v23 = vrot.slane %v2707_v48, 4  ;;  %v2644_v6 = vrot.slane %v2643_v9, 4 }
 0x81f   :  { %v2730_v51 = vrot.slane %v2683_v57, 4  ;;  %v2630_v60 = vrot.slane %v2625_v35, 4  ;;  %v2633_v4 = vsel %vm639_vm1, 0, %v2632_v54  ;;  %v2647_v33 = vsel %vm639_vm1, %v2643_v9, %v2646_v27 }
 0x820   :  { %v2708_v11 = vrot.slane %v2703_v38, 4  ;;  %v2711_v5 = vsel %vm639_vm1, 0, %v2710_v23  ;;  %v2645_v42 = vsel %vm639_vm1, %v2644_v6, %v2638_v16  ;;  %v2655_v39 = vperm.slane %v2647_v33, %v6407_v29 }
 0x821   :  { %v2774_v17 = vrot.slane %v2711_v5, 4  ;;  %v2631_v13 = vsel %vm639_vm1, 0, %v2630_v60  ;;  %v2651_v46 = vperm.slane %v2645_v42, %v6407_v29  ;;  %v7322_v8 = vsel %vm639_vm1, %v2682_v53, %v2625_v35 }
 0x822   :  { %v2709_v48 = vsel %vm639_vm1, 0, %v2708_v11  ;;  %v2658_v56 = vrot.slane %v2655_v39, 4  ;;  %v2716_v27 = vperm.slane %v7322_v8, %v6397_v0  ;;  %v2717_v9 = vsel %vm639_vm1, %v2684_v32, %v2629_v61 }
 0x823   :  { %v2768_v30 = vrot.slane %v2709_v48, 4  ;;  %v2656_v16 = vrot.slane %v2651_v46, 4  ;;  %v2721_v54 = vperm.slane %v2717_v9, %v6397_v0  ;;  %v7330_v57 = vsel %vm639_vm1, %v2730_v51, %v2631_v13 }
 0x824   :  { %v2659_v38 = vsel %vm639_vm1, 0, %v2658_v56  ;;  %v2735_v53 = vperm.slane %v7330_v57, %v6397_v0  ;;  %v2737_v35 = vsel %vm639_vm1, %v2736_v63, %v2633_v4  ;;  %v7337_v6 = vsel %vm639_vm1, %v2708_v11, %v2651_v46 }
 0x825   :  { %v2657_v60 = vsel %vm639_vm1, 0, %v2656_v16  ;;  %v7340_v32 = vrot.slane %v2721_v54, 4  ;;  %v2741_v61 = vperm.slane %v2737_v35, %v6397_v0  ;;  %v2754_v51 = vperm.slane %v7337_v6, %v6397_v0 }
 0x826   :  { %v2755_v33 = vsel %vm639_vm1, %v2710_v23, %v2655_v39  ;;  %v7347_v5 = vsel %vm639_vm1, %v2768_v30, %v2657_v60  ;;  %v2775_v42 = vsel %vm639_vm1, %v2774_v17, %v2659_v38  ;;  %v3169_v63 = vsel %vm639_vm1, %v3168_v20, %v3161_v3 }
 0x827   :  { %v7351_v4 = vrot.slane %v2741_v61, 4  ;;  %v2759_v11 = vperm.slane %v2755_v33, %v6397_v0  ;;  %v2773_v13 = vperm.slane %v7347_v5, %v6397_v0  ;;  %v2779_v46 = vperm.slane %v2775_v42, %v6397_v0 }
 0x828   :  { %v3173_v48 = vperm.slane %v3169_v63, %v6407_v29  ;;  %v3267_v23 = vshrl.u32 %v7292_v37, 16  ;;  %v3810_v39 = vunpack.c.l.b16 %v7230_v14  ;;  %v3205_v17 = vperm.slane %v7242_v62, %v6397_v0 }
 0x829   :  { %v7362_v56 = vrot.slane %v2759_v11, 4  ;;  %v7364_v3 = vrot.slane %v2779_v46, 4  ;;  %v3218_v20 = vperm.slane %v7269_v43, %v6397_v0  ;;  %v3233_v9 = vsel %vm639_vm1, %v3232_v36, %v7235_v7 }
 0x82a   :  { %v3266_v30 = vpack.i.b16 %v3173_v48, %v7292_v37  ;;  %v3268_v16 = vshrl.u32 %v3173_v48, 16  ;;  %v3206_v54 = vrot.slane %v3205_v17, 4  ;;  %v3237_v14 = vperm.slane %v3233_v9, %v6397_v0 }
 0x82b   :  { %v3225_v62 = vsel %vm639_vm1, %v7279_v18, %v3218_v20  ;;  %v3243_v38 = vperm.slane %v7277_v26, %v6397_v0  ;;  %v3117_v43 = vsel %vm639_vm1, 0, %v3116_v28  ;;  %v3136_v41 = vrot.slane %v7207_v25, 4 }
 0x82c   :  { %v3789_v35 = vunpack.c.l.b16 %v3266_v30  ;;  %v3269_v7 = vpack.i.b16 %v3268_v16, %v3267_v23  ;;  %v8050_v36 = vperm.slane %v7179_v2, %v6397_v0  ;;  %v7387_v61 = vperm.slane %v3225_v62, %v6407_v29 }
 0x82d   :  { %v3244_v33 = vrot.slane %v3243_v38, 4  ;;  %v3137_v26 = vsel %vm639_vm1, 0, %v3136_v41  ;;  %v3154_v47 = vrot.slane %v7292_v37, 4  ;;  %v3174_v42 = vrot.slane %v3173_v48, 4 }
 0x82e   :  { %v3207_v60 = vsel %vm639_vm1, %v3206_v54, %v8050_v36  ;;  %v3790_v28 = vpack.c.b16 %v3789_v35, %v7220_v45  ;;  %v3811_v25 = vunpack.c.l.b16 %v3269_v7  ;;  %v3260_v63 = vpack.i.b16 %v3137_v26, %v3117_v43 }
 0x82f   :  { %v3211_v18 = vperm.slane %v3207_v60, %v6407_v29  ;;  %v3245_v11 = vsel %vm639_vm1, %v3244_v33, %v3237_v14  ;;  %v3155_v46 = vsel %vm639_vm1, 0, %v3154_v47  ;;  %v3279_v23 = vshrl.u32 %v7224_v40, 16 }
 0x830   :  { %v3795_v17 = vsel %vm1321_vm2, %v3790_v28, 0  ;;  %v3812_v20 = vpack.c.b16 %v3811_v25, %v3810_v39  ;;  %v3249_v9 = vperm.slane %v3245_v11, %v6407_v29  ;;  %v3175_v37 = vsel %vm639_vm1, 0, %v3174_v42 }
 0x831   :  { %v3278_v2 = vpack.i.b16 %v3211_v18, %v7224_v40  ;;  %3804 = vmatpush.bf16.xpose.msrb.mxu3 %v3795_v17  ;;  %v3272_v30 = vpack.i.b16 %v3175_v37, %v3155_v46  ;;  %v3832_v48 = vunpack.c.l.b16 %v3260_v63  ;;  %v3280_v16 = vshrl.u32 %v3211_v18, 16 }
 0x832   :  { %v3817_v54 = vsel %vm1321_vm2, %v3812_v20, 0  ;;  %v3290_v14 = vpack.i.b16 %v3249_v9, %v7387_v61  ;;  %v3291_v62 = vshrl.u32 %v7387_v61, 16  ;;  %v3292_v38 = vshrl.u32 %v3249_v9, 16 }
 0x833   :  { %v3876_v45 = vunpack.c.l.b16 %v3278_v2  ;;  %3826 = vmatpush.bf16.xpose.msra.mxu0 %v3817_v54  ;;  %v3833_v41 = vunpack.c.l.b16 %v3272_v30  ;;  %v3281_v35 = vpack.i.b16 %v3280_v16, %v3279_v23  ;;  %v3261_v39 = vshrl.u32 %v3117_v43, 16 }
 0x834   :  { %v3262_v7 = vshrl.u32 %v3137_v26, 16  ;;  %v3877_v36 = vunpack.c.l.b16 %v3290_v14  ;;  %v3293_v60 = vpack.i.b16 %v3292_v38, %v3291_v62  ;;  %v3273_v33 = vshrl.u32 %v3155_v46, 16 }
 0x835   :  { %v3274_v47 = vshrl.u32 %v3175_v37, 16  ;;  %v3834_v28 = vpack.c.b16 %v3833_v41, %v3832_v48  ;;  %v3898_v25 = vunpack.c.l.b16 %v3281_v35  ;;  %v2723_v63 = vsel %vm639_vm1, %v7340_v32, %v2716_v27 }
 0x836   :  { %v3263_v42 = vpack.i.b16 %v3262_v7, %v3261_v39  ;;  %v3878_v11 = vpack.c.b16 %v3877_v36, %v3876_v45  ;;  %v3899_v2 = vunpack.c.l.b16 %v3293_v60  ;;  %v7409_v23 = vperm.slane %v2723_v63, %v6407_v29 }
 0x837   :  { %v3275_v17 = vpack.i.b16 %v3274_v47, %v3273_v33  ;;  %v3839_v43 = vsel %vm1321_vm2, %v3834_v28, 0  ;;  %v2743_v46 = vsel %vm639_vm1, %v7351_v4, %v2735_v53  ;;  %v3192_v8 = vrot.slane %v7224_v40, 4 }
 0x838   :  { %v3854_v26 = vunpack.c.l.b16 %v3263_v42  ;;  %v3883_v20 = vsel %vm1321_vm2, %v3878_v11, 0  ;;  %v3900_v27 = vpack.c.b16 %v3899_v2, %v3898_v25  ;;  %v2747_v37 = vperm.slane %v2743_v46, %v6407_v29 }
 0x839   :  { %3848 = vmatpush.bf16.xpose.msra.mxu3 %v3839_v43  ;;  %v3855_v32 = vunpack.c.l.b16 %v3275_v17  ;;  %3892 = vmatpush.bf16.xpose.msra.mxu1 %v3883_v20  ;;  %v3193_v45 = vsel %vm639_vm1, 0, %v3192_v8  ;;  %v3212_v30 = vrot.slane %v3211_v18, 4  ;;  %v3230_v48 = vrot.slane %v7387_v61, 4  ;;  %v7452_v20 = vpop.permute.xlu1 %3308 }
 0x83a   :  { %v3250_v16 = vrot.slane %v3249_v9, 4  ;;  %v3905_v57 = vsel %vm1321_vm2, %v3900_v27, 0  ;;  %v2790_v53 = vpack.i.b16 %v2747_v37, %v7409_v23  ;;  %v2791_v40 = vshrl.u32 %v7409_v23, 16  ;;  %v7454_v27 = vpop.permute.xlu0 %3316 }
 0x83b   :  { %v3856_v54 = vpack.c.b16 %v3855_v32, %v3854_v26  ;;  %3914 = vmatpush.bf16.xpose.msra.mxu2 %v3905_v57  ;;  %v3213_v4 = vsel %vm639_vm1, 0, %v3212_v30  ;;  %v3231_v14 = vsel %vm639_vm1, 0, %v3230_v48  ;;  %v2792_v38 = vshrl.u32 %v2747_v37, 16  ;;  %v3319_v48 = vpop.permute.xlu2 %3318 }
 0x83c   :  { %v3251_v62 = vsel %vm639_vm1, 0, %v3250_v16  ;;  %5306 = vmatmul.msk.bf16.vlgmr.msrb.gmra.mxu3 %vm1321_vm2, %v2790_v53  ;;  %v3284_v61 = vpack.i.b16 %v3213_v4, %v3193_v45  ;;  %v2761_v41 = vsel %vm639_vm1, %v7362_v56, %v2754_v51  ;;  %v2781_v7 = vsel %vm639_vm1, %v7364_v3, %v2773_v13 }
 0x83d   :  { %v3861_v18 = vsel %vm1321_vm2, %v3856_v54, 0  ;;  %v3296_v9 = vpack.i.b16 %v3251_v62, %v3231_v14  ;;  %v2793_v35 = vpack.i.b16 %v2792_v38, %v2791_v40  ;;  %v7436_v39 = vperm.slane %v2761_v41, %v6407_v29 }
 0x83e   :  { %3870 = vmatpush.bf16.xpose.msrb.mxu0 %v3861_v18  ;;  %v3285_v36 = vshrl.u32 %v3193_v45, 16  ;;  %v3920_v60 = vunpack.c.l.b16 %v3284_v61  ;;  %v2785_v47 = vperm.slane %v2781_v7, %v6407_v29  ;;  %v3286_v6 = vshrl.u32 %v3213_v4, 16 }
 0x83f   :  { %v3921_v33 = vunpack.c.l.b16 %v3296_v9  ;;  %5307 = vmatmul.msk.bf16.vlgmr.msra.gmra.mxu0 %vm1321_vm2, %v2793_v35  ;;  %v3297_v51 = vshrl.u32 %v3231_v14, 16  ;;  %v3298_v56 = vshrl.u32 %v3251_v62, 16  ;;  %v2803_v28 = vshrl.u32 %v7436_v39, 16 }
 0x840   :  { %v2802_v42 = vpack.i.b16 %v2785_v47, %v7436_v39  ;;  %v3287_v63 = vpack.i.b16 %v3286_v6, %v3285_v36  ;;  %v2804_v5 = vshrl.u32 %v2785_v47, 16  ;;  %v2748_v2 = vrot.slane %v2747_v37, 4 }
 0x841   :  { %v3922_v25 = vpack.c.b16 %v3921_v33, %v3920_v60  ;;  %v3299_v11 = vpack.i.b16 %v3298_v56, %v3297_v51  ;;  %v2728_v26 = vrot.slane %v7409_v23, 4  ;;  %v3347_v23 = vshrl.u32 %v7081_v49, 16  ;;  %v3327_v53 = vpop.permute.xlu1 %3326 }
 0x842   :  { %5310 = vmatmul.msk.bf16.vlgmr.msra.gmra.mxu1 %vm1321_vm2, %v2802_v42  ;;  %v2805_v3 = vpack.i.b16 %v2804_v5, %v2803_v28  ;;  %v3942_v17 = vunpack.c.l.b16 %v3287_v63  ;;  %v2749_v8 = vsel %vm639_vm1, 0, %v2748_v2  ;;  %v3353_v54 = vshrl.u32 %v3319_v48, 16  ;;  %v3311_v40 = vpop.permute.xlu0 %3310 }
 0x843   :  { %v3927_v13 = vsel %vm1321_vm2, %v3922_v25, 0  ;;  %v3943_v43 = vunpack.c.l.b16 %v3299_v11  ;;  %v2729_v45 = vsel %vm639_vm1, 0, %v2728_v26  ;;  %v2798_v37 = vshrl.u32 %v2749_v8, 16 }
 0x844   :  { %3936 = vmatpush.bf16.xpose.msrb.mxu3 %v3927_v13  ;;  %5311 = vmatmul.msk.bf16.vlgmr.msra.gmra.mxu2 %vm1321_vm2, %v2805_v3  ;;  %v2796_v30 = vpack.i.b16 %v2749_v8, %v2729_v45  ;;  %v2797_v16 = vshrl.u32 %v2729_v45, 16  ;;  %v3354_v4 = vshrl.u32 %v3327_v53, 16  ;;  %v3346_v14 = vpack.i.b16 %v3311_v40, %v7081_v49 }
 0x845   :  { %v3944_v46 = vpack.c.b16 %v3943_v43, %v3942_v17  ;;  %v3348_v62 = vshrl.u32 %v3311_v40, 16  ;;  %v3352_v38 = vpack.i.b16 %v3327_v53, %v3319_v48  ;;  %v2786_v35 = vrot.slane %v2785_v47, 4 }
 0x846   :  { %v2799_v57 = vpack.i.b16 %v2798_v37, %v2797_v16  ;;  %v3436_v61 = vperm.slane %v3346_v14, %v6397_v0  ;;  %v3355_v9 = vpack.i.b16 %v3354_v4, %v3353_v54  ;;  %v2766_v6 = vrot.slane %v7436_v39, 4 }
 0x847   :  { %v3949_v32 = vsel %vm1321_vm2, %v3944_v46, 0  ;;  %v3349_v18 = vpack.i.b16 %v3348_v62, %v3347_v23  ;;  %v3441_v41 = vperm.slane %v3352_v38, %v6397_v0  ;;  %v2787_v25 = vsel %vm639_vm1, 0, %v2786_v35 }
 0x848   :  { %3958 = vmatpush.bf16.xpose.msra.mxu0 %v3949_v32  ;;  %v3444_v7 = vrot.slane %v3436_v61, 4  ;;  %v3467_v33 = vperm.slane %v3355_v9, %v6397_v0  ;;  %v2767_v63 = vsel %vm639_vm1, 0, %v2766_v6  ;;  %v2810_v5 = vshrl.u32 %v2787_v25, 16 }
 0x849   :  { %v3462_v36 = vperm.slane %v3349_v18, %v6397_v0  ;;  %v3442_v60 = vrot.slane %v3441_v41, 4  ;;  %v2808_v39 = vpack.i.b16 %v2787_v25, %v2767_v63  ;;  %v2809_v11 = vshrl.u32 %v2767_v63, 16 }
 0x84a   :  { %v7471_v56 = vsel %vm639_vm1, %v3441_v41, %v3444_v7  ;;  %v3468_v28 = vrot.slane %v3467_v33, 4  ;;  %v7512_v41 = vpop.permute.xlu0 %3312  ;;  %v3335_v63 = vshrl.u32 %v7074_v34, 16 }
 0x84b   :  { %v3470_v51 = vrot.slane %v3462_v36, 4  ;;  %v7468_v49 = vsel %vm639_vm1, %v3442_v60, %v3436_v61  ;;  %v2811_v13 = vpack.i.b16 %v2810_v5, %v2809_v11  ;;  %v3336_v5 = vshrl.u32 %v7452_v20, 16 }
 0x84c   :  { %5308 = vmatmul.msk.bf16.vlgmr.msra.gmra.mxu3 %vm1321_vm2, %v2796_v30  ;;  %v7475_v47 = vsel %vm639_vm1, %v3468_v28, %v3462_v36 }
 0x84d   :  { %v7478_v42 = vsel %vm639_vm1, %v3467_v33, %v3470_v51  ;;  %v3315_v9 = vpop.permute.xlu2 %3314 }
 0x84f   :  { %5309 = vmatmul.msk.bf16.vlgmr.msrb.gmra.mxu0 %vm1321_vm2, %v2799_v57 }
 0x855   :  { %v7514_v35 = vpop.permute.xlu2 %3330 }
 0x85c   :  { %5312 = vmatmul.msk.bf16.vlgmr.msrb.gmra.mxu3 %vm1321_vm2, %v2808_v39 }
 0x85f   :  { %5313 = vmatmul.msk.bf16.vlgmr.msra.gmra.mxu0 %vm1321_vm2, %v2811_v13 }
 0x865   :  { %v7516_v7 = vpop.permute.xlu0 %3322 }
 0x8bc   :  { %v3828_v3 = vpop.f32.mrf.mxu0 }
 0x8bd   :  { %v3967_v2 = vsel %vm1984_vm4, %v3828_v3, -inf }
 0x8be   :  { %3968 = vmax.xlane.f32.xlu2 %v3967_v2 }
 0x8bf   :  { %v7484_v17 = vpop.f32.mrf.mxu1  ;;  %v3806_v43 = vpop.f32.mrf.mxu3 }
 0x8c0   :  { %v3964_v26 = vsel %vm1984_vm4, %v3806_v43, -inf  ;;  %v3976_v8 = vsel %vm1984_vm4, %v7484_v17, -inf }
 0x8c1   :  { %3965 = vmax.xlane.f32.xlu0 %v3964_v26  ;;  %v3337_v26 = vpack.i.b16 %v3336_v5, %v3335_v63  ;;  %v3378_v63 = vshrl.u32 %v7514_v35, 16 }
 0x8c4   :  { %v3830_v46 = vpop.f32.mrf.mxu0 }
 0x8c6   :  { %3977 = vmax.xlane.f32.xlu2 %v3976_v8 }
 0x8c7   :  { %v3896_v32 = vpop.f32.mrf.mxu1  ;;  %v3916_v45 = vpop.f32.mrf.mxu2 }
 0x8c8   :  { %v3979_v37 = vsel %vm1984_vm4, %v3916_v45, -inf  ;;  %v3808_v30 = vpop.f32.mrf.mxu3  ;;  %v3449_v32 = vperm.slane %v7468_v49, %v6407_v29 }
 0x8c9   :  { %3980 = vmax.xlane.f32.xlu1 %v3979_v37  ;;  %v3475_v30 = vperm.slane %v7475_v47, %v6407_v29 }
 0x8cc   :  { %v7490_v48 = vpop.f32.mrf.mxu0 }
 0x8cd   :  { %v3973_v16 = vsel %vm1984_vm4, %v7490_v48, -inf }
 0x8ce   :  { %3974 = vmax.xlane.f32.xlu2 %v3973_v16 }
 0x8cf   :  { %v3918_v57 = vpop.f32.mrf.mxu2 }
 0x8d0   :  { %v7494_v23 = vpop.f32.mrf.mxu3  ;;  %v3370_v57 = vpack.i.b16 %v3315_v9, %v7146_v58 }
 0x8d1   :  { %v3970_v54 = vsel %vm1984_vm4, %v7494_v23, -inf }
 0x8d2   :  { %3971 = vmax.xlane.f32.xlu1 %v3970_v54  ;;  %v7543_v54 = vrot.slane %v3449_v32, 4 }
 0x8d4   :  { %v3874_v53 = vpop.f32.mrf.mxu0 }
 0x8d5   :  { %v3372_v53 = vshrl.u32 %v3315_v9, 16 }
 0x8d8   :  { %v3852_v40 = vpop.f32.mrf.mxu3 }
 0x8dc   :  { %v7498_v4 = vpop.f32.mrf.mxu0 }
 0x8dd   :  { %v3985_v14 = vsel %vm1984_vm4, %v7498_v4, -inf }
 0x8de   :  { %3986 = vmax.xlane.f32.xlu1 %v3985_v14  ;;  %v3341_v14 = vshrl.u32 %v7454_v27, 16 }
 0x8e0   :  { %v7502_v62 = vpop.f32.mrf.mxu3 }
 0x8e1   :  { %v3982_v38 = vsel %vm1984_vm4, %v7502_v62, -inf }
 0x8e2   :  { %3983 = vmax.xlane.f32.xlu0 %v3982_v38  ;;  %v7547_v38 = vrot.slane %v3475_v30, 4 }
 0x8e4   :  { %v3962_v18 = vpop.f32.mrf.mxu0 }
 0x8e6   :  { %3324 = vrot.lane.b32.xlu2 %v7074_v34, %s6025_s20 }
 0x8e8   :  { %v3940_v61 = vpop.f32.mrf.mxu3 }
 0x8f6   :  { %3328 = vrot.lane.b32.xlu0 %v7097_v22, %s6025_s20 }
 0x8f7   :  { %3320 = vrot.lane.b32.xlu1 %v7097_v22, %s6023_s22 }
 0x931   :  { %v3969_v36 = vpop.xlane.xlu2 %3968 }
 0x932   :  { %v3989_v60 = vsub.f32 %v3828_v3, %v3969_v36 }
 0x934   :  { %v3998_v33 = vmul.f32 1.442695, %v3989_v60  ;;  %v3966_v6 = vpop.xlane.xlu0 %3965  ;;  %v3376_v60 = vpack.i.b16 %v7514_v35, %v7516_v7 }
 0x935   :  { %v3988_v51 = vsub.f32 %v3806_v43, %v3966_v6  ;;  %v3334_v43 = vpack.i.b16 %v7452_v20, %v7074_v34  ;;  %v3410_v34 = vperm.slane %v3337_v26, %v6397_v0  ;;  %v3479_v20 = vperm.slane %v7478_v42, %v6407_v29 }
 0x936   :  { %5497 = vpow2.f32 %v3998_v33  ;;  %v7555_v33 = vperm.slane %v3370_v57, %v6397_v0  ;;  %v7572_v26 = vperm.slane %v3376_v60, %v6397_v0 }
 0x937   :  { %v3996_v28 = vmul.f32 1.442695, %v3988_v51  ;;  %v3384_v16 = vperm.slane %v3334_v43, %v6397_v0  ;;  %v3418_v36 = vrot.slane %v3410_v34, 4  ;;  %v3482_v42 = vrot.slane %v3479_v20, 4 }
 0x938   :  { %v3377_v43 = vshrl.u32 %v7516_v7, 16 }
 0x939   :  { %5499 = vpow2.f32 %v3996_v28  ;;  %v7518_v25 = vpop.xlane.xlu2 %3977  ;;  %v3392_v61 = vrot.slane %v3384_v16, 4 }
 0x93a   :  { %v3992_v35 = vsub.f32 %v7484_v17, %v7518_v25  ;;  %v3379_v17 = vpack.i.b16 %v3378_v63, %v3377_v43  ;;  %v3546_v25 = vrot.slane %v7572_v26, 4 }
 0x93c   :  { %v7522_v39 = vpop.eup %5497  ;;  %v3981_v11 = vpop.xlane.xlu1 %3980 }
 0x93d   :  { %v3993_v13 = vsub.f32 %v3916_v45, %v3981_v11  ;;  %v4015_v2 = vsel %vm1984_vm4, %v7522_v39, 0.0  ;;  %v3453_v45 = vperm.slane %v7471_v56, %v6407_v29  ;;  %v3371_v56 = vshrl.u32 %v7146_v58, 16 }
 0x93e   :  { %4016 = vadd.xlane.f32.xlu1 %v4015_v2  ;;  %v7566_v11 = vsel %vm639_vm1, 0, %v7547_v38  ;;  %v3483_v2 = vsel %vm639_vm1, 0, %v3482_v42 }
 0x93f   :  { %v7526_v3 = vpop.eup %5499  ;;  %v4006_v46 = vmul.f32 1.442695, %v3993_v13  ;;  %v3456_v49 = vrot.slane %v3453_v45, 4  ;;  %v3373_v28 = vpack.i.b16 %v3372_v53, %v3371_v56  ;;  %v3688_v7 = vrot.slane %v3483_v2, 4 }
 0x940   :  { %v4012_v8 = vsel %vm1984_vm4, %v7526_v3, 0.0 }
 0x941   :  { %5501 = vpow2.f32 %v4006_v46  ;;  %v3975_v37 = vpop.xlane.xlu2 %3974  ;;  %4013 = vadd.xlane.f32.xlu0 %v4012_v8  ;;  %v3457_v51 = vsel %vm639_vm1, 0, %v3456_v49  ;;  %v3548_v46 = vrot.slane %v7555_v33, 4  ;;  %v7580_v20 = vperm.slane %v3373_v28, %v6397_v0 }
 0x942   :  { %v3991_v58 = vsub.f32 %v7490_v48, %v3975_v37  ;;  %v3612_v30 = vrot.slane %v3457_v51, 4 }
 0x944   :  { %v4002_v8 = vmul.f32 1.442695, %v3991_v58 }
 0x945   :  { %v3972_v40 = vpop.xlane.xlu1 %3971 }
 0x946   :  { %v3990_v47 = vsub.f32 %v7494_v23, %v3972_v40  ;;  %v3455_v23 = vsel %vm639_vm1, 0, %v7543_v54  ;;  %v4004_v40 = vmul.f32 1.442695, %v3992_v35 }
 0x947   :  { %v7550_v18 = vpop.eup %5501  ;;  %v3606_v37 = vrot.slane %v3455_v23, 4 }
 0x948   :  { %v4000_v9 = vmul.f32 1.442695, %v3990_v47  ;;  %v4027_v6 = vsel %vm1984_vm4, %v7550_v18, 0.0 }
 0x949   :  { %4028 = vadd.xlane.f32.xlu1 %v4027_v6  ;;  %v3325_v5 = vpop.permute.xlu2 %3324 }
 0x94a   :  { %5503 = vpow2.f32 %v4000_v9  ;;  %v3340_v48 = vpack.i.b16 %v3325_v5, %v7454_v27  ;;  %v3342_v13 = vshrl.u32 %v3325_v5, 16  ;;  %v3682_v27 = vrot.slane %v7566_v11, 4 }
 0x94b   :  { %5505 = vpow2.f32 %v4002_v8 }
 0x94c   :  { %v3343_v32 = vpack.i.b16 %v3342_v13, %v3341_v14  ;;  %v3389_v45 = vperm.slane %v3340_v48, %v6397_v0  ;;  %5507 = vpow2.f32 %v4004_v40 }
 0x94e   :  { %v3390_v57 = vrot.slane %v3389_v45, 4  ;;  %v3393_v56 = vsel %vm639_vm1, %v3389_v45, %v3392_v61  ;;  %v3415_v53 = vperm.slane %v3343_v32, %v6397_v0 }
 0x94f   :  { %v3401_v14 = vperm.slane %v3393_v56, %v6407_v29 }
 0x950   :  { %v7586_v47 = vpop.eup %5503  ;;  %v3391_v60 = vsel %vm639_vm1, %v3390_v57, %v3384_v16  ;;  %v3416_v58 = vrot.slane %v3415_v53, 4  ;;  %v3419_v9 = vsel %vm639_vm1, %v3415_v53, %v3418_v36 }
 0x951   :  { %v3397_v6 = vperm.slane %v3391_v60, %v6407_v29  ;;  %v3404_v23 = vrot.slane %v3401_v14, 4  ;;  %v3427_v61 = vperm.slane %v3419_v9, %v6407_v29  ;;  %v3593_v51 = vsel %vm639_vm1, %v3456_v49, %v3401_v14  ;;  %v3987_v28 = vpop.xlane.xlu1 %3986  ;;  %v7607_v57 = vpop.eup %5505 }
 0x952   :  { %v3417_v63 = vsel %vm639_vm1, %v3416_v58, %v3410_v34  ;;  %v3597_v5 = vperm.slane %v3593_v51, %v6397_v0  ;;  %v3995_v11 = vsub.f32 %v7498_v4, %v3987_v28  ;;  %v4018_v16 = vsel %vm1984_vm4, %v7586_v47, 0.0 }
 0x953   :  { %v3402_v48 = vrot.slane %v3397_v6, 4  ;;  %v3405_v36 = vsel %vm639_vm1, 0, %v3404_v23  ;;  %v3423_v13 = vperm.slane %v3417_v63, %v6407_v29  ;;  %v3430_v2 = vrot.slane %v3427_v61, 4  ;;  %4019 = vadd.xlane.f32.xlu2 %v4018_v16 }
 0x954   :  { %v3588_v49 = vsel %vm639_vm1, %v7543_v54, %v3397_v6  ;;  %v3598_v43 = vrot.slane %v3597_v5, 4  ;;  %v3613_v34 = vsel %vm639_vm1, %v3612_v30, %v3405_v36  ;;  %v3669_v35 = vsel %vm639_vm1, %v3482_v42, %v3427_v61  ;;  %v7639_v36 = vpop.eup %5507 }
 0x955   :  { %v3403_v4 = vsel %vm639_vm1, 0, %v3402_v48  ;;  %v3428_v8 = vrot.slane %v3423_v13, 4  ;;  %v3431_v32 = vsel %vm639_vm1, 0, %v3430_v2  ;;  %v3592_v45 = vperm.slane %v3588_v49, %v6397_v0  ;;  %v3984_v14 = vpop.xlane.xlu0 %3983 }
 0x956   :  { %v3607_v56 = vsel %vm639_vm1, %v3606_v37, %v3403_v4  ;;  %v3617_v53 = vperm.slane %v3613_v34, %v6397_v0  ;;  %v3664_v54 = vsel %vm639_vm1, %v7547_v38, %v3423_v13  ;;  %v3673_v30 = vperm.slane %v3669_v35, %v6397_v0 }
 0x957   :  { %v3429_v42 = vsel %vm639_vm1, 0, %v3428_v8  ;;  %v3611_v60 = vperm.slane %v3607_v56, %v6397_v0  ;;  %v3689_v58 = vsel %vm639_vm1, %v3688_v7, %v3431_v32  ;;  %v3668_v6 = vperm.slane %v3664_v54, %v6397_v0 }
 0x958   :  { %v3618_v9 = vrot.slane %v3617_v53, 4  ;;  %v3674_v23 = vrot.slane %v3673_v30, 4  ;;  %v3693_v37 = vperm.slane %v3689_v58, %v6397_v0  ;;  %v7621_v61 = vsel %vm639_vm1, %v7572_v26, %v3548_v46 }
 0x959   :  { %v3571_v38 = vperm.slane %v3379_v17, %v6397_v0  ;;  %v4010_v51 = vmul.f32 1.442695, %v3995_v11  ;;  %v3994_v40 = vsub.f32 %v7502_v62, %v3984_v14  ;;  %v3683_v28 = vsel %vm639_vm1, %v3682_v27, %v3429_v42 }
 0x95a   :  { %v4021_v7 = vsel %vm1984_vm4, %v7607_v57, 0.0  ;;  %v3599_v63 = vsel %vm639_vm1, %v3598_v43, %v3592_v45  ;;  %v3619_v5 = vsel %vm639_vm1, %v3618_v9, %v3611_v60  ;;  %v3359_v62 = vshrl.u32 %v7097_v22, 16 }
 0x95b   :  { %5509 = vpow2.f32 %v4010_v51  ;;  %v4008_v16 = vmul.f32 1.442695, %v3994_v40  ;;  %4022 = vadd.xlane.f32.xlu2 %v4021_v7  ;;  %v7631_v46 = vperm.slane %v3599_v63, %v6407_v29  ;;  %v7634_v17 = vperm.slane %v3619_v5, %v6407_v29 }
 0x95c   :  { %v3574_v27 = vrot.slane %v7580_v20, 4  ;;  %v3694_v11 = vrot.slane %v3693_v37, 4  ;;  %v3675_v48 = vsel %vm639_vm1, %v3674_v23, %v3668_v6  ;;  %v3358_v13 = vpack.i.b16 %v7512_v41, %v7097_v22 }
 0x95d   :  { %5511 = vpow2.f32 %v4008_v16  ;;  %v3742_v2 = vpack.i.b16 %v7634_v17, %v7631_v46  ;;  %v7646_v49 = vperm.slane %v3675_v48, %v6407_v29  ;;  %v3360_v43 = vshrl.u32 %v7512_v41, 16 }
 0x95e   :  { %v3557_v34 = vperm.slane %v7621_v61, %v6407_v29  ;;  %v3687_v35 = vperm.slane %v3683_v28, %v6397_v0  ;;  %v3604_v4 = vrot.slane %v7631_v46, 4  ;;  %v3547_v22 = vsel %vm639_vm1, %v3546_v25, %v7555_v33 }
 0x95f   :  { %v3572_v8 = vrot.slane %v3571_v38, 4  ;;  %v3743_v32 = vshrl.u32 %v7631_v46, 16  ;;  %v3680_v45 = vrot.slane %v7646_v49, 4  ;;  %v3744_v56 = vshrl.u32 %v7634_v17, 16 }
 0x960   :  { %v3695_v41 = vsel %vm639_vm1, %v3694_v11, %v3687_v35  ;;  %v7662_v53 = vsel %vm639_vm1, 0, %v3604_v4  ;;  %v3624_v54 = vrot.slane %v7634_v17, 4  ;;  %v3575_v26 = vsel %vm639_vm1, %v3571_v38, %v3574_v27 }
 0x961   :  { %v7665_v30 = vpop.eup %5509  ;;  %v4024_v33 = vsel %vm1984_vm4, %v7639_v36, 0.0  ;;  %v7671_v25 = vperm.slane %v3695_v41, %v6407_v29  ;;  %v3767_v14 = vshrl.u32 %v7646_v49, 16  ;;  %v7676_v60 = vpack.i.b16 %v3744_v56, %v3743_v32 }
 0x962   :  { %v4033_v42 = vsel %vm1984_vm4, %v7665_v30, 0.0  ;;  %v7679_v58 = vsel %vm639_vm1, 0, %v3624_v54  ;;  %v3749_v9 = vshrl.u32 %v7662_v53, 16  ;;  %v3573_v51 = vsel %vm639_vm1, %v3572_v8, %v7580_v20 }
 0x963   :  { %v7682_v6 = vpop.eup %5511  ;;  %4034 = vadd.xlane.f32.xlu1 %v4033_v42  ;;  %4025 = vadd.xlane.f32.xlu2 %v4024_v33  ;;  %v3766_v23 = vpack.i.b16 %v7671_v25, %v7646_v49  ;;  %v3768_v61 = vshrl.u32 %v7671_v25, 16  ;;  %v3750_v38 = vshrl.u32 %v7679_v58, 16  ;;  %v7695_v28 = vsel %vm639_vm1, 0, %v3680_v45 }
 0x964   :  { %v4030_v40 = vsel %vm1984_vm4, %v7682_v6, 0.0  ;;  %v3700_v7 = vrot.slane %v7671_v25, 4  ;;  %v3553_v63 = vperm.slane %v3547_v22, %v6407_v29  ;;  %v3361_v27 = vpack.i.b16 %v3360_v43, %v3359_v62 }
 0x965   :  { %4031 = vadd.xlane.f32.xlu0 %v4030_v40  ;;  %v7699_v5 = vpack.i.b16 %v3768_v61, %v3767_v14  ;;  %v7701_v16 = vpack.i.b16 %v3750_v38, %v3749_v9  ;;  %v3583_v11 = vperm.slane %v3575_v26, %v6407_v29  ;;  %v3579_v48 = vperm.slane %v3573_v51, %v6407_v29 }
 0x966   :  { %v7705_v20 = vsel %vm639_vm1, 0, %v3700_v7  ;;  %v3773_v4 = vshrl.u32 %v7695_v28, 16  ;;  %v3488_v8 = vperm.slane %v3358_v13, %v6397_v0  ;;  %v3560_v32 = vrot.slane %v3557_v34, 4 }
 0x967   :  { %v3774_v22 = vshrl.u32 %v7705_v20, 16  ;;  %v3558_v56 = vrot.slane %v3553_v63, 4  ;;  %v3514_v54 = vperm.slane %v3361_v27, %v6397_v0  ;;  %v3584_v14 = vrot.slane %v3579_v48, 4 }
 0x968   :  { %v3329_v45 = vpop.permute.xlu0 %3328  ;;  %v3586_v42 = vrot.slane %v3583_v11, 4  ;;  %v3496_v9 = vrot.slane %v3488_v8, 4  ;;  %v3561_v61 = vsel %vm639_vm1, 0, %v3560_v32  ;;  %v8051_v17 = vpack.i.b16 %v7679_v58, %v7662_v53 }
 0x969   :  { %v3366_v62 = vshrl.u32 %v3329_v45, 16  ;;  %v3321_v43 = vpop.permute.xlu1 %3320  ;;  %v7713_v41 = vpack.i.b16 %v3774_v22, %v3773_v4  ;;  %v3559_v13 = vsel %vm639_vm1, 0, %v3558_v56  ;;  %v3522_v34 = vrot.slane %v3514_v54, 4 }
 0x96a   :  { %v3364_v26 = vpack.i.b16 %v3329_v45, %v3321_v43  ;;  %v3365_v33 = vshrl.u32 %v3321_v43, 16  ;;  %v3585_v27 = vsel %vm639_vm1, 0, %v3584_v14  ;;  %v3587_v4 = vsel %vm639_vm1, 0, %v3586_v42 }
 0x96b   :  { %v3650_v48 = vrot.slane %v3561_v61, 4  ;;  %v3644_v22 = vrot.slane %v3559_v13, 4  ;;  %v3726_v35 = vrot.slane %v3587_v4, 4 }
 0x96c   :  { %v3367_v38 = vpack.i.b16 %v3366_v62, %v3365_v33  ;;  %v3493_v51 = vperm.slane %v3364_v26, %v6397_v0 }
 0x96e   :  { %v3494_v40 = vrot.slane %v3493_v51, 4  ;;  %v3497_v7 = vsel %vm639_vm1, %v3493_v51, %v3496_v9  ;;  %v3519_v63 = vperm.slane %v3367_v38, %v6397_v0  ;;  %v3720_v51 = vrot.slane %v3585_v27, 4 }
 0x96f   :  { %v3505_v11 = vperm.slane %v3497_v7, %v6407_v29 }
 0x970   :  { %v3495_v45 = vsel %vm639_vm1, %v3494_v40, %v3488_v8  ;;  %v3520_v62 = vrot.slane %v3519_v63, 4  ;;  %v3523_v43 = vsel %vm639_vm1, %v3519_v63, %v3522_v34 }
 0x971   :  { %v3501_v26 = vperm.slane %v3495_v45, %v6407_v29  ;;  %v3508_v33 = vrot.slane %v3505_v11, 4  ;;  %v3531_v9 = vperm.slane %v3523_v43, %v6407_v29  ;;  %v3631_v38 = vsel %vm639_vm1, %v3560_v32, %v3505_v11 }
 0x972   :  { %v3521_v37 = vsel %vm639_vm1, %v3520_v62, %v3514_v54  ;;  %v3635_v61 = vperm.slane %v3631_v38, %v6397_v0 }
 0x973   :  { %v3506_v7 = vrot.slane %v3501_v26, 4  ;;  %v3509_v13 = vsel %vm639_vm1, 0, %v3508_v33  ;;  %v3527_v8 = vperm.slane %v3521_v37, %v6407_v29  ;;  %v3534_v40 = vrot.slane %v3531_v9, 4 }
 0x974   :  { %v3626_v34 = vsel %vm639_vm1, %v3558_v56, %v3501_v26  ;;  %v3636_v63 = vrot.slane %v3635_v61, 4  ;;  %v3651_v45 = vsel %vm639_vm1, %v3650_v48, %v3509_v13  ;;  %v3707_v43 = vsel %vm639_vm1, %v3586_v42, %v3531_v9 }
 0x975   :  { %v3507_v32 = vsel %vm639_vm1, 0, %v3506_v7  ;;  %v3532_v27 = vrot.slane %v3527_v8, 4  ;;  %v3535_v54 = vsel %vm639_vm1, 0, %v3534_v40  ;;  %v3630_v4 = vperm.slane %v3626_v34, %v6397_v0 }
 0x976   :  { %v3645_v11 = vsel %vm639_vm1, %v3644_v22, %v3507_v32  ;;  %v3655_v62 = vperm.slane %v3651_v45, %v6397_v0  ;;  %v3702_v37 = vsel %vm639_vm1, %v3584_v14, %v3527_v8  ;;  %v3711_v56 = vperm.slane %v3707_v43, %v6397_v0 }
 0x977   :  { %v3533_v26 = vsel %vm639_vm1, 0, %v3532_v27  ;;  %v3649_v48 = vperm.slane %v3645_v11, %v6397_v0  ;;  %v3706_v42 = vperm.slane %v3702_v37, %v6397_v0  ;;  %v3727_v33 = vsel %vm639_vm1, %v3726_v35, %v3535_v54 }
 0x978   :  { %v3656_v9 = vrot.slane %v3655_v62, 4  ;;  %v3712_v38 = vrot.slane %v3711_v56, 4  ;;  %v3721_v61 = vsel %vm639_vm1, %v3720_v51, %v3533_v26  ;;  %v3731_v22 = vperm.slane %v3727_v33, %v6397_v0 }
 0x979   :  { %v3637_v7 = vsel %vm639_vm1, %v3636_v63, %v3630_v4  ;;  %v3725_v14 = vperm.slane %v3721_v61, %v6397_v0  ;;  %v4060_v35 = vunpack.c.l.b16 %v3742_v2  ;;  %v4080_v51 = vunpack.c.l.b16 %v7676_v60 }
 0x97a   :  { %v3732_v13 = vrot.slane %v3731_v22, 4  ;;  %v3641_v8 = vperm.slane %v3637_v7, %v6407_v29  ;;  %v3657_v40 = vsel %vm639_vm1, %v3656_v9, %v3649_v48  ;;  %v3713_v34 = vsel %vm639_vm1, %v3712_v38, %v3706_v42 }
 0x97b   :  { %v3661_v45 = vperm.slane %v3657_v40, %v6407_v29  ;;  %v3717_v43 = vperm.slane %v3713_v34, %v6407_v29  ;;  %v4140_v27 = vunpack.c.l.b16 %v3766_v23  ;;  %v4100_v2 = vunpack.c.l.b16 %v8051_v17 }
 0x97c   :  { %v3755_v63 = vshrl.u32 %v3641_v8, 16  ;;  %v3733_v32 = vsel %vm639_vm1, %v3732_v13, %v3725_v14  ;;  %v3642_v54 = vrot.slane %v3641_v8, 4  ;;  %v4160_v34 = vunpack.c.l.b16 %v7699_v5 }
 0x97d   :  { %v3754_v4 = vpack.i.b16 %v3661_v45, %v3641_v8  ;;  %v3756_v11 = vshrl.u32 %v3661_v45, 16  ;;  %v3737_v62 = vperm.slane %v3733_v32, %v6407_v29  ;;  %v3662_v37 = vrot.slane %v3661_v45, 4 }
 0x97e   :  { %v3643_v46 = vsel %vm639_vm1, 0, %v3642_v54  ;;  %v3779_v60 = vshrl.u32 %v3717_v43, 16  ;;  %v3718_v56 = vrot.slane %v3717_v43, 4  ;;  %v4120_v45 = vunpack.c.l.b16 %v7701_v16 }
 0x97f   :  { %v4061_v26 = vunpack.c.l.b16 %v3754_v4  ;;  %v3757_v48 = vpack.i.b16 %v3756_v11, %v3755_v63  ;;  %v3778_v42 = vpack.i.b16 %v3737_v62, %v3717_v43  ;;  %v3663_v49 = vsel %vm639_vm1, 0, %v3662_v37 }
 0x980   :  { %v3760_v25 = vpack.i.b16 %v3663_v49, %v3643_v46  ;;  %v3780_v23 = vshrl.u32 %v3737_v62, 16  ;;  %v3761_v33 = vshrl.u32 %v3643_v46, 16  ;;  %v3762_v9 = vshrl.u32 %v3663_v49, 16 }
 0x981   :  { %v4062_v38 = vpack.c.b16 %v4061_v26, %v4060_v35  ;;  %v4081_v61 = vunpack.c.l.b16 %v3757_v48  ;;  %v4141_v22 = vunpack.c.l.b16 %v3778_v42  ;;  %v3719_v7 = vsel %vm639_vm1, 0, %v3718_v56 }
 0x982   :  { %v4101_v14 = vunpack.c.l.b16 %v3760_v25  ;;  %v3781_v13 = vpack.i.b16 %v3780_v23, %v3779_v60  ;;  %v3763_v53 = vpack.i.b16 %v3762_v9, %v3761_v33  ;;  %v3738_v58 = vrot.slane %v3737_v62, 4 }
 0x983   :  { %4074 = vmatpush.bf16.msrb.mxu1 %v4062_v38  ;;  %v4082_v8 = vpack.c.b16 %v4081_v61, %v4080_v51  ;;  %v4142_v40 = vpack.c.b16 %v4141_v22, %v4140_v27  ;;  %v3785_v4 = vshrl.u32 %v3719_v7, 16  ;;  %v8052_v51 = vpack.i.b16 %v7705_v20, %v7695_v28 }
 0x984   :  { %v4102_v43 = vpack.c.b16 %v4101_v14, %v4100_v2  ;;  %v4161_v63 = vunpack.c.l.b16 %v3781_v13  ;;  %v4121_v32 = vunpack.c.l.b16 %v3763_v53  ;;  %v3739_v35 = vsel %vm639_vm1, 0, %v3738_v58 }
 0x985   :  { %4094 = vmatpush.bf16.msrb.mxu2 %v4082_v8  ;;  %v3784_v54 = vpack.i.b16 %v3739_v35, %v3719_v7  ;;  %v3786_v11 = vshrl.u32 %v3739_v35, 16  ;;  %v4180_v27 = vunpack.c.l.b16 %v8052_v51  ;;  %v4200_v17 = vunpack.c.l.b16 %v7713_v41 }
 0x986   :  { %4114 = vmatpush.bf16.msra.mxu3 %v4102_v43  ;;  %v4162_v37 = vpack.c.b16 %v4161_v63, %v4160_v34  ;;  %v4122_v62 = vpack.c.b16 %v4121_v32, %v4120_v45 }
 0x987   :  { %4154 = vmatpush.bf16.msra.mxu1 %v4142_v40  ;;  %v4181_v5 = vunpack.c.l.b16 %v3784_v54  ;;  %v3787_v46 = vpack.i.b16 %v3786_v11, %v3785_v4 }
 0x988   :  { %4134 = vmatpush.bf16.msrb.mxu0 %v4122_v62 }
 0x989   :  { %4174 = vmatpush.bf16.msra.mxu2 %v4162_v37  ;;  %v4182_v16 = vpack.c.b16 %v4181_v5, %v4180_v27  ;;  %v4201_v2 = vunpack.c.l.b16 %v3787_v46 }
 0x98b   :  { %4194 = vmatpush.bf16.msrb.mxu3 %v4182_v16  ;;  %v4202_v60 = vpack.c.b16 %v4201_v2, %v4200_v17 }
 0x98d   :  { %4214 = vmatpush.bf16.msra.mxu0 %v4202_v60 }
 0x9b1   :  { %v4017_v56 = vpop.xlane.xlu1 %4016 }
 0x9b2   :  { %5513 = vrcp.f32 %v4017_v56 }
 0x9b4   :  { %v4014_v26 = vpop.xlane.xlu0 %4013 }
 0x9b5   :  { %5515 = vrcp.f32 %v4014_v26 }
 0x9b8   :  { %v5514_v48 = vpop.eup %5513 }
 0x9b9   :  { %v4045_v42 = vmul.f32 %v5514_v48, %v7522_v39 }
 0x9bb   :  { %v5516_v28 = vpop.eup %5515  ;;  %v4053_v20 = vpack.c.bf16 %v4045_v42, %v4045_v42 }
 0x9bc   :  { %v4044_v49 = vmul.f32 %v5516_v28, %v7526_v3  ;;  %v4029_v25 = vpop.xlane.xlu1 %4028 }
 0x9bd   :  { %5315 = vmatmul.msk.bf16.vlgmr.msrb.gmra.mxu2 %vm1984_vm4, %v4053_v20  ;;  %5517 = vrcp.f32 %v4029_v25 }
 0x9be   :  { %v4052_v23 = vpack.c.bf16 %v4044_v49, %v4044_v49 }
 0x9c0   :  { %5314 = vmatmul.msk.bf16.vlgmr.msrb.gmra.mxu1 %vm1984_vm4, %v4052_v23 }
 0x9c3   :  { %v5518_v41 = vpop.eup %5517 }
 0x9c4   :  { %v4049_v9 = vmul.f32 %v5518_v41, %v7550_v18 }
 0x9c6   :  { %v4020_v33 = vpop.xlane.xlu2 %4019  ;;  %v4057_v38 = vpack.c.bf16 %v4049_v9, %v4049_v9 }
 0x9c7   :  { %5519 = vrcp.f32 %v4020_v33 }
 0x9cd   :  { %v5520_v61 = vpop.eup %5519  ;;  %5319 = vmatmul.msk.bf16.vlgmr.msra.gmra.mxu2 %vm1984_vm4, %v4057_v38 }
 0x9ce   :  { %v4046_v39 = vmul.f32 %v5520_v61, %v7586_v47  ;;  %v4023_v22 = vpop.xlane.xlu2 %4022 }
 0x9cf   :  { %5521 = vrcp.f32 %v4023_v22 }
 0x9d0   :  { %v4054_v3 = vpack.c.bf16 %v4046_v39, %v4046_v39 }
 0x9d2   :  { %5316 = vmatmul.msk.bf16.vlgmr.msra.gmra.mxu3 %vm1984_vm4, %v4054_v3 }
 0x9d5   :  { %v5522_v7 = vpop.eup %5521 }
 0x9d6   :  { %v4047_v14 = vmul.f32 %v5522_v7, %v7607_v57  ;;  %v4026_v13 = vpop.xlane.xlu2 %4025  ;;  %v4035_v58 = vpop.xlane.xlu1 %4034 }
 0x9d7   :  { %5523 = vrcp.f32 %v4026_v13 }
 0x9d8   :  { %v4055_v53 = vpack.c.bf16 %v4047_v14, %v4047_v14  ;;  %v4032_v18 = vpop.xlane.xlu0 %4031 }
 0x9d9   :  { %5525 = vrcp.f32 %v4032_v18 }
 0x9da   :  { %5317 = vmatmul.msk.bf16.vlgmr.msrb.gmra.mxu0 %vm1984_vm4, %v4055_v53  ;;  %5527 = vrcp.f32 %v4035_v58 }
 0x9dd   :  { %v5524_v8 = vpop.eup %5523 }
 0x9de   :  { %v4048_v47 = vmul.f32 %v5524_v8, %v7639_v36 }
 0x9df   :  { %v5526_v40 = vpop.eup %5525 }
 0x9e0   :  { %v4050_v34 = vmul.f32 %v5526_v40, %v7682_v6  ;;  %v5528_v45 = vpop.eup %5527  ;;  %v4056_v43 = vpack.c.bf16 %v4048_v47, %v4048_v47 }
 0x9e1   :  { %v4051_v57 = vmul.f32 %v5528_v45, %v7665_v30 }
 0x9e2   :  { %v4058_v63 = vpack.c.bf16 %v4050_v34, %v4050_v34  ;;  %5318 = vmatmul.msk.bf16.vlgmr.msra.gmra.mxu1 %vm1984_vm4, %v4056_v43 }
 0x9e3   :  { %v4059_v32 = vpack.c.bf16 %v4051_v57, %v4051_v57 }
 0x9e4   :  { %5320 = vmatmul.msk.bf16.vlgmr.msrb.gmra.mxu3 %vm1984_vm4, %v4058_v63 }
 0x9ea   :  { %5321 = vmatmul.msk.bf16.vlgmr.msra.gmra.mxu0 %vm1984_vm4, %v4059_v32 }
 0xa3d   :  { %v4076_v35 = vpop.f32.mrf.mxu1 }
 0xa3e   :  { %v4220_v36 = vpack.c.bf16 %v4076_v35, %v4076_v35 }
 0xa40   :  { %v4096_v54 = vpop.f32.mrf.mxu2  ;;  %v4231_v51 = vshrl.u32 %v4220_v36, 16 }
 0xa41   :  { %v4221_v37 = vpack.c.bf16 %v4096_v54, %v4096_v54 }
 0xa43   :  { %v4232_v6 = vshrl.u32 %v4221_v37, 16  ;;  %v4230_v27 = vpack.i.b16 %v4221_v37, %v4220_v36 }
 0xa45   :  { %v4078_v4 = vpop.f32.mrf.mxu1  ;;  %v4233_v46 = vpack.i.b16 %v4232_v6, %v4231_v51  ;;  %v4256_v60 = vperm.slane %v4230_v27, %v6397_v0 }
 0xa47   :  { %v4282_v56 = vperm.slane %v4233_v46, %v6397_v0  ;;  %v4264_v49 = vrot.slane %v4256_v60, 4 }
 0xa48   :  { %v4098_v11 = vpop.f32.mrf.mxu2 }
 0xa49   :  { %v4290_v23 = vrot.slane %v4282_v56, 4 }
 0xa50   :  { %v4176_v62 = vpop.f32.mrf.mxu2 }
 0xa51   :  { %v4225_v7 = vpack.c.bf16 %v4176_v62, %v4176_v62 }
 0xa53   :  { %v4244_v34 = vshrl.u32 %v4225_v7, 16 }
 0xa55   :  { %v4116_v5 = vpop.f32.mrf.mxu3 }
 0xa56   :  { %v4222_v16 = vpack.c.bf16 %v4116_v5, %v4116_v5 }
 0xa57   :  { %v4136_v17 = vpop.f32.mrf.mxu0 }
 0xa58   :  { %v4223_v30 = vpack.c.bf16 %v4136_v17, %v4136_v17  ;;  %v4178_v2 = vpop.f32.mrf.mxu2  ;;  %v4237_v26 = vshrl.u32 %v4222_v16, 16 }
 0xa5a   :  { %v4236_v48 = vpack.i.b16 %v4223_v30, %v4222_v16  ;;  %v4238_v42 = vshrl.u32 %v4223_v30, 16 }
 0xa5c   :  { %v4239_v28 = vpack.i.b16 %v4238_v42, %v4237_v26  ;;  %v4261_v20 = vperm.slane %v4236_v48, %v6397_v0 }
 0xa5d   :  { %v4118_v25 = vpop.f32.mrf.mxu3 }
 0xa5e   :  { %v4262_v41 = vrot.slane %v4261_v20, 4  ;;  %v4287_v33 = vperm.slane %v4239_v28, %v6397_v0  ;;  %v4265_v9 = vsel %vm639_vm1, %v4261_v20, %v4264_v49 }
 0xa5f   :  { %v4138_v38 = vpop.f32.mrf.mxu0  ;;  %v4156_v3 = vpop.f32.mrf.mxu1  ;;  %v4273_v53 = vperm.slane %v4265_v9, %v6407_v29 }
 0xa60   :  { %v4263_v61 = vsel %vm639_vm1, %v4262_v41, %v4256_v60  ;;  %v4288_v39 = vrot.slane %v4287_v33, 4  ;;  %v4291_v22 = vsel %vm639_vm1, %v4287_v33, %v4290_v23  ;;  %v4224_v13 = vpack.c.bf16 %v4156_v3, %v4156_v3 }
 0xa61   :  { %v4299_v14 = vperm.slane %v4291_v22, %v6407_v29  ;;  %v4269_v18 = vperm.slane %v4263_v61, %v6407_v29  ;;  %v4276_v63 = vrot.slane %v4273_v53, 4 }
 0xa62   :  { %v4289_v58 = vsel %vm639_vm1, %v4288_v39, %v4282_v56  ;;  %v4243_v47 = vshrl.u32 %v4224_v13, 16  ;;  %v4242_v57 = vpack.i.b16 %v4225_v7, %v4224_v13 }
 0xa63   :  { %v4295_v8 = vperm.slane %v4289_v58, %v6407_v29  ;;  %v4302_v40 = vrot.slane %v4299_v14, 4  ;;  %v4274_v32 = vrot.slane %v4269_v18, 4  ;;  %v4277_v51 = vsel %vm639_vm1, 0, %v4276_v63 }
 0xa64   :  { %v4245_v54 = vpack.i.b16 %v4244_v34, %v4243_v47  ;;  %v4308_v27 = vperm.slane %v4242_v57, %v6397_v0  ;;  %v4396_v26 = vrot.slane %v4277_v51, 4 }
 0xa65   :  { %v4300_v45 = vrot.slane %v4295_v8, 4  ;;  %v4303_v43 = vsel %vm639_vm1, 0, %v4302_v40  ;;  %v4275_v46 = vsel %vm639_vm1, 0, %v4274_v32 }
 0xa66   :  { %v4402_v37 = vrot.slane %v4303_v43, 4  ;;  %v4334_v16 = vperm.slane %v4245_v54, %v6397_v0  ;;  %v4356_v48 = vrot.slane %v4275_v46, 4  ;;  %v4316_v42 = vrot.slane %v4308_v27, 4 }
 0xa67   :  { %v4301_v35 = vsel %vm639_vm1, 0, %v4300_v45  ;;  %v4196_v4 = vpop.f32.mrf.mxu3  ;;  %v4216_v11 = vpop.f32.mrf.mxu0  ;;  %v4397_v39 = vsel %vm639_vm1, %v4396_v26, %v4273_v53 }
 0xa68   :  { %v4158_v36 = vpop.f32.mrf.mxu1  ;;  %v4362_v62 = vrot.slane %v4301_v35, 4  ;;  %v4226_v6 = vpack.c.bf16 %v4196_v4, %v4196_v4  ;;  %v4227_v5 = vpack.c.bf16 %v4216_v11, %v4216_v11  ;;  %v4403_v17 = vsel %vm639_vm1, %v4402_v37, %v4299_v14 }
 0xa69   :  { %v4407_v49 = vperm.slane %v4403_v17, %v6397_v0  ;;  %v4342_v25 = vrot.slane %v4334_v16, 4  ;;  %v4357_v3 = vsel %vm639_vm1, %v4356_v48, %v4269_v18  ;;  %v4401_v34 = vperm.slane %v4397_v39, %v6397_v0 }
 0xa6a   :  { %v4249_v30 = vshrl.u32 %v4226_v6, 16  ;;  %v4248_v2 = vpack.i.b16 %v4227_v5, %v4226_v6  ;;  %v4250_v60 = vshrl.u32 %v4227_v5, 16  ;;  %v4363_v56 = vsel %vm639_vm1, %v4362_v62, %v4295_v8 }
 0xa6b   :  { %v4367_v61 = vperm.slane %v4363_v56, %v6397_v0  ;;  %v4408_v58 = vrot.slane %v4407_v49, 4  ;;  %v4361_v32 = vperm.slane %v4357_v3, %v6397_v0 }
 0xa6c   :  { %v4251_v28 = vpack.i.b16 %v4250_v60, %v4249_v30  ;;  %v4313_v20 = vperm.slane %v4248_v2, %v6397_v0 }
 0xa6d   :  { %v4368_v53 = vrot.slane %v4367_v61, 4  ;;  %v4409_v37 = vsel %vm639_vm1, %v4408_v58, %v4401_v34 }
 0xa6e   :  { %v4314_v33 = vrot.slane %v4313_v20, 4  ;;  %v4317_v9 = vsel %vm639_vm1, %v4313_v20, %v4316_v42  ;;  %v4339_v38 = vperm.slane %v4251_v28, %v6397_v0 }
 0xa6f   :  { %v4198_v23 = vpop.f32.mrf.mxu3  ;;  %v4218_v41 = vpop.f32.mrf.mxu0  ;;  %v4325_v22 = vperm.slane %v4317_v9, %v6407_v29  ;;  %v4369_v6 = vsel %vm639_vm1, %v4368_v53, %v4361_v32 }
 0xa70   :  { %v4315_v7 = vsel %vm639_vm1, %v4314_v33, %v4308_v27  ;;  %v4340_v14 = vrot.slane %v4339_v38, 4  ;;  %v4343_v13 = vsel %vm639_vm1, %v4339_v38, %v4342_v25  ;;  %v4373_v30 = vperm.slane %v4369_v6, %v6407_v29 }
 0xa71   :  { %v4321_v8 = vperm.slane %v4315_v7, %v6407_v29  ;;  %v4328_v40 = vrot.slane %v4325_v22, 4  ;;  %v4351_v47 = vperm.slane %v4343_v13, %v6407_v29 }
 0xa72   :  { %v4341_v45 = vsel %vm639_vm1, %v4340_v14, %v4334_v16  ;;  %v4413_v16 = vperm.slane %v4409_v37, %v6407_v29  ;;  %v4374_v25 = vrot.slane %v4373_v30, 4 }
 0xa73   :  { %v4326_v43 = vrot.slane %v4321_v8, 4  ;;  %v4329_v63 = vsel %vm639_vm1, 0, %v4328_v40  ;;  %v4347_v18 = vperm.slane %v4341_v45, %v6407_v29  ;;  %v4354_v57 = vrot.slane %v4351_v47, 4 }
 0xa74   :  { %v4416_v35 = vrot.slane %v4329_v63, 4  ;;  %v4414_v42 = vrot.slane %v4413_v16, 4  ;;  %v4451_v33 = vshrl.u32 %v4413_v16, 16  ;;  %v4375_v3 = vsel %vm639_vm1, 0, %v4374_v25 }
 0xa75   :  { %v4327_v54 = vsel %vm639_vm1, 0, %v4326_v43  ;;  %v4352_v4 = vrot.slane %v4347_v18, 4  ;;  %v4355_v11 = vsel %vm639_vm1, 0, %v4354_v57  ;;  %v4445_v43 = vshrl.u32 %v4375_v3, 16 }
 0xa76   :  { %v4376_v36 = vrot.slane %v4327_v54, 4  ;;  %v4422_v62 = vrot.slane %v4355_v11, 4  ;;  %v4417_v5 = vsel %vm639_vm1, %v4416_v35, %v4325_v22  ;;  %v4415_v61 = vsel %vm639_vm1, 0, %v4414_v42 }
 0xa77   :  { %v4353_v51 = vsel %vm639_vm1, 0, %v4352_v4  ;;  %v4421_v56 = vperm.slane %v4417_v5, %v6397_v0  ;;  %v4439_v22 = vshrl.u32 %v4373_v30, 16  ;;  %v4457_v40 = vshrl.u32 %v4415_v61, 16 }
 0xa78   :  { %v4382_v27 = vrot.slane %v4353_v51, 4  ;;  %v4423_v46 = vsel %vm639_vm1, %v4422_v62, %v4351_v47  ;;  %v4377_v2 = vsel %vm639_vm1, %v4376_v36, %v4321_v8 }
 0xa79   :  { %v4427_v17 = vperm.slane %v4423_v46, %v6397_v0  ;;  %v4381_v28 = vperm.slane %v4377_v2, %v6397_v0  ;;  %v5372_v46 = vld [vmem:[#allocation20 + $0x8] sm:$0xff] }
 0xa7a   :  { %v4383_v60 = vsel %vm639_vm1, %v4382_v27, %v4347_v18  ;;  %4513 = vmatpush.bf16.msrb.mxu1 %v5372_v46 }
 0xa7b   :  { %v4428_v26 = vrot.slane %v4427_v17, 4  ;;  %v4387_v48 = vperm.slane %v4383_v60, %v6397_v0 }
 0xa7d   :  { %v4388_v20 = vrot.slane %v4387_v48, 4  ;;  %v4429_v49 = vsel %vm639_vm1, %v4428_v26, %v4421_v56  ;;  %v5452_v48 = vld [vmem:[#allocation22] ss:$0 sm:$0xff] }
 0xa7e   :  { %v4433_v23 = vperm.slane %v4429_v49, %v6407_v29 }
 0xa7f   :  { %v4389_v41 = vsel %vm639_vm1, %v4388_v20, %v4381_v28 }
 0xa80   :  { %v4393_v9 = vperm.slane %v4389_v41, %v6407_v29  ;;  %v4452_v38 = vshrl.u32 %v4433_v23, 16  ;;  %v4434_v39 = vrot.slane %v4433_v23, 4  ;;  %v4450_v7 = vpack.i.b16 %v4433_v23, %v4413_v16  ;;  %v5371_v16 = vld [vmem:[#allocation20] sm:$0xff] }
 0xa81   :  { %4514 = vmatpush.bf16.msrb.mxu1 %v5371_v16 }
 0xa82   :  { %v4440_v0 = vshrl.u32 %v4393_v9, 16  ;;  %v4453_v14 = vpack.i.b16 %v4452_v38, %v4451_v33  ;;  %v4394_v13 = vrot.slane %v4393_v9, 4  ;;  %v4435_v58 = vsel %vm639_vm1, 0, %v4434_v39 }
 0xa83   :  { %v4456_v8 = vpack.i.b16 %v4435_v58, %v4415_v61  ;;  %v4458_v47 = vshrl.u32 %v4435_v58, 16  ;;  %v4438_v34 = vpack.i.b16 %v4393_v9, %v4373_v30  ;;  %v4461_v35 = vunpack.c.l.b16 %v4450_v7 }
 0xa84   :  { %v4441_v45 = vpack.i.b16 %v4440_v0, %v4439_v22  ;;  %v4395_v29 = vsel %vm639_vm1, 0, %v4394_v13  ;;  %v4464_v32 = vunpack.c.l.b16 %v4453_v14 }
 0xa85   :  { %v4444_v53 = vpack.i.b16 %v4395_v29, %v4375_v3  ;;  %v4446_v63 = vshrl.u32 %v4395_v29, 16  ;;  %v4459_v18 = vpack.i.b16 %v4458_v47, %v4457_v40  ;;  %v4460_v54 = vunpack.c.l.b16 %v4438_v34 }
 0xa86   :  { %v4463_v57 = vunpack.c.l.b16 %v4441_v45  ;;  %v4469_v11 = vunpack.c.l.b16 %v4456_v8 }
 0xa87   :  { %v4468_v4 = vunpack.c.l.b16 %v4444_v53  ;;  %v4447_v37 = vpack.i.b16 %v4446_v63, %v4445_v43  ;;  %v4462_v62 = vpack.c.b16 %v4461_v35, %v4460_v54  ;;  %v4474_v27 = vunpack.c.l.b16 %v4459_v18 }
 0xa88   :  { %v4465_v36 = vpack.c.b16 %v4464_v32, %v4463_v57 }
 0xa89   :  { %v4470_v6 = vpack.c.b16 %v4469_v11, %v4468_v4  ;;  %v4473_v51 = vunpack.c.l.b16 %v4447_v37 }
 0xa8a   :  { %4466 = vrot.lane.b32.xlu0 %v4465_v36, %s6028_s6 }
 0xa8b   :  { %4471 = vrot.lane.b32.xlu2 %v4470_v6, %s6029_s21  ;;  %v4475_v5 = vpack.c.b16 %v4474_v27, %v4473_v51 }
 0xa8d   :  { %4476 = vrot.lane.b32.xlu1 %v4475_v5, %s6030_s12 }
 0xae5   :  { %v4472_v30 = vpop.permute.xlu2 %4471 }
 0xafc   :  { %v4467_v17 = vpop.permute.xlu0 %4466 }
 0xafd   :  { %v4480_v2 = vsel %vm1321_vm2, %v4462_v62, %v4467_v17 }
 0xafe   :  { %v4482_v60 = vsel %vm1984_vm4, %v4480_v2, %v4472_v30  ;;  %vm4883_vm4 = vcmask 523264  }
 0xaff   :  { %v4477_v56 = vpop.permute.xlu1 %4476 }
 0xb00   :  { %v4484_v26 = vsel %vm1987_vm5, %v4482_v60, %v4477_v56 }
 0xb01   :  { %5330 = vmatmul.msk.bf16.vlgmr.msrb.gmra.mxu1 %vm471_vm0, %v4484_v26 }
 0xb7e   :  { %v4516_v42 = vpop.f32.mrf.mxu1 }
 0xb7f   :  { %v4517_v28 = vadd.f32 %v5452_v48, %v4516_v42  ;;  %v5374_v42 = vld [vmem:[#allocation23 + $0x8] sm:$0xff] }
 0xb80   :  { %4836 = vmatpush.bf16.msrb.mxu2 %v5374_v42 }
 0xb81   :  { %v4523_v20 = vrot.slane %v4517_v28, 2  ;;  %v4524_v49 = vrot.slane %v4517_v28, 4  ;;  %v4525_v25 = vrot.slane %v4517_v28, 6  ;;  %v4535_v23 = vadd.f32 %v4517_v28, %v6936_v21 }
 0xb83   :  { %v4536_v41 = vadd.f32 %v4523_v20, %v6940_v10  ;;  %v4537_v33 = vadd.f32 %v4524_v49, %v6944_v24  ;;  %v4538_v9 = vadd.f32 %v4525_v25, %v6948_v44  ;;  %4551 = vst [vmem:[#allocation1] ss:$4 sm:$0xff] %v4535_v23  ;;  %v5373_v25 = vld [vmem:[#allocation23] sm:$0xff] }
 0xb84   :  { %4837 = vmatpush.bf16.msrb.mxu2 %v5373_v25 }
 0xb85   :  { %4553 = vst [vmem:[#allocation1 + $0x1] ss:$4 sm:$0xff] %v4536_v41 }
 0xb86   :  { %4555 = vst [vmem:[#allocation1 + $0x2] ss:$4 sm:$0xff] %v4537_v33  ;;  %v4518_v38 = vpop.f32.mrf.mxu1 }
 0xb87   :  { %4557 = vst [vmem:[#allocation1 + $0x3] ss:$4 sm:$0xff] %v4538_v9  ;;  %v4519_v61 = vadd.f32 %v5452_v48, %v4518_v38 }
 0xb89   :  { %v4526_v39 = vrot.slane %v4519_v61, 2  ;;  %v4527_v22 = vrot.slane %v4519_v61, 4  ;;  %v4528_v3 = vrot.slane %v4519_v61, 6  ;;  %v4539_v7 = vadd.f32 %v4519_v61, %v6977_v12  ;;  %v5454_v61 = vld [vmem:[%s6180_s3] ss:$0 sm:$0xff]  ;;  %s8053_s3 = sld [smem:[#allocation47_spill]] }
 0xb8b   :  { %v4540_v0 = vadd.f32 %v4526_v39, %v6985_v31  ;;  %v4541_v21 = vadd.f32 %v4527_v22, %v6990_v52  ;;  %v4542_v10 = vadd.f32 %v4528_v3, %v6996_v50  ;;  %4559 = vst [vmem:[#allocation1 + $0x20] ss:$4 sm:$0xff] %v4539_v7 }
 0xb8d   :  { %4561 = vst [vmem:[#allocation1 + $0x21] ss:$4 sm:$0xff] %v4540_v0 }
 0xb8e   :  { %4563 = vst [vmem:[#allocation1 + $0x22] ss:$4 sm:$0xff] %v4541_v21  ;;  %v4566_v24 = vld.sshfl [vmem:[#allocation1] sm:$0xff pattern:$0x73625140] }
 0xb8f   :  { %4565 = vst [vmem:[#allocation1 + $0x23] ss:$4 sm:$0xff] %v4542_v10  ;;  %v4570_v44 = vsel %vm471_vm0, %v4566_v24, 0.0  ;;  %v5375_v25 = vld [vmem:[%s8053_s3] sm:$0xff] }
 0xb90   :  { %4571 = vadd.xlane.f32.xlu0 %v4570_v44 }
 0xb96   :  { %v4567_v14 = vld.sshfl [vmem:[#allocation1 + $0x20] sm:$0xff pattern:$0x73625140] }
 0xb97   :  { %v4573_v13 = vsel %vm471_vm0, %v4567_v14, 0.0 }
 0xb98   :  { %4574 = vadd.xlane.f32.xlu2 %v4573_v13 }
 0xc03   :  { %v4572_v58 = vpop.xlane.xlu0 %4571 }
 0xc04   :  { %v4576_v12 = vmul.f32 %v4572_v58, %v6854_v15  ;;  %v4765_v58 = vrot.slane %v5454_v61, 2 }
 0xc06   :  { %v4583_v31 = vperm.slane %v4576_v12, %v6856_v59  ;;  %v4587_v52 = vperm.slane %v4576_v12, %v6858_v55  ;;  %v4591_v50 = vperm.slane %v4576_v12, %v6860_v19  ;;  %v4595_v8 = vperm.slane %v4576_v12, %v6862_v1 }
 0xc07   :  { %v4766_v12 = vrot.slane %v5454_v61, 4 }
 0xc08   :  { %v7876_v40 = vsub.f32 %v4535_v23, %v4583_v31  ;;  %v7878_v47 = vsub.f32 %v4536_v41, %v4587_v52  ;;  %v7880_v34 = vsub.f32 %v4537_v33, %v4591_v50  ;;  %v7882_v45 = vsub.f32 %v4538_v9, %v4595_v8  ;;  %v5453_v33 = vld [vmem:[#allocation26] ss:$0 sm:$0xff] }
 0xc09   :  { %v4747_v3 = vrot.slane %v5453_v33, 2 }
 0xc0a   :  { %v4628_v29 = vmul.f32 %v7876_v40, %v7876_v40  ;;  %v4629_v53 = vmul.f32 %v7878_v47, %v7878_v47  ;;  %v4630_v43 = vmul.f32 %v7880_v34, %v7880_v34  ;;  %v4631_v63 = vmul.f32 %v7882_v45, %v7882_v45 }
 0xc0b   :  { %v4575_v18 = vpop.xlane.xlu2 %4574 }
 0xc0c   :  { %4644 = vst [vmem:[#allocation1] ss:$4 sm:$0xff] %v4628_v29  ;;  %v4577_v57 = vmul.f32 %v4575_v18, %v6854_v15 }
 0xc0d   :  { %4646 = vst [vmem:[#allocation1 + $0x1] ss:$4 sm:$0xff] %v4629_v53  ;;  %v4767_v53 = vrot.slane %v5454_v61, 6 }
 0xc0e   :  { %4648 = vst [vmem:[#allocation1 + $0x2] ss:$4 sm:$0xff] %v4630_v43  ;;  %v4599_v32 = vperm.slane %v4577_v57, %v6856_v59  ;;  %v4603_v35 = vperm.slane %v4577_v57, %v6858_v55  ;;  %v4607_v54 = vperm.slane %v4577_v57, %v6860_v19  ;;  %v4611_v4 = vperm.slane %v4577_v57, %v6862_v1 }
 0xc0f   :  { %4650 = vst [vmem:[#allocation1 + $0x3] ss:$4 sm:$0xff] %v4631_v63 }
 0xc10   :  { %v7897_v11 = vsub.f32 %v4539_v7, %v4599_v32  ;;  %v7899_v37 = vsub.f32 %v4540_v0, %v4603_v35  ;;  %v7901_v36 = vsub.f32 %v4541_v21, %v4607_v54  ;;  %v7903_v62 = vsub.f32 %v4542_v10, %v4611_v4 }
 0xc11   :  { %v4748_v7 = vrot.slane %v5453_v33, 4  ;;  %v4749_v0 = vrot.slane %v5453_v33, 6 }
 0xc12   :  { %v4632_v6 = vmul.f32 %v7897_v11, %v7897_v11  ;;  %v4633_v51 = vmul.f32 %v7899_v37, %v7899_v37  ;;  %v4634_v27 = vmul.f32 %v7901_v36, %v7901_v36  ;;  %v4635_v5 = vmul.f32 %v7903_v62, %v7903_v62 }
 0xc14   :  { %4652 = vst [vmem:[#allocation1 + $0x20] ss:$4 sm:$0xff] %v4632_v6 }
 0xc15   :  { %4654 = vst [vmem:[#allocation1 + $0x21] ss:$4 sm:$0xff] %v4633_v51 }
 0xc16   :  { %4656 = vst [vmem:[#allocation1 + $0x22] ss:$4 sm:$0xff] %v4634_v27  ;;  %v4659_v46 = vld.sshfl [vmem:[#allocation1] sm:$0xff pattern:$0x73625140] }
 0xc17   :  { %4658 = vst [vmem:[#allocation1 + $0x23] ss:$4 sm:$0xff] %v4635_v5  ;;  %v4663_v16 = vsel %vm471_vm0, %v4659_v46, 0.0 }
 0xc18   :  { %4664 = vadd.xlane.f32.xlu1 %v4663_v16 }
 0xc1e   :  { %v4660_v17 = vld.sshfl [vmem:[#allocation1 + $0x20] sm:$0xff pattern:$0x73625140] }
 0xc1f   :  { %v4666_v30 = vsel %vm471_vm0, %v4660_v17, 0.0 }
 0xc20   :  { %4667 = vadd.xlane.f32.xlu0 %v4666_v30 }
 0xc8b   :  { %v4665_v2 = vpop.xlane.xlu1 %4664 }
 0xc8c   :  { %v4669_v60 = vmul.f32 %v4665_v2, %v6854_v15 }
 0xc8e   :  { %v4671_v56 = vadd.f32 1e-05, %v4669_v60 }
 0xc90   :  { %5529 = vrsqrt.f32 %v4671_v56  ;;  %vm4679_vm14 = vweird.f32 %v4671_v56 }
 0xc93   :  { %v4668_v26 = vpop.xlane.xlu0 %4667 }
 0xc94   :  { %v4670_v48 = vmul.f32 %v4668_v26, %v6854_v15 }
 0xc96   :  { %v5530_v28 = vpop.eup %5529  ;;  %v4672_v20 = vadd.f32 1e-05, %v4670_v48 }
 0xc97   :  { %v4674_v49 = vmul.f32 %v5530_v28, %v4671_v56  ;;  %vm4680_vm13 = vweird.f32 %v5530_v28 }
 0xc98   :  { %5531 = vrsqrt.f32 %v4672_v20  ;;  %vm4681_vm15 = vmor %vm4679_vm14, %vm4680_vm13  ;;  %vm4689_vm2 = vweird.f32 %v4672_v20 }
 0xc99   :  { %v4675_v23 = vmul.f32 %v5530_v28, %v4674_v49  ;;  %v5376_v49 = vld [vmem:[%s8053_s3 + $0x8] sm:$0xff] }
 0xc9b   :  { %v4676_v41 = vmul.f32 0.5, %v4675_v23 }
 0xc9d   :  { %v4677_v9 = vsub.f32 1.5, %v4676_v41  ;;  %v5455_v41 = vld [vmem:[#allocation25] ss:$0 sm:$0xff] }
 0xc9e   :  { %v5532_v38 = vpop.eup %5531 }
 0xc9f   :  { %v4678_v39 = vmul.f32 %v5530_v28, %v4677_v9  ;;  %v4684_v22 = vmul.f32 %v5532_v38, %v4672_v20  ;;  %vm4690_vm1 = vweird.f32 %v5532_v38  ;;  %v5377_v20 = vld [vmem:[%s8053_s3 + $0x10] sm:$0xff] }
 0xca0   :  { %vm4691_vm3 = vmor %vm4689_vm2, %vm4690_vm1 }
 0xca1   :  { %v4682_v21 = vsel %vm4681_vm15, %v5530_v28, %v4678_v39  ;;  %v4685_v10 = vmul.f32 %v5532_v38, %v4684_v22 }
 0xca2   :  { %v4698_v24 = vperm.slane %v4682_v21, %v6856_v59  ;;  %v4702_v44 = vperm.slane %v4682_v21, %v6858_v55  ;;  %v4706_v14 = vperm.slane %v4682_v21, %v6860_v19  ;;  %v4710_v13 = vperm.slane %v4682_v21, %v6862_v1 }
 0xca3   :  { %v4686_v31 = vmul.f32 0.5, %v4685_v10 }
 0xca4   :  { %v4735_v52 = vmul.f32 %v4698_v24, %v7876_v40  ;;  %v4736_v50 = vmul.f32 %v4702_v44, %v7878_v47  ;;  %v4737_v8 = vmul.f32 %v4706_v14, %v7880_v34  ;;  %v4738_v29 = vmul.f32 %v4710_v13, %v7882_v45 }
 0xca5   :  { %v4687_v43 = vsub.f32 1.5, %v4686_v31 }
 0xca6   :  { %v4753_v63 = vmul.f32 %v5453_v33, %v4735_v52  ;;  %v4754_v18 = vmul.f32 %v4747_v3, %v4736_v50  ;;  %v4755_v57 = vmul.f32 %v4748_v7, %v4737_v8  ;;  %v4756_v32 = vmul.f32 %v4749_v0, %v4738_v29 }
 0xca7   :  { %v4688_v35 = vmul.f32 %v5532_v38, %v4687_v43 }
 0xca8   :  { %v4771_v54 = vadd.f32 %v5454_v61, %v4753_v63  ;;  %v4772_v4 = vadd.f32 %v4765_v58, %v4754_v18  ;;  %v4773_v6 = vadd.f32 %v4766_v12, %v4755_v57  ;;  %v4774_v40 = vadd.f32 %v4767_v53, %v4756_v32 }
 0xca9   :  { %v4692_v51 = vsel %vm4691_vm3, %v5532_v38, %v4688_v35 }
 0xcaa   :  { %4787 = vst [vmem:[#allocation1] ss:$4 sm:$0xff] %v4771_v54  ;;  %v4714_v47 = vperm.slane %v4692_v51, %v6856_v59  ;;  %v4718_v34 = vperm.slane %v4692_v51, %v6858_v55  ;;  %v4722_v45 = vperm.slane %v4692_v51, %v6860_v19  ;;  %v4726_v27 = vperm.slane %v4692_v51, %v6862_v1 }
 0xcab   :  { %4789 = vst [vmem:[#allocation1 + $0x1] ss:$4 sm:$0xff] %v4772_v4 }
 0xcac   :  { %4791 = vst [vmem:[#allocation1 + $0x2] ss:$4 sm:$0xff] %v4773_v6  ;;  %v4739_v5 = vmul.f32 %v4714_v47, %v7897_v11  ;;  %v4740_v46 = vmul.f32 %v4718_v34, %v7899_v37  ;;  %v4741_v16 = vmul.f32 %v4722_v45, %v7901_v36  ;;  %v4742_v17 = vmul.f32 %v4726_v27, %v7903_v62  ;;  %v5378_v62 = vld [vmem:[%s8053_s3 + $0x18] sm:$0xff] }
 0xcad   :  { %4793 = vst [vmem:[#allocation1 + $0x3] ss:$4 sm:$0xff] %v4774_v40  ;;  %4891 = vmatpush.bf16.msra.mxu3 %v5378_v62 }
 0xcae   :  { %v4757_v30 = vmul.f32 %v5453_v33, %v4739_v5  ;;  %v4758_v2 = vmul.f32 %v4747_v3, %v4740_v46  ;;  %v4759_v60 = vmul.f32 %v4748_v7, %v4741_v16  ;;  %v4760_v56 = vmul.f32 %v4749_v0, %v4742_v17  ;;  %v5456_v3 = vld [vmem:[%s8054_s24] ss:$0 sm:$0xff] }
 0xcb0   :  { %v4775_v26 = vadd.f32 %v5454_v61, %v4757_v30  ;;  %v4776_v48 = vadd.f32 %v4765_v58, %v4758_v2  ;;  %v4777_v42 = vadd.f32 %v4766_v12, %v4759_v60  ;;  %v4778_v28 = vadd.f32 %v4767_v53, %v4760_v56 }
 0xcb1   :  { %4892 = vmatpush.bf16.msra.mxu3 %v5377_v20 }
 0xcb2   :  { %4795 = vst [vmem:[#allocation1 + $0x20] ss:$4 sm:$0xff] %v4775_v26 }
 0xcb3   :  { %4797 = vst [vmem:[#allocation1 + $0x21] ss:$4 sm:$0xff] %v4776_v48 }
 0xcb4   :  { %4799 = vst [vmem:[#allocation1 + $0x22] ss:$4 sm:$0xff] %v4777_v42  ;;  %v4802_v11 = vld.sshfl [vmem:[#allocation1] sm:$0xff pattern:$0x73625140] }
 0xcb5   :  { %4801 = vst [vmem:[#allocation1 + $0x23] ss:$4 sm:$0xff] %v4778_v28  ;;  %4893 = vmatpush.bf16.msra.mxu3 %v5376_v49 }
 0xcb9   :  { %4894 = vmatpush.bf16.msra.mxu3 %v5375_v25 }
 0xcbc   :  { %v4803_v37 = vld.sshfl [vmem:[#allocation1 + $0x20] sm:$0xff pattern:$0x73625140] }
 0xcbd   :  { %v4806_v36 = vpack.c.bf16 %v4803_v37, %v4802_v11 }
 0xcbf   :  { %5339 = vmatmul.msk.bf16.vlgmr.msrb.gmra.mxu2 %vm471_vm0, %v4806_v36 }
 0xd42   :  { %v4839_v23 = vpop.f32.mrf.mxu2 }
 0xd43   :  { %v4840_v33 = vadd.f32 %v5455_v41, %v4839_v23 }
 0xd45   :  { %v4844_v61 = vmax.f32 %v4840_v33, 0.0 }
 0xd4a   :  { %v4841_v9 = vpop.f32.mrf.mxu2 }
 0xd4b   :  { %v4842_v38 = vadd.f32 %v5455_v41, %v4841_v9 }
 0xd4d   :  { %v4845_v39 = vmax.f32 %v4842_v38, 0.0 }
 0xd4f   :  { %v4846_v22 = vpack.c.bf16 %v4845_v39, %v4844_v61 }
 0xd51   :  { %5356 = vmatmul.msk.bf16.vlgmr.msra.gmra.mxu3 %vm4883_vm4, %v4846_v22 }
 0xdd4   :  { %v4896_v7 = vpop.f32.mrf.mxu3 }
 0xdd5   :  { %v4897_v0 = vadd.f32 %v5456_v3, %v4896_v7 }
 0xdd7   :  { %v4903_v21 = vrot.slane %v4897_v0, 2  ;;  %v4904_v10 = vrot.slane %v4897_v0, 4  ;;  %v4905_v24 = vrot.slane %v4897_v0, 6  ;;  %v4915_v44 = vadd.f32 %v4897_v0, %v4771_v54 }
 0xdd9   :  { %v4916_v14 = vadd.f32 %v4903_v21, %v4772_v4  ;;  %v4917_v13 = vadd.f32 %v4904_v10, %v4773_v6  ;;  %v4918_v58 = vadd.f32 %v4905_v24, %v4774_v40  ;;  %4931 = vst [vmem:[#allocation1] ss:$4 sm:$0xff] %v4915_v44 }
 0xddb   :  { %4933 = vst [vmem:[#allocation1 + $0x1] ss:$4 sm:$0xff] %v4916_v14 }
 0xddc   :  { %4935 = vst [vmem:[#allocation1 + $0x2] ss:$4 sm:$0xff] %v4917_v13  ;;  %v4898_v12 = vpop.f32.mrf.mxu3 }
 0xddd   :  { %4937 = vst [vmem:[#allocation1 + $0x3] ss:$4 sm:$0xff] %v4918_v58  ;;  %v4899_v31 = vadd.f32 %v5456_v3, %v4898_v12 }
 0xddf   :  { %v4906_v52 = vrot.slane %v4899_v31, 2  ;;  %v4907_v50 = vrot.slane %v4899_v31, 4  ;;  %v4908_v8 = vrot.slane %v4899_v31, 6  ;;  %v4919_v29 = vadd.f32 %v4899_v31, %v4775_v26 }
 0xde1   :  { %v4920_v53 = vadd.f32 %v4906_v52, %v4776_v48  ;;  %v4921_v43 = vadd.f32 %v4907_v50, %v4777_v42  ;;  %v4922_v63 = vadd.f32 %v4908_v8, %v4778_v28  ;;  %4939 = vst [vmem:[#allocation1 + $0x20] ss:$4 sm:$0xff] %v4919_v29 }
 0xde3   :  { %4941 = vst [vmem:[#allocation1 + $0x21] ss:$4 sm:$0xff] %v4920_v53 }
 0xde4   :  { %4943 = vst [vmem:[#allocation1 + $0x22] ss:$4 sm:$0xff] %v4921_v43  ;;  %v4946_v18 = vld.sshfl [vmem:[#allocation1] sm:$0xff pattern:$0x73625140] }
 0xde5   :  { %4945 = vst [vmem:[#allocation1 + $0x23] ss:$4 sm:$0xff] %v4922_v63  ;;  %v4950_v57 = vsel %vm471_vm0, %v4946_v18, 0.0 }
 0xde6   :  { %4951 = vadd.xlane.f32.xlu2 %v4950_v57 }
 0xdec   :  { %v4947_v32 = vld.sshfl [vmem:[#allocation1 + $0x20] sm:$0xff pattern:$0x73625140] }
 0xded   :  { %v4953_v35 = vsel %vm471_vm0, %v4947_v32, 0.0 }
 0xdee   :  { %4954 = vadd.xlane.f32.xlu0 %v4953_v35 }
 0xe59   :  { %v4952_v54 = vpop.xlane.xlu2 %4951 }
 0xe5a   :  { %v4956_v4 = vmul.f32 %v4952_v54, %v6854_v15 }
 0xe5c   :  { %v4963_v6 = vperm.slane %v4956_v4, %v6856_v59  ;;  %v4967_v40 = vperm.slane %v4956_v4, %v6858_v55  ;;  %v4971_v51 = vperm.slane %v4956_v4, %v6860_v19  ;;  %v4975_v47 = vperm.slane %v4956_v4, %v6862_v1 }
 0xe5e   :  { %v7947_v34 = vsub.f32 %v4915_v44, %v4963_v6  ;;  %v7949_v45 = vsub.f32 %v4916_v14, %v4967_v40  ;;  %v7951_v27 = vsub.f32 %v4917_v13, %v4971_v51  ;;  %v7953_v5 = vsub.f32 %v4918_v58, %v4975_v47  ;;  %v5457_v44 = vld [vmem:[%s6185_s5] ss:$0 sm:$0xff]  ;;  %s6036_s5 = smov [#allocation28]  }
 0xe5f   :  { %v5458_v58 = vld [vmem:[%s6190_s14] ss:$0 sm:$0xff]  ;;  %v5127_v52 = vrot.slane %v5457_v44, 2  ;;  %v5128_v50 = vrot.slane %v5457_v44, 4  ;;  %v5129_v8 = vrot.slane %v5457_v44, 6  ;;  %s5172_s14 = sshll.u32 %s6036_s5, 4  ;;  %s5173_s14 = int_to_ptr.vmem [resolvable:$true] %s5172_s14 }
 0xe60   :  { %v5008_v46 = vmul.f32 %v7947_v34, %v7947_v34  ;;  %v5009_v16 = vmul.f32 %v7949_v45, %v7949_v45  ;;  %v5010_v17 = vmul.f32 %v7951_v27, %v7951_v27  ;;  %v5011_v30 = vmul.f32 %v7953_v5, %v7953_v5 }
 0xe61   :  { %v4955_v2 = vpop.xlane.xlu0 %4954  ;;  %v5145_v57 = vrot.slane %v5458_v58, 2  ;;  %v5146_v32 = vrot.slane %v5458_v58, 4  ;;  %v5147_v51 = vrot.slane %v5458_v58, 6 }
 0xe62   :  { %5024 = vst [vmem:[#allocation1] ss:$4 sm:$0xff] %v5008_v46  ;;  %v4957_v60 = vmul.f32 %v4955_v2, %v6854_v15 }
 0xe63   :  { %5026 = vst [vmem:[#allocation1 + $0x1] ss:$4 sm:$0xff] %v5009_v16 }
 0xe64   :  { %5028 = vst [vmem:[#allocation1 + $0x2] ss:$4 sm:$0xff] %v5010_v17  ;;  %v4979_v56 = vperm.slane %v4957_v60, %v6856_v59  ;;  %v4983_v26 = vperm.slane %v4957_v60, %v6858_v55  ;;  %v4987_v48 = vperm.slane %v4957_v60, %v6860_v19  ;;  %v4991_v42 = vperm.slane %v4957_v60, %v6862_v1 }
 0xe65   :  { %5030 = vst [vmem:[#allocation1 + $0x3] ss:$4 sm:$0xff] %v5011_v30 }
 0xe66   :  { %v7968_v28 = vsub.f32 %v4919_v29, %v4979_v56  ;;  %v7970_v11 = vsub.f32 %v4920_v53, %v4983_v26  ;;  %v7972_v37 = vsub.f32 %v4921_v43, %v4987_v48  ;;  %v7974_v36 = vsub.f32 %v4922_v63, %v4991_v42 }
 0xe68   :  { %v5012_v62 = vmul.f32 %v7968_v28, %v7968_v28  ;;  %v5013_v20 = vmul.f32 %v7970_v11, %v7970_v11  ;;  %v5014_v49 = vmul.f32 %v7972_v37, %v7972_v37  ;;  %v5015_v25 = vmul.f32 %v7974_v36, %v7974_v36 }
 0xe6a   :  { %5032 = vst [vmem:[#allocation1 + $0x20] ss:$4 sm:$0xff] %v5012_v62 }
 0xe6b   :  { %5034 = vst [vmem:[#allocation1 + $0x21] ss:$4 sm:$0xff] %v5013_v20 }
 0xe6c   :  { %5036 = vst [vmem:[#allocation1 + $0x22] ss:$4 sm:$0xff] %v5014_v49  ;;  %v5039_v23 = vld.sshfl [vmem:[#allocation1] sm:$0xff pattern:$0x73625140] }
 0xe6d   :  { %5038 = vst [vmem:[#allocation1 + $0x23] ss:$4 sm:$0xff] %v5015_v25  ;;  %v5043_v41 = vsel %vm471_vm0, %v5039_v23, 0.0 }
 0xe6e   :  { %5044 = vadd.xlane.f32.xlu1 %v5043_v41 }
 0xe74   :  { %v5040_v33 = vld.sshfl [vmem:[#allocation1 + $0x20] sm:$0xff pattern:$0x73625140] }
 0xe75   :  { %v5046_v9 = vsel %vm471_vm0, %v5040_v33, 0.0 }
 0xe76   :  { %5047 = vadd.xlane.f32.xlu2 %v5046_v9 }
 0xee1   :  { %v5045_v38 = vpop.xlane.xlu1 %5044 }
 0xee2   :  { %v5049_v61 = vmul.f32 %v5045_v38, %v6854_v15 }
 0xee4   :  { %v5051_v39 = vadd.f32 1e-05, %v5049_v61 }
 0xee6   :  { %5533 = vrsqrt.f32 %v5051_v39  ;;  %vm5059_vm0 = vweird.f32 %v5051_v39 }
 0xee9   :  { %v5048_v22 = vpop.xlane.xlu2 %5047 }
 0xeea   :  { %v5050_v3 = vmul.f32 %v5048_v22, %v6854_v15 }
 0xeec   :  { %v5534_v7 = vpop.eup %5533  ;;  %v5052_v0 = vadd.f32 1e-05, %v5050_v3 }
 0xeed   :  { %v5054_v21 = vmul.f32 %v5534_v7, %v5051_v39  ;;  %vm5060_vm5 = vweird.f32 %v5534_v7 }
 0xeee   :  { %5535 = vrsqrt.f32 %v5052_v0  ;;  %vm5061_vm6 = vmor %vm5059_vm0, %vm5060_vm5  ;;  %vm5069_vm9 = vweird.f32 %v5052_v0 }
 0xeef   :  { %v5055_v10 = vmul.f32 %v5534_v7, %v5054_v21 }
 0xef1   :  { %v5056_v24 = vmul.f32 0.5, %v5055_v10 }
 0xef3   :  { %v5057_v14 = vsub.f32 1.5, %v5056_v24 }
 0xef4   :  { %v5536_v13 = vpop.eup %5535 }
 0xef5   :  { %v5058_v12 = vmul.f32 %v5534_v7, %v5057_v14  ;;  %v5064_v31 = vmul.f32 %v5536_v13, %v5052_v0  ;;  %vm5070_vm7 = vweird.f32 %v5536_v13 }
 0xef6   :  { %vm5071_vm10 = vmor %vm5069_vm9, %vm5070_vm7 }
 0xef7   :  { %v5062_v29 = vsel %vm5061_vm6, %v5534_v7, %v5058_v12  ;;  %v5065_v15 = vmul.f32 %v5536_v13, %v5064_v31 }
 0xef8   :  { %v5078_v53 = vperm.slane %v5062_v29, %v6856_v59  ;;  %v5082_v43 = vperm.slane %v5062_v29, %v6858_v55  ;;  %v5086_v63 = vperm.slane %v5062_v29, %v6860_v19  ;;  %v5090_v18 = vperm.slane %v5062_v29, %v6862_v1 }
 0xef9   :  { %v5066_v35 = vmul.f32 0.5, %v5065_v15 }
 0xefa   :  { %v5115_v54 = vmul.f32 %v5078_v53, %v7947_v34  ;;  %v5116_v4 = vmul.f32 %v5082_v43, %v7949_v45  ;;  %v5117_v6 = vmul.f32 %v5086_v63, %v7951_v27  ;;  %v5118_v40 = vmul.f32 %v5090_v18, %v7953_v5 }
 0xefb   :  { %v5067_v47 = vsub.f32 1.5, %v5066_v35 }
 0xefc   :  { %v5133_v46 = vmul.f32 %v5457_v44, %v5115_v54  ;;  %v5134_v16 = vmul.f32 %v5127_v52, %v5116_v4  ;;  %v5135_v17 = vmul.f32 %v5128_v50, %v5117_v6  ;;  %v5136_v30 = vmul.f32 %v5129_v8, %v5118_v40 }
 0xefd   :  { %v5068_v2 = vmul.f32 %v5536_v13, %v5067_v47 }
 0xefe   :  { %v5151_v60 = vadd.f32 %v5458_v58, %v5133_v46  ;;  %v5152_v56 = vadd.f32 %v5145_v57, %v5134_v16  ;;  %v5153_v26 = vadd.f32 %v5146_v32, %v5135_v17  ;;  %v5154_v34 = vadd.f32 %v5147_v51, %v5136_v30 }
 0xeff   :  { %v5072_v45 = vsel %vm5071_vm10, %v5536_v13, %v5068_v2 }
 0xf00   :  { %5160 = vst.msk [vmem:[#allocation28] sm:$0x3] %vm5159_vm8, %v5151_v60  ;;  %v5094_v27 = vperm.slane %v5072_v45, %v6856_v59  ;;  %v5098_v5 = vperm.slane %v5072_v45, %v6858_v55  ;;  %v5102_v48 = vperm.slane %v5072_v45, %v6860_v19  ;;  %v5106_v42 = vperm.slane %v5072_v45, %v6862_v1 }
 0xf01   :  { %5161 = vst.msk [vmem:[#allocation28 + $0x2] sm:$0x3] %vm5159_vm8, %v5152_v56 }
 0xf02   :  { %5162 = vst.msk [vmem:[#allocation28 + $0x4] sm:$0x3] %vm5159_vm8, %v5153_v26  ;;  %v5119_v62 = vmul.f32 %v5094_v27, %v7968_v28  ;;  %v5120_v20 = vmul.f32 %v5098_v5, %v7970_v11  ;;  %v5121_v49 = vmul.f32 %v5102_v48, %v7972_v37  ;;  %v5122_v25 = vmul.f32 %v5106_v42, %v7974_v36 }
 0xf03   :  { %5163 = vst.msk [vmem:[#allocation28 + $0x6] sm:$0x3] %vm5159_vm8, %v5154_v34 }
 0xf04   :  { %v5137_v59 = vmul.f32 %v5457_v44, %v5119_v62  ;;  %v5138_v55 = vmul.f32 %v5127_v52, %v5120_v20  ;;  %v5139_v19 = vmul.f32 %v5128_v50, %v5121_v49  ;;  %v5140_v23 = vmul.f32 %v5129_v8, %v5122_v25 }
 0xf06   :  { %v5155_v1 = vadd.f32 %v5458_v58, %v5137_v59  ;;  %v5156_v41 = vadd.f32 %v5145_v57, %v5138_v55  ;;  %v5157_v33 = vadd.f32 %v5146_v32, %v5139_v19  ;;  %v5158_v28 = vadd.f32 %v5147_v51, %v5140_v23 }
 0xf08   :  { %5164 = vst.msk [vmem:[#allocation28 + $0x8] sm:$0x3] %vm5159_vm8, %v5155_v1 }
 0xf09   :  { %5165 = vst.msk [vmem:[#allocation28 + $0xa] sm:$0x3] %vm5159_vm8, %v5156_v41 }
 0xf0a   :  { %5166 = vst.msk [vmem:[#allocation28 + $0xc] sm:$0x3] %vm5159_vm8, %v5157_v33 }
 0xf0b   :  { %5167 = vst.msk [vmem:[#allocation28 + $0xe] sm:$0x3] %vm5159_vm8, %v5158_v28 }
 0xf0c   :  { %5952 = shalt.err (!%p5949_p0)
}
 0xf0d   :  { %5180 = dma.vmem_to_hbm [thread:$0]  %s5173_s14, 256, %s5175_s8, [#allocation4], %s6004_s26, %s6004_s26, %s6005_s28  }
 0xf0e   :  { %5971 = dma.done.wait [#allocation4], 256  }
 0xf0f   :  { %5972 = vsyncadd [#allocation4], 4294967040 }
 0xf10   :  { %5185 = vsyncpa [#allocation3], 1 }
 0xf11   :  { %5186 = vsyncpa [#allocation6], 1 }
 0xf12   :  { %5187 = vsyncpa [#allocation9], 1 }
 0xf13   :  { %5188 = vsyncpa [#allocation12], 1 }
 0xf14   :  { %5189 = vsyncpa [#allocation15], 1 }
 0xf15   :  { %5190 = vsyncpa [#allocation18], 1 }
 0xf16   :  { %5191 = vsyncpa [#allocation21], 1 }
 0xf17   :  { %5192 = vsyncpa [#allocation24], 1 }
 0xf18   :  { %5193 = vsyncpa [#allocation27], 1 }
 0xf19   :  { %5194 = vsyncpa [#allocation4], 1 }

</bundles_post_ra>
